<compile_context>
chip_gen: v7x
topology: tpu7x:2x2x1
jax: 0.10.0
libtpu: 0.0.40
codegen_flags: <defaults>
</compile_context>

<pallas_src>
import functools

import jax
import jax.numpy as jnp
from jax import lax
from jax.experimental import pallas as pl
from jax.experimental.pallas import tpu as pltpu

F32 = jnp.float32
BF16 = jnp.bfloat16
VMEM_SPEC = pl.BlockSpec(memory_space=pltpu.MemorySpace.VMEM)


def _round_up(v, m):
    return (v + m - 1) // m * m


# ----------------------------------------------------------------------------- kernel

def _gatnet_kernel(*refs, num_graphs, n_real, slope, eps, steps):
    """Fully fused GATNet forward.

    refs = [x, ea, src_col, dst_col, dst_row, batch_col, batch_row,
            (wlr, blr, we, att, hsum, hexp, bias, gamma, beta) * n_layers,
            gate_w, gate_b, lstm_w, lstm_b, w1, b1, w2, b2, w3, b3, w4, b4, out]
    """
    x_ref, ea_ref, src_ref, dstc_ref, dstr_ref, batc_ref, batr_ref = refs[:7]
    out_ref = refs[-1]
    (gw_ref, gb_ref, lw_ref, lb_ref,
     w1_ref, b1_ref, w2_ref, b2_ref, w3_ref, b3_ref, w4_ref, b4_ref) = refs[-13:-1]
    layer_refs = refs[7:-13]
    n_layers = len(layer_refs) // 9

    x = x_ref[...]                                  # (N, Fin)  f32
    ea = ea_ref[...]                                # (E, Fe)   f32
    n_pad, e_pad = x.shape[0], ea.shape[0]

    # ---- build 0/1 gather / scatter operators in-kernel (bf16, no HBM traffic) ----
    node_iota_en = lax.broadcasted_iota(jnp.int32, (e_pad, n_pad), 1)
    gsrc = jnp.where(src_ref[...] == node_iota_en, 1.0, 0.0).astype(BF16)    # (E, N)
    gdst = jnp.where(dstc_ref[...] == node_iota_en, 1.0, 0.0).astype(BF16)   # (E, N)
    node_iota_ne = lax.broadcasted_iota(jnp.int32, (n_pad, e_pad), 0)
    scat = jnp.where(dstr_ref[...] == node_iota_ne, 1.0, 0.0).astype(BF16)   # (N, E)

    # pad-node mask (pad nodes carry batch id == num_graphs) for BatchNorm statistics
    batc = batc_ref[...]                                                     # (N, 1) i32
    nmask = jnp.where(batc < num_graphs, 1.0, 0.0)                           # (N, 1) f32
    inv_n = jnp.float32(1.0 / n_real)

    # ------------------------------ GATv2 stack ------------------------------
    for li in range(n_layers):
        (wlr_ref, blr_ref, we_ref, att_ref, hsum_ref, hexp_ref,
         bias_ref, gamma_ref, beta_ref) = layer_refs[9 * li: 9 * (li + 1)]
        hc = hsum_ref.shape[0]                      # heads * per-head channels

        # fused lin_l | lin_r matmul, then split columns (f32, small K/N)
        xlr = jnp.dot(x, wlr_ref[...], preferred_element_type=jnp.float32) + blr_ref[...]
        xl, xr = xlr[:, :hc], xlr[:, hc:]
        el = jnp.dot(ea, we_ref[...], preferred_element_type=jnp.float32)    # lin_edge

        # gathers to edges: bf16 0/1 operator x bf16 features, f32 accumulation
        xl_src = jnp.dot(gsrc, xl.astype(BF16), preferred_element_type=jnp.float32)  # (E, HC)
        xr_dst = jnp.dot(gdst, xr.astype(BF16), preferred_element_type=jnp.float32)  # (E, HC)

        g = xl_src + xr_dst + el
        g = jnp.where(g > 0, g, slope * g)          # LeakyReLU(0.2)

        # per-head attention logits via block-diagonal reducer
        s = jnp.dot(g * att_ref[...], hsum_ref[...],
                    preferred_element_type=jnp.float32)                       # (E, H)
        s = s - jnp.max(s, axis=0, keepdims=True)   # global per-head shift (shift-exact)
        p = jnp.exp(s)                                                        # (E, H)
        p_hc = jnp.dot(p, hexp_ref[...], preferred_element_type=jnp.float32)  # (E, HC)

        # fused num/den segment sum: ONE pass over the (N, E) operator
        packed = jnp.concatenate([xl_src * p_hc, p_hc], axis=-1).astype(BF16)  # (E, 2HC)
        acc = jnp.dot(scat, packed, preferred_element_type=jnp.float32)        # (N, 2HC)
        num, den = acc[:, :hc], acc[:, hc:]
        agg = num * pl.reciprocal(jnp.maximum(den, 1e-20), approx=True)

        # epilogue: conv bias -> ELU -> BatchNorm1d (batch stats, pad rows masked out)
        y = agg + bias_ref[...]
        yneg = jnp.minimum(y, 0.0)
        elu_neg = jnp.where(yneg > -1e-4, yneg + 0.5 * yneg * yneg,
                            jnp.exp(yneg) - 1.0)    # stable expm1
        y = jnp.where(y > 0, y, elu_neg)

        mu = jnp.sum(y * nmask, axis=0, keepdims=True) * inv_n
        d = (y - mu) * nmask
        var = jnp.sum(d * d, axis=0, keepdims=True) * inv_n
        x = (y - mu) * lax.rsqrt(var + eps) * gamma_ref[...] + beta_ref[...]

    # ------------------------------ graph-level head ------------------------------
    nb = num_graphs
    c = x.shape[1]

    giota_bn = lax.broadcasted_iota(jnp.int32, (nb, n_pad), 0)
    P = jnp.where(batr_ref[...] == giota_bn, 1.0, 0.0).astype(BF16)           # (B, N)
    giota_nb = lax.broadcasted_iota(jnp.int32, (n_pad, nb), 1)
    PT = jnp.where(batc == giota_nb, 1.0, 0.0).astype(BF16)                   # (N, B)
    cnt = jnp.sum(jnp.where(batr_ref[...] == giota_bn, 1.0, 0.0),
                  axis=1, keepdims=True)                                      # (B, 1) exact

    # attentional-aggregation gate (scores never leave VMEM)
    gate = jnp.dot(x, gw_ref[...], preferred_element_type=jnp.float32) + gb_ref[...]  # (N, 1)
    pg = jnp.exp(gate - jnp.max(gate, keepdims=True))

    # fused sum + attentional pooling: one matmul over the (B, N) operator
    pool_in = jnp.concatenate([x, pg * x, pg], axis=-1).astype(BF16)          # (N, 2C+1)
    pooled = jnp.dot(P, pool_in, preferred_element_type=jnp.float32)          # (B, 2C+1)
    x_sum = pooled[:, :c]
    x_att = pooled[:, c:2 * c] / jnp.maximum(pooled[:, 2 * c:2 * c + 1], 1e-20)
    x_mean = x_sum / cnt                                                      # exact divide

    # max pooling: per-graph masked sublane reduction (pad nodes excluded by batch id)
    neg = jnp.float32(-3.0e38)
    rows = [jnp.max(jnp.where(batc == b, x, neg), axis=0, keepdims=True)
            for b in range(nb)]
    x_max = jnp.concatenate(rows, axis=0) if nb > 1 else rows[0]

    # Set2Set(processing_steps=steps); fused LSTM matmul + fused attend matmul per step
    lw = lw_ref[...]                                 # (3C, 4C)  = [wih; whh] stacked
    lb = lb_ref[...]
    h = jnp.zeros((nb, c), jnp.float32)
    cell = jnp.zeros((nb, c), jnp.float32)
    q_star = jnp.zeros((nb, 2 * c), jnp.float32)
    for _ in range(steps):
        gates = jnp.dot(jnp.concatenate([q_star, h], axis=-1), lw,
                        preferred_element_type=jnp.float32) + lb
        i = jax.nn.sigmoid(gates[:, 0 * c:1 * c])
        f = jax.nn.sigmoid(gates[:, 1 * c:2 * c])
        gg = jnp.tanh(gates[:, 2 * c:3 * c])
        o = jax.nn.sigmoid(gates[:, 3 * c:4 * c])
        cell = f * cell + i * gg
        h = o * jnp.tanh(cell)
        q_nodes = jnp.dot(PT, h.astype(BF16), preferred_element_type=jnp.float32)  # (N, C)
        e = jnp.sum(x * q_nodes, axis=-1, keepdims=True)                            # (N, 1)
        pe = jnp.exp(e - jnp.max(e, keepdims=True))
        att_in = jnp.concatenate([pe * x, pe], axis=-1).astype(BF16)                # (N, C+1)
        agg2 = jnp.dot(P, att_in, preferred_element_type=jnp.float32)               # (B, C+1)
        r = agg2[:, :c] / jnp.maximum(agg2[:, c:], 1e-20)
        q_star = jnp.concatenate([h, r], axis=-1)

    # concat order matches the PyTorch module: [sum | max | mean | att | set2set]
    feats = jnp.concatenate([x_sum, x_max, x_mean, x_att, q_star], axis=-1)

    y = jnp.maximum(jnp.dot(feats, w1_ref[...], preferred_element_type=jnp.float32) + b1_ref[...], 0.0)
    y = jnp.maximum(jnp.dot(y, w2_ref[...], preferred_element_type=jnp.float32) + b2_ref[...], 0.0)
    y = jnp.maximum(jnp.dot(y, w3_ref[...], preferred_element_type=jnp.float32) + b3_ref[...], 0.0)
    out_ref[...] = jnp.dot(y, w4_ref[...], preferred_element_type=jnp.float32) + b4_ref[...]


# ----------------------------------------------------------------------------- model glue

def make_params(key, in_channels, hidden_channels, out_channels, edge_attr_dim,
                num_heads, num_layers):
    def nrm(k, shape, scale):
        return jax.random.normal(k, shape, F32) * scale

    kiter = iter(jax.random.split(key, 64))
    params = {"gat": []}
    cur_in = in_channels
    for i in range(num_layers):
        last = (i == num_layers - 1)
        heads = 1 if last else num_heads
        layer_out = out_channels if last else hidden_channels
        ch = layer_out if last else layer_out // heads     # per-head channels
        hc = heads * ch
        eye_h = jnp.eye(heads, dtype=F32)
        hexp = jnp.repeat(eye_h, ch, axis=1)                # (H, H*C) per-head expander
        lp = {
            "wlr": nrm(next(kiter), (cur_in, 2 * hc), 0.2),   # [lin_l | lin_r] fused
            "blr": nrm(next(kiter), (1, 2 * hc), 0.05),
            "we": nrm(next(kiter), (edge_attr_dim, hc), 0.2),  # lin_edge (no bias)
            "att": nrm(next(kiter), (1, hc), 0.2),
            "hsum": hexp.T,                                   # (H*C, H) block-diag reducer
            "hexp": hexp,                                     # (H, H*C)
            "bias": nrm(next(kiter), (1, layer_out), 0.05),
            "gamma": jnp.ones((1, layer_out), F32),
            "beta": jnp.zeros((1, layer_out), F32),
        }
        params["gat"].append(lp)
        cur_in = layer_out

    # AttentionalAggregation gate_nn: Linear(out_channels, 1)
    params["gate_w"] = nrm(next(kiter), (out_channels, 1), 0.2)
    params["gate_b"] = nrm(next(kiter), (1, 1), 0.05)

    # Set2Set LSTM(input=2C, hidden=C): stacked [wih; whh] -> one fused matmul per step
    c = cur_in
    params["lstm_w"] = nrm(next(kiter), (3 * c, 4 * c), 0.2)
    params["lstm_b"] = nrm(next(kiter), (1, 4 * c), 0.05)

    dims = [3 * c + 3 * out_channels, 128, 64, 32, 1]
    params["mlp"] = [(nrm(next(kiter), (a, b), 0.15), nrm(next(kiter), (1, b), 0.05))
                     for a, b in zip(dims[:-1], dims[1:])]
    return params


@functools.partial(jax.jit, static_argnames=("num_graphs",))
def gatnet_forward(params, x, edge_index, edge_attr, batch, num_graphs):
    n_real = x.shape[0]
    e0 = edge_index.shape[1]
    src, dst = edge_index[0], edge_index[1]
    node_ids = jnp.arange(n_real, dtype=src.dtype)

    # GATv2Conv default preprocessing: add self loops, edge_attr fill_value='mean'
    d0 = (dst[None, :] == node_ids[:, None]).astype(F32)              # (N, E0)
    cnt0 = jnp.maximum(jnp.sum(d0, axis=1, keepdims=True), 1.0)
    loop_attr = (d0 @ edge_attr) / cnt0                               # mean of incoming attrs
    src_full = jnp.concatenate([src, node_ids]).astype(jnp.int32)
    dst_full = jnp.concatenate([dst, node_ids]).astype(jnp.int32)
    ea_full = jnp.concatenate([edge_attr, loop_attr], axis=0)

    # pad N/E to the 8-sublane grain; pad edges target a pad node; pad nodes get
    # batch id == num_graphs (excluded from pooling and from masked BatchNorm stats)
    e_real = e0 + n_real
    n_pad = _round_up(n_real, 8)
    e_pad = _round_up(e_real, 8)
    if e_pad > e_real and n_pad == n_real:
        n_pad += 8
    dump = jnp.int32(n_real)                                          # first pad node

    x_p = jnp.pad(x, ((0, n_pad - n_real), (0, 0)))
    ea_p = jnp.pad(ea_full, ((0, e_pad - e_real), (0, 0)))
    src_p = jnp.concatenate([src_full, jnp.full((e_pad - e_real,), dump, jnp.int32)])
    dst_p = jnp.concatenate([dst_full, jnp.full((e_pad - e_real,), dump, jnp.int32)])
    bat_p = jnp.concatenate([batch.astype(jnp.int32),
                             jnp.full((n_pad - n_real,), num_graphs, jnp.int32)])

    flat = [x_p, ea_p,
            src_p[:, None], dst_p[:, None], dst_p[None, :],
            bat_p[:, None], bat_p[None, :]]
    for lp in params["gat"]:
        flat.extend([lp["wlr"], lp["blr"], lp["we"], lp["att"], lp["hsum"], lp["hexp"],
                     lp["bias"], lp["gamma"], lp["beta"]])
    flat.extend([params["gate_w"], params["gate_b"], params["lstm_w"], params["lstm_b"]])
    for w, b in params["mlp"]:
        flat.extend([w, b])

    kern = functools.partial(_gatnet_kernel, num_graphs=num_graphs, n_real=n_real,
                             slope=0.2, eps=1e-5, steps=3)
    y = pl.pallas_call(
        kern,
        out_shape=jax.ShapeDtypeStruct((num_graphs, 1), F32),
        in_specs=[VMEM_SPEC] * len(flat),
        out_specs=VMEM_SPEC,
        compiler_params=pltpu.CompilerParams(vmem_limit_bytes=48 * 1024 * 1024),
    )(*flat)
    return y[:, 0]


# ----------------------------------------------------------------------------- main

if __name__ == "__main__":
    key = jax.random.PRNGKey(0)
    k_x, k_e, k_p = jax.random.split(key, 3)

    in_channels, hidden_channels, out_channels = 8, 16, 8
    edge_attr_dim, num_heads, num_layers = 4, 2, 3
    num_graphs, nodes_per_graph = 3, 4
    n_nodes = num_graphs * nodes_per_graph

    batch = jnp.repeat(jnp.arange(num_graphs, dtype=jnp.int32), nodes_per_graph)

    src_list, dst_list = [], []
    for g in range(num_graphs):
        base = g * nodes_per_graph
        for j in range(nodes_per_graph):
            a = base + j
            bnode = base + (j + 1) % nodes_per_graph
            src_list += [a, bnode]
            dst_list += [bnode, a]
    edge_index = jnp.array([src_list, dst_list], dtype=jnp.int32)     # (2, 24)

    x = jax.random.normal(k_x, (n_nodes, in_channels), F32)
    edge_attr = jax.random.normal(k_e, (edge_index.shape[1], edge_attr_dim), F32)

    params = make_params(k_p, in_channels, hidden_channels, out_channels,
                         edge_attr_dim, num_heads, num_layers)

    out = gatnet_forward(params, x, edge_index, edge_attr, batch, num_graphs=num_graphs)
    out = jax.block_until_ready(out)

    assert out.shape == (num_graphs,)
    assert bool(jnp.all(jnp.isfinite(out)))
    print("KERNEL_OK")
</pallas_src>

<mosaic_0001>
module attributes {stable_mosaic.version = 11 : i64} {
  func.func @_gatnet_kernel(%arg0: memref<16x8xf32, #tpu.memory_space<vmem>>, %arg1: memref<40x4xf32, #tpu.memory_space<vmem>>, %arg2: memref<40x1xi32, #tpu.memory_space<vmem>>, %arg3: memref<40x1xi32, #tpu.memory_space<vmem>>, %arg4: memref<1x40xi32, #tpu.memory_space<vmem>>, %arg5: memref<16x1xi32, #tpu.memory_space<vmem>>, %arg6: memref<1x16xi32, #tpu.memory_space<vmem>>, %arg7: memref<8x32xf32, #tpu.memory_space<vmem>>, %arg8: memref<1x32xf32, #tpu.memory_space<vmem>>, %arg9: memref<4x16xf32, #tpu.memory_space<vmem>>, %arg10: memref<1x16xf32, #tpu.memory_space<vmem>>, %arg11: memref<16x2xf32, #tpu.memory_space<vmem>>, %arg12: memref<2x16xf32, #tpu.memory_space<vmem>>, %arg13: memref<1x16xf32, #tpu.memory_space<vmem>>, %arg14: memref<1x16xf32, #tpu.memory_space<vmem>>, %arg15: memref<1x16xf32, #tpu.memory_space<vmem>>, %arg16: memref<16x32xf32, #tpu.memory_space<vmem>>, %arg17: memref<1x32xf32, #tpu.memory_space<vmem>>, %arg18: memref<4x16xf32, #tpu.memory_space<vmem>>, %arg19: memref<1x16xf32, #tpu.memory_space<vmem>>, %arg20: memref<16x2xf32, #tpu.memory_space<vmem>>, %arg21: memref<2x16xf32, #tpu.memory_space<vmem>>, %arg22: memref<1x16xf32, #tpu.memory_space<vmem>>, %arg23: memref<1x16xf32, #tpu.memory_space<vmem>>, %arg24: memref<1x16xf32, #tpu.memory_space<vmem>>, %arg25: memref<16x16xf32, #tpu.memory_space<vmem>>, %arg26: memref<1x16xf32, #tpu.memory_space<vmem>>, %arg27: memref<4x8xf32, #tpu.memory_space<vmem>>, %arg28: memref<1x8xf32, #tpu.memory_space<vmem>>, %arg29: memref<8x1xf32, #tpu.memory_space<vmem>>, %arg30: memref<1x8xf32, #tpu.memory_space<vmem>>, %arg31: memref<1x8xf32, #tpu.memory_space<vmem>>, %arg32: memref<1x8xf32, #tpu.memory_space<vmem>>, %arg33: memref<1x8xf32, #tpu.memory_space<vmem>>, %arg34: memref<8x1xf32, #tpu.memory_space<vmem>>, %arg35: memref<1x1xf32, #tpu.memory_space<vmem>>, %arg36: memref<24x32xf32, #tpu.memory_space<vmem>>, %arg37: memref<1x32xf32, #tpu.memory_space<vmem>>, %arg38: memref<48x128xf32, #tpu.memory_space<vmem>>, %arg39: memref<1x128xf32, #tpu.memory_space<vmem>>, %arg40: memref<128x64xf32, #tpu.memory_space<vmem>>, %arg41: memref<1x64xf32, #tpu.memory_space<vmem>>, %arg42: memref<64x32xf32, #tpu.memory_space<vmem>>, %arg43: memref<1x32xf32, #tpu.memory_space<vmem>>, %arg44: memref<32x1xf32, #tpu.memory_space<vmem>>, %arg45: memref<1x1xf32, #tpu.memory_space<vmem>>, %arg46: memref<3x1xf32, #tpu.memory_space<vmem>>) attributes {dimension_semantics = [], scalar_prefetch = 0 : i64, scratch_operands = 0 : i64, tpu.core_type = #tpu.core_type<tc>} {
    %c0 = arith.constant 0 : index
    %c0_0 = arith.constant 0 : index
    %0 = vector.load %arg0[%c0, %c0_0] : memref<16x8xf32, #tpu.memory_space<vmem>>, vector<16x8xf32>
    %c0_1 = arith.constant 0 : index
    %c0_2 = arith.constant 0 : index
    %1 = vector.load %arg1[%c0_1, %c0_2] : memref<40x4xf32, #tpu.memory_space<vmem>>, vector<40x4xf32>
    %2 = tpu.iota {dimensions = array<i32: 1>} : vector<40x16xi32>
    %c0_3 = arith.constant 0 : index
    %c0_4 = arith.constant 0 : index
    %3 = vector.load %arg2[%c0_3, %c0_4] : memref<40x1xi32, #tpu.memory_space<vmem>>, vector<40x1xi32>
    %4 = vector.broadcast %3 : vector<40x1xi32> to vector<40x16xi32>
    %5 = arith.cmpi eq, %4, %2 : vector<40x16xi32>
    %cst = arith.constant 1.000000e+00 : f32
    %cst_5 = arith.constant 0.000000e+00 : f32
    %6 = vector.broadcast %cst : f32 to vector<40x16xf32>
    %7 = vector.broadcast %cst_5 : f32 to vector<40x16xf32>
    %8 = arith.select %5, %6, %7 : vector<40x16xi1>, vector<40x16xf32>
    %9 = arith.truncf %8 : vector<40x16xf32> to vector<40x16xbf16>
    %c0_6 = arith.constant 0 : index
    %c0_7 = arith.constant 0 : index
    %10 = vector.load %arg3[%c0_6, %c0_7] : memref<40x1xi32, #tpu.memory_space<vmem>>, vector<40x1xi32>
    %11 = vector.broadcast %10 : vector<40x1xi32> to vector<40x16xi32>
    %12 = arith.cmpi eq, %11, %2 : vector<40x16xi32>
    %cst_8 = arith.constant 1.000000e+00 : f32
    %cst_9 = arith.constant 0.000000e+00 : f32
    %13 = vector.broadcast %cst_8 : f32 to vector<40x16xf32>
    %14 = vector.broadcast %cst_9 : f32 to vector<40x16xf32>
    %15 = arith.select %12, %13, %14 : vector<40x16xi1>, vector<40x16xf32>
    %16 = arith.truncf %15 : vector<40x16xf32> to vector<40x16xbf16>
    %17 = tpu.iota {dimensions = array<i32: 0>} : vector<16x40xi32>
    %c0_10 = arith.constant 0 : index
    %c0_11 = arith.constant 0 : index
    %18 = vector.load %arg4[%c0_10, %c0_11] : memref<1x40xi32, #tpu.memory_space<vmem>>, vector<1x40xi32>
    %19 = vector.broadcast %18 : vector<1x40xi32> to vector<16x40xi32>
    %20 = arith.cmpi eq, %19, %17 : vector<16x40xi32>
    %cst_12 = arith.constant 1.000000e+00 : f32
    %cst_13 = arith.constant 0.000000e+00 : f32
    %21 = vector.broadcast %cst_12 : f32 to vector<16x40xf32>
    %22 = vector.broadcast %cst_13 : f32 to vector<16x40xf32>
    %23 = arith.select %20, %21, %22 : vector<16x40xi1>, vector<16x40xf32>
    %24 = arith.truncf %23 : vector<16x40xf32> to vector<16x40xbf16>
    %c0_14 = arith.constant 0 : index
    %c0_15 = arith.constant 0 : index
    %25 = vector.load %arg5[%c0_14, %c0_15] : memref<16x1xi32, #tpu.memory_space<vmem>>, vector<16x1xi32>
    %c3_i32 = arith.constant 3 : i32
    %26 = vector.broadcast %c3_i32 : i32 to vector<16x1xi32>
    %27 = arith.cmpi slt, %25, %26 : vector<16x1xi32>
    %cst_16 = arith.constant 1.000000e+00 : f32
    %cst_17 = arith.constant 0.000000e+00 : f32
    %28 = vector.broadcast %cst_16 : f32 to vector<16x1xf32>
    %29 = vector.broadcast %cst_17 : f32 to vector<16x1xf32>
    %30 = arith.select %27, %28, %29 : vector<16x1xi1>, vector<16x1xf32>
    %c0_18 = arith.constant 0 : index
    %c0_19 = arith.constant 0 : index
    %31 = vector.load %arg7[%c0_18, %c0_19] : memref<8x32xf32, #tpu.memory_space<vmem>>, vector<8x32xf32>
    %cst_20 = arith.constant dense<0.000000e+00> : vector<16x32xf32>
    %32 = tpu.matmul %0, %31, %cst_20 {dimension_numbers = #tpu.dot_dimension_numbers<[1], [0], [0], [1], [0, 0, 1, 1], [], []>} : vector<16x8xf32>, vector<8x32xf32>, vector<16x32xf32> -> vector<16x32xf32>
    %c0_21 = arith.constant 0 : index
    %c0_22 = arith.constant 0 : index
    %33 = vector.load %arg8[%c0_21, %c0_22] : memref<1x32xf32, #tpu.memory_space<vmem>>, vector<1x32xf32>
    %34 = vector.broadcast %33 : vector<1x32xf32> to vector<16x32xf32>
    %35 = arith.addf %32, %34 : vector<16x32xf32>
    %36 = vector.extract_strided_slice %35 {offsets = [0, 0], sizes = [16, 16], strides = [1, 1]} : vector<16x32xf32> to vector<16x16xf32>
    %37 = vector.extract_strided_slice %35 {offsets = [0, 16], sizes = [16, 16], strides = [1, 1]} : vector<16x32xf32> to vector<16x16xf32>
    %c0_23 = arith.constant 0 : index
    %c0_24 = arith.constant 0 : index
    %38 = vector.load %arg9[%c0_23, %c0_24] : memref<4x16xf32, #tpu.memory_space<vmem>>, vector<4x16xf32>
    %cst_25 = arith.constant dense<0.000000e+00> : vector<40x16xf32>
    %39 = tpu.matmul %1, %38, %cst_25 {dimension_numbers = #tpu.dot_dimension_numbers<[1], [0], [0], [1], [0, 0, 1, 1], [], []>} : vector<40x4xf32>, vector<4x16xf32>, vector<40x16xf32> -> vector<40x16xf32>
    %40 = arith.truncf %36 : vector<16x16xf32> to vector<16x16xbf16>
    %cst_26 = arith.constant dense<0.000000e+00> : vector<40x16xf32>
    %41 = tpu.matmul %9, %40, %cst_26 {dimension_numbers = #tpu.dot_dimension_numbers<[1], [0], [0], [1], [0, 0, 1, 1], [], []>} : vector<40x16xbf16>, vector<16x16xbf16>, vector<40x16xf32> -> vector<40x16xf32>
    %42 = arith.truncf %37 : vector<16x16xf32> to vector<16x16xbf16>
    %cst_27 = arith.constant dense<0.000000e+00> : vector<40x16xf32>
    %43 = tpu.matmul %16, %42, %cst_27 {dimension_numbers = #tpu.dot_dimension_numbers<[1], [0], [0], [1], [0, 0, 1, 1], [], []>} : vector<40x16xbf16>, vector<16x16xbf16>, vector<40x16xf32> -> vector<40x16xf32>
    %44 = arith.addf %41, %43 : vector<40x16xf32>
    %45 = arith.addf %44, %39 : vector<40x16xf32>
    %cst_28 = arith.constant 0.000000e+00 : f32
    %46 = vector.broadcast %cst_28 : f32 to vector<40x16xf32>
    %47 = arith.cmpf ogt, %45, %46 : vector<40x16xf32>
    %cst_29 = arith.constant 2.000000e-01 : f32
    %48 = vector.broadcast %cst_29 : f32 to vector<40x16xf32>
    %49 = arith.mulf %48, %45 : vector<40x16xf32>
    %50 = arith.select %47, %45, %49 : vector<40x16xi1>, vector<40x16xf32>
    %c0_30 = arith.constant 0 : index
    %c0_31 = arith.constant 0 : index
    %51 = vector.load %arg10[%c0_30, %c0_31] : memref<1x16xf32, #tpu.memory_space<vmem>>, vector<1x16xf32>
    %52 = vector.broadcast %51 : vector<1x16xf32> to vector<40x16xf32>
    %53 = arith.mulf %50, %52 : vector<40x16xf32>
    %c0_32 = arith.constant 0 : index
    %c0_33 = arith.constant 0 : index
    %54 = vector.load %arg11[%c0_32, %c0_33] : memref<16x2xf32, #tpu.memory_space<vmem>>, vector<16x2xf32>
    %cst_34 = arith.constant dense<0.000000e+00> : vector<40x2xf32>
    %55 = tpu.matmul %53, %54, %cst_34 {dimension_numbers = #tpu.dot_dimension_numbers<[1], [0], [0], [1], [0, 0, 1, 1], [], []>} : vector<40x16xf32>, vector<16x2xf32>, vector<40x2xf32> -> vector<40x2xf32>
    %cst_35 = arith.constant dense<0xFF800000> : vector<2xf32>
    %56 = vector.multi_reduction <maximumf>, %55, %cst_35 [0] : vector<40x2xf32> to vector<2xf32>
    %57 = vector.shape_cast %56 : vector<2xf32> to vector<1x2xf32>
    %58 = vector.broadcast %57 : vector<1x2xf32> to vector<40x2xf32>
    %59 = arith.subf %55, %58 : vector<40x2xf32>
    %60 = math.exp %59 : vector<40x2xf32>
    %c0_36 = arith.constant 0 : index
    %c0_37 = arith.constant 0 : index
    %61 = vector.load %arg12[%c0_36, %c0_37] : memref<2x16xf32, #tpu.memory_space<vmem>>, vector<2x16xf32>
    %cst_38 = arith.constant dense<0.000000e+00> : vector<40x16xf32>
    %62 = tpu.matmul %60, %61, %cst_38 {dimension_numbers = #tpu.dot_dimension_numbers<[1], [0], [0], [1], [0, 0, 1, 1], [], []>} : vector<40x2xf32>, vector<2x16xf32>, vector<40x16xf32> -> vector<40x16xf32>
    %63 = arith.mulf %41, %62 : vector<40x16xf32>
    %64 = tpu.concatenate %63, %62 in 1 : vector<40x16xf32>, vector<40x16xf32> -> vector<40x32xf32>
    %65 = arith.truncf %64 : vector<40x32xf32> to vector<40x32xbf16>
    %cst_39 = arith.constant dense<0.000000e+00> : vector<16x32xf32>
    %66 = tpu.matmul %24, %65, %cst_39 {dimension_numbers = #tpu.dot_dimension_numbers<[1], [0], [0], [1], [0, 0, 1, 1], [], []>} : vector<16x40xbf16>, vector<40x32xbf16>, vector<16x32xf32> -> vector<16x32xf32>
    %67 = vector.extract_strided_slice %66 {offsets = [0, 0], sizes = [16, 16], strides = [1, 1]} : vector<16x32xf32> to vector<16x16xf32>
    %68 = vector.extract_strided_slice %66 {offsets = [0, 16], sizes = [16, 16], strides = [1, 1]} : vector<16x32xf32> to vector<16x16xf32>
    %cst_40 = arith.constant 9.99999968E-21 : f32
    %69 = vector.broadcast %cst_40 : f32 to vector<16x16xf32>
    %70 = arith.maximumf %68, %69 : vector<16x16xf32>
    %71 = tpu.reciprocal %70 {approx = true} : vector<16x16xf32> -> vector<16x16xf32>
    %72 = arith.mulf %67, %71 : vector<16x16xf32>
    %c0_41 = arith.constant 0 : index
    %c0_42 = arith.constant 0 : index
    %73 = vector.load %arg13[%c0_41, %c0_42] : memref<1x16xf32, #tpu.memory_space<vmem>>, vector<1x16xf32>
    %74 = vector.broadcast %73 : vector<1x16xf32> to vector<16x16xf32>
    %75 = arith.addf %72, %74 : vector<16x16xf32>
    %cst_43 = arith.constant 0.000000e+00 : f32
    %76 = vector.broadcast %cst_43 : f32 to vector<16x16xf32>
    %77 = arith.minimumf %75, %76 : vector<16x16xf32>
    %cst_44 = arith.constant -9.99999974E-5 : f32
    %78 = vector.broadcast %cst_44 : f32 to vector<16x16xf32>
    %79 = arith.cmpf ogt, %77, %78 : vector<16x16xf32>
    %cst_45 = arith.constant 5.000000e-01 : f32
    %80 = vector.broadcast %cst_45 : f32 to vector<16x16xf32>
    %81 = arith.mulf %80, %77 : vector<16x16xf32>
    %82 = arith.mulf %81, %77 : vector<16x16xf32>
    %83 = arith.addf %77, %82 : vector<16x16xf32>
    %84 = math.exp %77 : vector<16x16xf32>
    %cst_46 = arith.constant 1.000000e+00 : f32
    %85 = vector.broadcast %cst_46 : f32 to vector<16x16xf32>
    %86 = arith.subf %84, %85 : vector<16x16xf32>
    %87 = arith.select %79, %83, %86 : vector<16x16xi1>, vector<16x16xf32>
    %cst_47 = arith.constant 0.000000e+00 : f32
    %88 = vector.broadcast %cst_47 : f32 to vector<16x16xf32>
    %89 = arith.cmpf ogt, %75, %88 : vector<16x16xf32>
    %90 = arith.select %89, %75, %87 : vector<16x16xi1>, vector<16x16xf32>
    %91 = vector.broadcast %30 : vector<16x1xf32> to vector<16x16xf32>
    %92 = arith.mulf %90, %91 : vector<16x16xf32>
    %cst_48 = arith.constant dense<0.000000e+00> : vector<16xf32>
    %93 = vector.multi_reduction <add>, %92, %cst_48 [0] : vector<16x16xf32> to vector<16xf32>
    %94 = vector.shape_cast %93 : vector<16xf32> to vector<1x16xf32>
    %cst_49 = arith.constant 0.0833333358 : f32
    %95 = vector.broadcast %cst_49 : f32 to vector<1x16xf32>
    %96 = arith.mulf %94, %95 : vector<1x16xf32>
    %97 = vector.broadcast %96 : vector<1x16xf32> to vector<16x16xf32>
    %98 = arith.subf %90, %97 : vector<16x16xf32>
    %99 = vector.broadcast %30 : vector<16x1xf32> to vector<16x16xf32>
    %100 = arith.mulf %98, %99 : vector<16x16xf32>
    %101 = arith.mulf %100, %100 : vector<16x16xf32>
    %cst_50 = arith.constant dense<0.000000e+00> : vector<16xf32>
    %102 = vector.multi_reduction <add>, %101, %cst_50 [0] : vector<16x16xf32> to vector<16xf32>
    %103 = vector.shape_cast %102 : vector<16xf32> to vector<1x16xf32>
    %cst_51 = arith.constant 0.0833333358 : f32
    %104 = vector.broadcast %cst_51 : f32 to vector<1x16xf32>
    %105 = arith.mulf %103, %104 : vector<1x16xf32>
    %106 = vector.broadcast %96 : vector<1x16xf32> to vector<16x16xf32>
    %107 = arith.subf %90, %106 : vector<16x16xf32>
    %cst_52 = arith.constant 9.99999974E-6 : f32
    %108 = vector.broadcast %cst_52 : f32 to vector<1x16xf32>
    %109 = arith.addf %105, %108 : vector<1x16xf32>
    %110 = math.rsqrt %109 : vector<1x16xf32>
    %111 = vector.broadcast %110 : vector<1x16xf32> to vector<16x16xf32>
    %112 = arith.mulf %107, %111 : vector<16x16xf32>
    %c0_53 = arith.constant 0 : index
    %c0_54 = arith.constant 0 : index
    %113 = vector.load %arg14[%c0_53, %c0_54] : memref<1x16xf32, #tpu.memory_space<vmem>>, vector<1x16xf32>
    %114 = vector.broadcast %113 : vector<1x16xf32> to vector<16x16xf32>
    %115 = arith.mulf %112, %114 : vector<16x16xf32>
    %c0_55 = arith.constant 0 : index
    %c0_56 = arith.constant 0 : index
    %116 = vector.load %arg15[%c0_55, %c0_56] : memref<1x16xf32, #tpu.memory_space<vmem>>, vector<1x16xf32>
    %117 = vector.broadcast %116 : vector<1x16xf32> to vector<16x16xf32>
    %118 = arith.addf %115, %117 : vector<16x16xf32>
    %c0_57 = arith.constant 0 : index
    %c0_58 = arith.constant 0 : index
    %119 = vector.load %arg16[%c0_57, %c0_58] : memref<16x32xf32, #tpu.memory_space<vmem>>, vector<16x32xf32>
    %cst_59 = arith.constant dense<0.000000e+00> : vector<16x32xf32>
    %120 = tpu.matmul %118, %119, %cst_59 {dimension_numbers = #tpu.dot_dimension_numbers<[1], [0], [0], [1], [0, 0, 1, 1], [], []>} : vector<16x16xf32>, vector<16x32xf32>, vector<16x32xf32> -> vector<16x32xf32>
    %c0_60 = arith.constant 0 : index
    %c0_61 = arith.constant 0 : index
    %121 = vector.load %arg17[%c0_60, %c0_61] : memref<1x32xf32, #tpu.memory_space<vmem>>, vector<1x32xf32>
    %122 = vector.broadcast %121 : vector<1x32xf32> to vector<16x32xf32>
    %123 = arith.addf %120, %122 : vector<16x32xf32>
    %124 = vector.extract_strided_slice %123 {offsets = [0, 0], sizes = [16, 16], strides = [1, 1]} : vector<16x32xf32> to vector<16x16xf32>
    %125 = vector.extract_strided_slice %123 {offsets = [0, 16], sizes = [16, 16], strides = [1, 1]} : vector<16x32xf32> to vector<16x16xf32>
    %c0_62 = arith.constant 0 : index
    %c0_63 = arith.constant 0 : index
    %126 = vector.load %arg18[%c0_62, %c0_63] : memref<4x16xf32, #tpu.memory_space<vmem>>, vector<4x16xf32>
    %cst_64 = arith.constant dense<0.000000e+00> : vector<40x16xf32>
    %127 = tpu.matmul %1, %126, %cst_64 {dimension_numbers = #tpu.dot_dimension_numbers<[1], [0], [0], [1], [0, 0, 1, 1], [], []>} : vector<40x4xf32>, vector<4x16xf32>, vector<40x16xf32> -> vector<40x16xf32>
    %128 = arith.truncf %124 : vector<16x16xf32> to vector<16x16xbf16>
    %cst_65 = arith.constant dense<0.000000e+00> : vector<40x16xf32>
    %129 = tpu.matmul %9, %128, %cst_65 {dimension_numbers = #tpu.dot_dimension_numbers<[1], [0], [0], [1], [0, 0, 1, 1], [], []>} : vector<40x16xbf16>, vector<16x16xbf16>, vector<40x16xf32> -> vector<40x16xf32>
    %130 = arith.truncf %125 : vector<16x16xf32> to vector<16x16xbf16>
    %cst_66 = arith.constant dense<0.000000e+00> : vector<40x16xf32>
    %131 = tpu.matmul %16, %130, %cst_66 {dimension_numbers = #tpu.dot_dimension_numbers<[1], [0], [0], [1], [0, 0, 1, 1], [], []>} : vector<40x16xbf16>, vector<16x16xbf16>, vector<40x16xf32> -> vector<40x16xf32>
    %132 = arith.addf %129, %131 : vector<40x16xf32>
    %133 = arith.addf %132, %127 : vector<40x16xf32>
    %cst_67 = arith.constant 0.000000e+00 : f32
    %134 = vector.broadcast %cst_67 : f32 to vector<40x16xf32>
    %135 = arith.cmpf ogt, %133, %134 : vector<40x16xf32>
    %cst_68 = arith.constant 2.000000e-01 : f32
    %136 = vector.broadcast %cst_68 : f32 to vector<40x16xf32>
    %137 = arith.mulf %136, %133 : vector<40x16xf32>
    %138 = arith.select %135, %133, %137 : vector<40x16xi1>, vector<40x16xf32>
    %c0_69 = arith.constant 0 : index
    %c0_70 = arith.constant 0 : index
    %139 = vector.load %arg19[%c0_69, %c0_70] : memref<1x16xf32, #tpu.memory_space<vmem>>, vector<1x16xf32>
    %140 = vector.broadcast %139 : vector<1x16xf32> to vector<40x16xf32>
    %141 = arith.mulf %138, %140 : vector<40x16xf32>
    %c0_71 = arith.constant 0 : index
    %c0_72 = arith.constant 0 : index
    %142 = vector.load %arg20[%c0_71, %c0_72] : memref<16x2xf32, #tpu.memory_space<vmem>>, vector<16x2xf32>
    %cst_73 = arith.constant dense<0.000000e+00> : vector<40x2xf32>
    %143 = tpu.matmul %141, %142, %cst_73 {dimension_numbers = #tpu.dot_dimension_numbers<[1], [0], [0], [1], [0, 0, 1, 1], [], []>} : vector<40x16xf32>, vector<16x2xf32>, vector<40x2xf32> -> vector<40x2xf32>
    %cst_74 = arith.constant dense<0xFF800000> : vector<2xf32>
    %144 = vector.multi_reduction <maximumf>, %143, %cst_74 [0] : vector<40x2xf32> to vector<2xf32>
    %145 = vector.shape_cast %144 : vector<2xf32> to vector<1x2xf32>
    %146 = vector.broadcast %145 : vector<1x2xf32> to vector<40x2xf32>
    %147 = arith.subf %143, %146 : vector<40x2xf32>
    %148 = math.exp %147 : vector<40x2xf32>
    %c0_75 = arith.constant 0 : index
    %c0_76 = arith.constant 0 : index
    %149 = vector.load %arg21[%c0_75, %c0_76] : memref<2x16xf32, #tpu.memory_space<vmem>>, vector<2x16xf32>
    %cst_77 = arith.constant dense<0.000000e+00> : vector<40x16xf32>
    %150 = tpu.matmul %148, %149, %cst_77 {dimension_numbers = #tpu.dot_dimension_numbers<[1], [0], [0], [1], [0, 0, 1, 1], [], []>} : vector<40x2xf32>, vector<2x16xf32>, vector<40x16xf32> -> vector<40x16xf32>
    %151 = arith.mulf %129, %150 : vector<40x16xf32>
    %152 = tpu.concatenate %151, %150 in 1 : vector<40x16xf32>, vector<40x16xf32> -> vector<40x32xf32>
    %153 = arith.truncf %152 : vector<40x32xf32> to vector<40x32xbf16>
    %cst_78 = arith.constant dense<0.000000e+00> : vector<16x32xf32>
    %154 = tpu.matmul %24, %153, %cst_78 {dimension_numbers = #tpu.dot_dimension_numbers<[1], [0], [0], [1], [0, 0, 1, 1], [], []>} : vector<16x40xbf16>, vector<40x32xbf16>, vector<16x32xf32> -> vector<16x32xf32>
    %155 = vector.extract_strided_slice %154 {offsets = [0, 0], sizes = [16, 16], strides = [1, 1]} : vector<16x32xf32> to vector<16x16xf32>
    %156 = vector.extract_strided_slice %154 {offsets = [0, 16], sizes = [16, 16], strides = [1, 1]} : vector<16x32xf32> to vector<16x16xf32>
    %cst_79 = arith.constant 9.99999968E-21 : f32
    %157 = vector.broadcast %cst_79 : f32 to vector<16x16xf32>
    %158 = arith.maximumf %156, %157 : vector<16x16xf32>
    %159 = tpu.reciprocal %158 {approx = true} : vector<16x16xf32> -> vector<16x16xf32>
    %160 = arith.mulf %155, %159 : vector<16x16xf32>
    %c0_80 = arith.constant 0 : index
    %c0_81 = arith.constant 0 : index
    %161 = vector.load %arg22[%c0_80, %c0_81] : memref<1x16xf32, #tpu.memory_space<vmem>>, vector<1x16xf32>
    %162 = vector.broadcast %161 : vector<1x16xf32> to vector<16x16xf32>
    %163 = arith.addf %160, %162 : vector<16x16xf32>
    %cst_82 = arith.constant 0.000000e+00 : f32
    %164 = vector.broadcast %cst_82 : f32 to vector<16x16xf32>
    %165 = arith.minimumf %163, %164 : vector<16x16xf32>
    %cst_83 = arith.constant -9.99999974E-5 : f32
    %166 = vector.broadcast %cst_83 : f32 to vector<16x16xf32>
    %167 = arith.cmpf ogt, %165, %166 : vector<16x16xf32>
    %cst_84 = arith.constant 5.000000e-01 : f32
    %168 = vector.broadcast %cst_84 : f32 to vector<16x16xf32>
    %169 = arith.mulf %168, %165 : vector<16x16xf32>
    %170 = arith.mulf %169, %165 : vector<16x16xf32>
    %171 = arith.addf %165, %170 : vector<16x16xf32>
    %172 = math.exp %165 : vector<16x16xf32>
    %cst_85 = arith.constant 1.000000e+00 : f32
    %173 = vector.broadcast %cst_85 : f32 to vector<16x16xf32>
    %174 = arith.subf %172, %173 : vector<16x16xf32>
    %175 = arith.select %167, %171, %174 : vector<16x16xi1>, vector<16x16xf32>
    %cst_86 = arith.constant 0.000000e+00 : f32
    %176 = vector.broadcast %cst_86 : f32 to vector<16x16xf32>
    %177 = arith.cmpf ogt, %163, %176 : vector<16x16xf32>
    %178 = arith.select %177, %163, %175 : vector<16x16xi1>, vector<16x16xf32>
    %179 = vector.broadcast %30 : vector<16x1xf32> to vector<16x16xf32>
    %180 = arith.mulf %178, %179 : vector<16x16xf32>
    %cst_87 = arith.constant dense<0.000000e+00> : vector<16xf32>
    %181 = vector.multi_reduction <add>, %180, %cst_87 [0] : vector<16x16xf32> to vector<16xf32>
    %182 = vector.shape_cast %181 : vector<16xf32> to vector<1x16xf32>
    %cst_88 = arith.constant 0.0833333358 : f32
    %183 = vector.broadcast %cst_88 : f32 to vector<1x16xf32>
    %184 = arith.mulf %182, %183 : vector<1x16xf32>
    %185 = vector.broadcast %184 : vector<1x16xf32> to vector<16x16xf32>
    %186 = arith.subf %178, %185 : vector<16x16xf32>
    %187 = vector.broadcast %30 : vector<16x1xf32> to vector<16x16xf32>
    %188 = arith.mulf %186, %187 : vector<16x16xf32>
    %189 = arith.mulf %188, %188 : vector<16x16xf32>
    %cst_89 = arith.constant dense<0.000000e+00> : vector<16xf32>
    %190 = vector.multi_reduction <add>, %189, %cst_89 [0] : vector<16x16xf32> to vector<16xf32>
    %191 = vector.shape_cast %190 : vector<16xf32> to vector<1x16xf32>
    %cst_90 = arith.constant 0.0833333358 : f32
    %192 = vector.broadcast %cst_90 : f32 to vector<1x16xf32>
    %193 = arith.mulf %191, %192 : vector<1x16xf32>
    %194 = vector.broadcast %184 : vector<1x16xf32> to vector<16x16xf32>
    %195 = arith.subf %178, %194 : vector<16x16xf32>
    %cst_91 = arith.constant 9.99999974E-6 : f32
    %196 = vector.broadcast %cst_91 : f32 to vector<1x16xf32>
    %197 = arith.addf %193, %196 : vector<1x16xf32>
    %198 = math.rsqrt %197 : vector<1x16xf32>
    %199 = vector.broadcast %198 : vector<1x16xf32> to vector<16x16xf32>
    %200 = arith.mulf %195, %199 : vector<16x16xf32>
    %c0_92 = arith.constant 0 : index
    %c0_93 = arith.constant 0 : index
    %201 = vector.load %arg23[%c0_92, %c0_93] : memref<1x16xf32, #tpu.memory_space<vmem>>, vector<1x16xf32>
    %202 = vector.broadcast %201 : vector<1x16xf32> to vector<16x16xf32>
    %203 = arith.mulf %200, %202 : vector<16x16xf32>
    %c0_94 = arith.constant 0 : index
    %c0_95 = arith.constant 0 : index
    %204 = vector.load %arg24[%c0_94, %c0_95] : memref<1x16xf32, #tpu.memory_space<vmem>>, vector<1x16xf32>
    %205 = vector.broadcast %204 : vector<1x16xf32> to vector<16x16xf32>
    %206 = arith.addf %203, %205 : vector<16x16xf32>
    %c0_96 = arith.constant 0 : index
    %c0_97 = arith.constant 0 : index
    %207 = vector.load %arg25[%c0_96, %c0_97] : memref<16x16xf32, #tpu.memory_space<vmem>>, vector<16x16xf32>
    %cst_98 = arith.constant dense<0.000000e+00> : vector<16x16xf32>
    %208 = tpu.matmul %206, %207, %cst_98 {dimension_numbers = #tpu.dot_dimension_numbers<[1], [0], [0], [1], [0, 0, 1, 1], [], []>} : vector<16x16xf32>, vector<16x16xf32>, vector<16x16xf32> -> vector<16x16xf32>
    %c0_99 = arith.constant 0 : index
    %c0_100 = arith.constant 0 : index
    %209 = vector.load %arg26[%c0_99, %c0_100] : memref<1x16xf32, #tpu.memory_space<vmem>>, vector<1x16xf32>
    %210 = vector.broadcast %209 : vector<1x16xf32> to vector<16x16xf32>
    %211 = arith.addf %208, %210 : vector<16x16xf32>
    %212 = vector.extract_strided_slice %211 {offsets = [0, 0], sizes = [16, 8], strides = [1, 1]} : vector<16x16xf32> to vector<16x8xf32>
    %213 = vector.extract_strided_slice %211 {offsets = [0, 8], sizes = [16, 8], strides = [1, 1]} : vector<16x16xf32> to vector<16x8xf32>
    %c0_101 = arith.constant 0 : index
    %c0_102 = arith.constant 0 : index
    %214 = vector.load %arg27[%c0_101, %c0_102] : memref<4x8xf32, #tpu.memory_space<vmem>>, vector<4x8xf32>
    %cst_103 = arith.constant dense<0.000000e+00> : vector<40x8xf32>
    %215 = tpu.matmul %1, %214, %cst_103 {dimension_numbers = #tpu.dot_dimension_numbers<[1], [0], [0], [1], [0, 0, 1, 1], [], []>} : vector<40x4xf32>, vector<4x8xf32>, vector<40x8xf32> -> vector<40x8xf32>
    %216 = arith.truncf %212 : vector<16x8xf32> to vector<16x8xbf16>
    %cst_104 = arith.constant dense<0.000000e+00> : vector<40x8xf32>
    %217 = tpu.matmul %9, %216, %cst_104 {dimension_numbers = #tpu.dot_dimension_numbers<[1], [0], [0], [1], [0, 0, 1, 1], [], []>} : vector<40x16xbf16>, vector<16x8xbf16>, vector<40x8xf32> -> vector<40x8xf32>
    %218 = arith.truncf %213 : vector<16x8xf32> to vector<16x8xbf16>
    %cst_105 = arith.constant dense<0.000000e+00> : vector<40x8xf32>
    %219 = tpu.matmul %16, %218, %cst_105 {dimension_numbers = #tpu.dot_dimension_numbers<[1], [0], [0], [1], [0, 0, 1, 1], [], []>} : vector<40x16xbf16>, vector<16x8xbf16>, vector<40x8xf32> -> vector<40x8xf32>
    %220 = arith.addf %217, %219 : vector<40x8xf32>
    %221 = arith.addf %220, %215 : vector<40x8xf32>
    %cst_106 = arith.constant 0.000000e+00 : f32
    %222 = vector.broadcast %cst_106 : f32 to vector<40x8xf32>
    %223 = arith.cmpf ogt, %221, %222 : vector<40x8xf32>
    %cst_107 = arith.constant 2.000000e-01 : f32
    %224 = vector.broadcast %cst_107 : f32 to vector<40x8xf32>
    %225 = arith.mulf %224, %221 : vector<40x8xf32>
    %226 = arith.select %223, %221, %225 : vector<40x8xi1>, vector<40x8xf32>
    %c0_108 = arith.constant 0 : index
    %c0_109 = arith.constant 0 : index
    %227 = vector.load %arg28[%c0_108, %c0_109] : memref<1x8xf32, #tpu.memory_space<vmem>>, vector<1x8xf32>
    %228 = vector.broadcast %227 : vector<1x8xf32> to vector<40x8xf32>
    %229 = arith.mulf %226, %228 : vector<40x8xf32>
    %c0_110 = arith.constant 0 : index
    %c0_111 = arith.constant 0 : index
    %230 = vector.load %arg29[%c0_110, %c0_111] : memref<8x1xf32, #tpu.memory_space<vmem>>, vector<8x1xf32>
    %cst_112 = arith.constant dense<0.000000e+00> : vector<40x1xf32>
    %231 = tpu.matmul %229, %230, %cst_112 {dimension_numbers = #tpu.dot_dimension_numbers<[1], [0], [0], [1], [0, 0, 1, 1], [], []>} : vector<40x8xf32>, vector<8x1xf32>, vector<40x1xf32> -> vector<40x1xf32>
    %cst_113 = arith.constant dense<0xFF800000> : vector<1xf32>
    %232 = vector.multi_reduction <maximumf>, %231, %cst_113 [0] : vector<40x1xf32> to vector<1xf32>
    %233 = vector.shape_cast %232 : vector<1xf32> to vector<1x1xf32>
    %234 = vector.broadcast %233 : vector<1x1xf32> to vector<40x1xf32>
    %235 = arith.subf %231, %234 : vector<40x1xf32>
    %236 = math.exp %235 : vector<40x1xf32>
    %c0_114 = arith.constant 0 : index
    %c0_115 = arith.constant 0 : index
    %237 = vector.load %arg30[%c0_114, %c0_115] : memref<1x8xf32, #tpu.memory_space<vmem>>, vector<1x8xf32>
    %cst_116 = arith.constant dense<0.000000e+00> : vector<40x8xf32>
    %238 = tpu.matmul %236, %237, %cst_116 {dimension_numbers = #tpu.dot_dimension_numbers<[1], [0], [0], [1], [0, 0, 1, 1], [], []>} : vector<40x1xf32>, vector<1x8xf32>, vector<40x8xf32> -> vector<40x8xf32>
    %239 = arith.mulf %217, %238 : vector<40x8xf32>
    %240 = tpu.concatenate %239, %238 in 1 : vector<40x8xf32>, vector<40x8xf32> -> vector<40x16xf32>
    %241 = arith.truncf %240 : vector<40x16xf32> to vector<40x16xbf16>
    %cst_117 = arith.constant dense<0.000000e+00> : vector<16x16xf32>
    %242 = tpu.matmul %24, %241, %cst_117 {dimension_numbers = #tpu.dot_dimension_numbers<[1], [0], [0], [1], [0, 0, 1, 1], [], []>} : vector<16x40xbf16>, vector<40x16xbf16>, vector<16x16xf32> -> vector<16x16xf32>
    %243 = vector.extract_strided_slice %242 {offsets = [0, 0], sizes = [16, 8], strides = [1, 1]} : vector<16x16xf32> to vector<16x8xf32>
    %244 = vector.extract_strided_slice %242 {offsets = [0, 8], sizes = [16, 8], strides = [1, 1]} : vector<16x16xf32> to vector<16x8xf32>
    %cst_118 = arith.constant 9.99999968E-21 : f32
    %245 = vector.broadcast %cst_118 : f32 to vector<16x8xf32>
    %246 = arith.maximumf %244, %245 : vector<16x8xf32>
    %247 = tpu.reciprocal %246 {approx = true} : vector<16x8xf32> -> vector<16x8xf32>
    %248 = arith.mulf %243, %247 : vector<16x8xf32>
    %c0_119 = arith.constant 0 : index
    %c0_120 = arith.constant 0 : index
    %249 = vector.load %arg31[%c0_119, %c0_120] : memref<1x8xf32, #tpu.memory_space<vmem>>, vector<1x8xf32>
    %250 = vector.broadcast %249 : vector<1x8xf32> to vector<16x8xf32>
    %251 = arith.addf %248, %250 : vector<16x8xf32>
    %cst_121 = arith.constant 0.000000e+00 : f32
    %252 = vector.broadcast %cst_121 : f32 to vector<16x8xf32>
    %253 = arith.minimumf %251, %252 : vector<16x8xf32>
    %cst_122 = arith.constant -9.99999974E-5 : f32
    %254 = vector.broadcast %cst_122 : f32 to vector<16x8xf32>
    %255 = arith.cmpf ogt, %253, %254 : vector<16x8xf32>
    %cst_123 = arith.constant 5.000000e-01 : f32
    %256 = vector.broadcast %cst_123 : f32 to vector<16x8xf32>
    %257 = arith.mulf %256, %253 : vector<16x8xf32>
    %258 = arith.mulf %257, %253 : vector<16x8xf32>
    %259 = arith.addf %253, %258 : vector<16x8xf32>
    %260 = math.exp %253 : vector<16x8xf32>
    %cst_124 = arith.constant 1.000000e+00 : f32
    %261 = vector.broadcast %cst_124 : f32 to vector<16x8xf32>
    %262 = arith.subf %260, %261 : vector<16x8xf32>
    %263 = arith.select %255, %259, %262 : vector<16x8xi1>, vector<16x8xf32>
    %cst_125 = arith.constant 0.000000e+00 : f32
    %264 = vector.broadcast %cst_125 : f32 to vector<16x8xf32>
    %265 = arith.cmpf ogt, %251, %264 : vector<16x8xf32>
    %266 = arith.select %265, %251, %263 : vector<16x8xi1>, vector<16x8xf32>
    %267 = vector.broadcast %30 : vector<16x1xf32> to vector<16x8xf32>
    %268 = arith.mulf %266, %267 : vector<16x8xf32>
    %cst_126 = arith.constant dense<0.000000e+00> : vector<8xf32>
    %269 = vector.multi_reduction <add>, %268, %cst_126 [0] : vector<16x8xf32> to vector<8xf32>
    %270 = vector.shape_cast %269 : vector<8xf32> to vector<1x8xf32>
    %cst_127 = arith.constant 0.0833333358 : f32
    %271 = vector.broadcast %cst_127 : f32 to vector<1x8xf32>
    %272 = arith.mulf %270, %271 : vector<1x8xf32>
    %273 = vector.broadcast %272 : vector<1x8xf32> to vector<16x8xf32>
    %274 = arith.subf %266, %273 : vector<16x8xf32>
    %275 = vector.broadcast %30 : vector<16x1xf32> to vector<16x8xf32>
    %276 = arith.mulf %274, %275 : vector<16x8xf32>
    %277 = arith.mulf %276, %276 : vector<16x8xf32>
    %cst_128 = arith.constant dense<0.000000e+00> : vector<8xf32>
    %278 = vector.multi_reduction <add>, %277, %cst_128 [0] : vector<16x8xf32> to vector<8xf32>
    %279 = vector.shape_cast %278 : vector<8xf32> to vector<1x8xf32>
    %cst_129 = arith.constant 0.0833333358 : f32
    %280 = vector.broadcast %cst_129 : f32 to vector<1x8xf32>
    %281 = arith.mulf %279, %280 : vector<1x8xf32>
    %282 = vector.broadcast %272 : vector<1x8xf32> to vector<16x8xf32>
    %283 = arith.subf %266, %282 : vector<16x8xf32>
    %cst_130 = arith.constant 9.99999974E-6 : f32
    %284 = vector.broadcast %cst_130 : f32 to vector<1x8xf32>
    %285 = arith.addf %281, %284 : vector<1x8xf32>
    %286 = math.rsqrt %285 : vector<1x8xf32>
    %287 = vector.broadcast %286 : vector<1x8xf32> to vector<16x8xf32>
    %288 = arith.mulf %283, %287 : vector<16x8xf32>
    %c0_131 = arith.constant 0 : index
    %c0_132 = arith.constant 0 : index
    %289 = vector.load %arg32[%c0_131, %c0_132] : memref<1x8xf32, #tpu.memory_space<vmem>>, vector<1x8xf32>
    %290 = vector.broadcast %289 : vector<1x8xf32> to vector<16x8xf32>
    %291 = arith.mulf %288, %290 : vector<16x8xf32>
    %c0_133 = arith.constant 0 : index
    %c0_134 = arith.constant 0 : index
    %292 = vector.load %arg33[%c0_133, %c0_134] : memref<1x8xf32, #tpu.memory_space<vmem>>, vector<1x8xf32>
    %293 = vector.broadcast %292 : vector<1x8xf32> to vector<16x8xf32>
    %294 = arith.addf %291, %293 : vector<16x8xf32>
    %295 = tpu.iota {dimensions = array<i32: 0>} : vector<3x16xi32>
    %c0_135 = arith.constant 0 : index
    %c0_136 = arith.constant 0 : index
    %296 = vector.load %arg6[%c0_135, %c0_136] : memref<1x16xi32, #tpu.memory_space<vmem>>, vector<1x16xi32>
    %297 = vector.broadcast %296 : vector<1x16xi32> to vector<3x16xi32>
    %298 = arith.cmpi eq, %297, %295 : vector<3x16xi32>
    %cst_137 = arith.constant 1.000000e+00 : f32
    %cst_138 = arith.constant 0.000000e+00 : f32
    %299 = vector.broadcast %cst_137 : f32 to vector<3x16xf32>
    %300 = vector.broadcast %cst_138 : f32 to vector<3x16xf32>
    %301 = arith.select %298, %299, %300 : vector<3x16xi1>, vector<3x16xf32>
    %302 = arith.truncf %301 : vector<3x16xf32> to vector<3x16xbf16>
    %303 = tpu.iota {dimensions = array<i32: 1>} : vector<16x3xi32>
    %304 = vector.broadcast %25 : vector<16x1xi32> to vector<16x3xi32>
    %305 = arith.cmpi eq, %304, %303 : vector<16x3xi32>
    %cst_139 = arith.constant 1.000000e+00 : f32
    %cst_140 = arith.constant 0.000000e+00 : f32
    %306 = vector.broadcast %cst_139 : f32 to vector<16x3xf32>
    %307 = vector.broadcast %cst_140 : f32 to vector<16x3xf32>
    %308 = arith.select %305, %306, %307 : vector<16x3xi1>, vector<16x3xf32>
    %309 = arith.truncf %308 : vector<16x3xf32> to vector<16x3xbf16>
    %c0_141 = arith.constant 0 : index
    %c0_142 = arith.constant 0 : index
    %310 = vector.load %arg6[%c0_141, %c0_142] : memref<1x16xi32, #tpu.memory_space<vmem>>, vector<1x16xi32>
    %311 = vector.broadcast %310 : vector<1x16xi32> to vector<3x16xi32>
    %312 = arith.cmpi eq, %311, %295 : vector<3x16xi32>
    %cst_143 = arith.constant 1.000000e+00 : f32
    %cst_144 = arith.constant 0.000000e+00 : f32
    %313 = vector.broadcast %cst_143 : f32 to vector<3x16xf32>
    %314 = vector.broadcast %cst_144 : f32 to vector<3x16xf32>
    %315 = arith.select %312, %313, %314 : vector<3x16xi1>, vector<3x16xf32>
    %cst_145 = arith.constant dense<0.000000e+00> : vector<3xf32>
    %316 = vector.multi_reduction <add>, %315, %cst_145 [1] : vector<3x16xf32> to vector<3xf32>
    %317 = vector.shape_cast %316 : vector<3xf32> to vector<3x1xf32>
    %c0_146 = arith.constant 0 : index
    %c0_147 = arith.constant 0 : index
    %318 = vector.load %arg34[%c0_146, %c0_147] : memref<8x1xf32, #tpu.memory_space<vmem>>, vector<8x1xf32>
    %cst_148 = arith.constant dense<0.000000e+00> : vector<16x1xf32>
    %319 = tpu.matmul %294, %318, %cst_148 {dimension_numbers = #tpu.dot_dimension_numbers<[1], [0], [0], [1], [0, 0, 1, 1], [], []>} : vector<16x8xf32>, vector<8x1xf32>, vector<16x1xf32> -> vector<16x1xf32>
    %c0_149 = arith.constant 0 : index
    %c0_150 = arith.constant 0 : index
    %320 = vector.load %arg35[%c0_149, %c0_150] : memref<1x1xf32, #tpu.memory_space<vmem>>, vector<1x1xf32>
    %321 = vector.broadcast %320 : vector<1x1xf32> to vector<16x1xf32>
    %322 = arith.addf %319, %321 : vector<16x1xf32>
    %323 = vector.shape_cast %322 : vector<16x1xf32> to vector<1x16x1xf32>
    %cst_151 = arith.constant dense<0xFF800000> : vector<1xf32>
    %324 = vector.multi_reduction <maximumf>, %323, %cst_151 [1, 2] : vector<1x16x1xf32> to vector<1xf32>
    %325 = vector.shape_cast %324 : vector<1xf32> to vector<1x1x1xf32>
    %326 = vector.extract %325[0, 0, 0] : f32 from vector<1x1x1xf32>
    %327 = vector.broadcast %326 : f32 to vector<1x1xf32>
    %328 = vector.broadcast %327 : vector<1x1xf32> to vector<16x1xf32>
    %329 = arith.subf %322, %328 : vector<16x1xf32>
    %330 = math.exp %329 : vector<16x1xf32>
    %331 = vector.broadcast %330 : vector<16x1xf32> to vector<16x8xf32>
    %332 = arith.mulf %331, %294 : vector<16x8xf32>
    %333 = tpu.concatenate %294, %332, %330 in 1 : vector<16x8xf32>, vector<16x8xf32>, vector<16x1xf32> -> vector<16x17xf32>
    %334 = arith.truncf %333 : vector<16x17xf32> to vector<16x17xbf16>
    %cst_152 = arith.constant dense<0.000000e+00> : vector<3x17xf32>
    %335 = tpu.matmul %302, %334, %cst_152 {dimension_numbers = #tpu.dot_dimension_numbers<[1], [0], [0], [1], [0, 0, 1, 1], [], []>} : vector<3x16xbf16>, vector<16x17xbf16>, vector<3x17xf32> -> vector<3x17xf32>
    %336 = vector.extract_strided_slice %335 {offsets = [0, 0], sizes = [3, 8], strides = [1, 1]} : vector<3x17xf32> to vector<3x8xf32>
    %337 = vector.extract_strided_slice %335 {offsets = [0, 8], sizes = [3, 8], strides = [1, 1]} : vector<3x17xf32> to vector<3x8xf32>
    %338 = vector.extract_strided_slice %335 {offsets = [0, 16], sizes = [3, 1], strides = [1, 1]} : vector<3x17xf32> to vector<3x1xf32>
    %cst_153 = arith.constant 9.99999968E-21 : f32
    %339 = vector.broadcast %cst_153 : f32 to vector<3x1xf32>
    %340 = arith.maximumf %338, %339 : vector<3x1xf32>
    %341 = vector.broadcast %340 : vector<3x1xf32> to vector<3x8xf32>
    %342 = arith.divf %337, %341 : vector<3x8xf32>
    %343 = vector.broadcast %317 : vector<3x1xf32> to vector<3x8xf32>
    %344 = arith.divf %336, %343 : vector<3x8xf32>
    %c0_i32 = arith.constant 0 : i32
    %345 = vector.broadcast %c0_i32 : i32 to vector<16x1xi32>
    %346 = arith.cmpi eq, %25, %345 : vector<16x1xi32>
    %cst_154 = arith.constant -3.000000e+38 : f32
    %347 = vector.shape_cast %346 : vector<16x1xi1> to vector<16x1xi1>
    %348 = vector.broadcast %347 : vector<16x1xi1> to vector<16x8xi1>
    %349 = vector.broadcast %cst_154 : f32 to vector<16x8xf32>
    %350 = arith.select %348, %294, %349 : vector<16x8xi1>, vector<16x8xf32>
    %cst_155 = arith.constant dense<0xFF800000> : vector<8xf32>
    %351 = vector.multi_reduction <maximumf>, %350, %cst_155 [0] : vector<16x8xf32> to vector<8xf32>
    %352 = vector.shape_cast %351 : vector<8xf32> to vector<1x8xf32>
    %c1_i32 = arith.constant 1 : i32
    %353 = vector.broadcast %c1_i32 : i32 to vector<16x1xi32>
    %354 = arith.cmpi eq, %25, %353 : vector<16x1xi32>
    %cst_156 = arith.constant -3.000000e+38 : f32
    %355 = vector.shape_cast %354 : vector<16x1xi1> to vector<16x1xi1>
    %356 = vector.broadcast %355 : vector<16x1xi1> to vector<16x8xi1>
    %357 = vector.broadcast %cst_156 : f32 to vector<16x8xf32>
    %358 = arith.select %356, %294, %357 : vector<16x8xi1>, vector<16x8xf32>
    %cst_157 = arith.constant dense<0xFF800000> : vector<8xf32>
    %359 = vector.multi_reduction <maximumf>, %358, %cst_157 [0] : vector<16x8xf32> to vector<8xf32>
    %360 = vector.shape_cast %359 : vector<8xf32> to vector<1x8xf32>
    %c2_i32 = arith.constant 2 : i32
    %361 = vector.broadcast %c2_i32 : i32 to vector<16x1xi32>
    %362 = arith.cmpi eq, %25, %361 : vector<16x1xi32>
    %cst_158 = arith.constant -3.000000e+38 : f32
    %363 = vector.shape_cast %362 : vector<16x1xi1> to vector<16x1xi1>
    %364 = vector.broadcast %363 : vector<16x1xi1> to vector<16x8xi1>
    %365 = vector.broadcast %cst_158 : f32 to vector<16x8xf32>
    %366 = arith.select %364, %294, %365 : vector<16x8xi1>, vector<16x8xf32>
    %cst_159 = arith.constant dense<0xFF800000> : vector<8xf32>
    %367 = vector.multi_reduction <maximumf>, %366, %cst_159 [0] : vector<16x8xf32> to vector<8xf32>
    %368 = vector.shape_cast %367 : vector<8xf32> to vector<1x8xf32>
    %369 = tpu.concatenate %352, %360, %368 in 0 : vector<1x8xf32>, vector<1x8xf32>, vector<1x8xf32> -> vector<3x8xf32>
    %c0_160 = arith.constant 0 : index
    %c0_161 = arith.constant 0 : index
    %370 = vector.load %arg36[%c0_160, %c0_161] : memref<24x32xf32, #tpu.memory_space<vmem>>, vector<24x32xf32>
    %c0_162 = arith.constant 0 : index
    %c0_163 = arith.constant 0 : index
    %371 = vector.load %arg37[%c0_162, %c0_163] : memref<1x32xf32, #tpu.memory_space<vmem>>, vector<1x32xf32>
    %cst_164 = arith.constant 0.000000e+00 : f32
    %372 = vector.broadcast %cst_164 : f32 to vector<3x8xf32>
    %cst_165 = arith.constant 0.000000e+00 : f32
    %373 = vector.broadcast %cst_165 : f32 to vector<3x8xf32>
    %cst_166 = arith.constant 0.000000e+00 : f32
    %374 = vector.broadcast %cst_166 : f32 to vector<3x16xf32>
    %375 = tpu.concatenate %374, %372 in 1 : vector<3x16xf32>, vector<3x8xf32> -> vector<3x24xf32>
    %cst_167 = arith.constant dense<0.000000e+00> : vector<3x32xf32>
    %376 = tpu.matmul %375, %370, %cst_167 {dimension_numbers = #tpu.dot_dimension_numbers<[1], [0], [0], [1], [0, 0, 1, 1], [], []>} : vector<3x24xf32>, vector<24x32xf32>, vector<3x32xf32> -> vector<3x32xf32>
    %377 = vector.broadcast %371 : vector<1x32xf32> to vector<3x32xf32>
    %378 = arith.addf %376, %377 : vector<3x32xf32>
    %379 = vector.extract_strided_slice %378 {offsets = [0, 0], sizes = [3, 8], strides = [1, 1]} : vector<3x32xf32> to vector<3x8xf32>
    %380 = arith.negf %379 : vector<3x8xf32>
    %381 = math.exp %380 : vector<3x8xf32>
    %cst_168 = arith.constant 1.000000e+00 : f32
    %382 = vector.broadcast %cst_168 : f32 to vector<3x8xf32>
    %383 = arith.addf %382, %381 : vector<3x8xf32>
    %384 = arith.divf %382, %383 : vector<3x8xf32>
    %385 = vector.extract_strided_slice %378 {offsets = [0, 8], sizes = [3, 8], strides = [1, 1]} : vector<3x32xf32> to vector<3x8xf32>
    %386 = arith.negf %385 : vector<3x8xf32>
    %387 = math.exp %386 : vector<3x8xf32>
    %cst_169 = arith.constant 1.000000e+00 : f32
    %388 = vector.broadcast %cst_169 : f32 to vector<3x8xf32>
    %389 = arith.addf %388, %387 : vector<3x8xf32>
    %390 = arith.divf %388, %389 : vector<3x8xf32>
    %391 = vector.extract_strided_slice %378 {offsets = [0, 16], sizes = [3, 8], strides = [1, 1]} : vector<3x32xf32> to vector<3x8xf32>
    %392 = math.tanh %391 : vector<3x8xf32>
    %393 = vector.extract_strided_slice %378 {offsets = [0, 24], sizes = [3, 8], strides = [1, 1]} : vector<3x32xf32> to vector<3x8xf32>
    %394 = arith.negf %393 : vector<3x8xf32>
    %395 = math.exp %394 : vector<3x8xf32>
    %cst_170 = arith.constant 1.000000e+00 : f32
    %396 = vector.broadcast %cst_170 : f32 to vector<3x8xf32>
    %397 = arith.addf %396, %395 : vector<3x8xf32>
    %398 = arith.divf %396, %397 : vector<3x8xf32>
    %399 = arith.mulf %390, %373 : vector<3x8xf32>
    %400 = arith.mulf %384, %392 : vector<3x8xf32>
    %401 = arith.addf %399, %400 : vector<3x8xf32>
    %402 = math.tanh %401 : vector<3x8xf32>
    %403 = arith.mulf %398, %402 : vector<3x8xf32>
    %404 = arith.truncf %403 : vector<3x8xf32> to vector<3x8xbf16>
    %cst_171 = arith.constant dense<0.000000e+00> : vector<16x8xf32>
    %405 = tpu.matmul %309, %404, %cst_171 {dimension_numbers = #tpu.dot_dimension_numbers<[1], [0], [0], [1], [0, 0, 1, 1], [], []>} : vector<16x3xbf16>, vector<3x8xbf16>, vector<16x8xf32> -> vector<16x8xf32>
    %406 = arith.mulf %294, %405 : vector<16x8xf32>
    %cst_172 = arith.constant dense<0.000000e+00> : vector<16xf32>
    %407 = vector.multi_reduction <add>, %406, %cst_172 [1] : vector<16x8xf32> to vector<16xf32>
    %408 = vector.shape_cast %407 : vector<16xf32> to vector<16x1xf32>
    %409 = vector.shape_cast %408 : vector<16x1xf32> to vector<1x16x1xf32>
    %cst_173 = arith.constant dense<0xFF800000> : vector<1xf32>
    %410 = vector.multi_reduction <maximumf>, %409, %cst_173 [1, 2] : vector<1x16x1xf32> to vector<1xf32>
    %411 = vector.shape_cast %410 : vector<1xf32> to vector<1x1x1xf32>
    %412 = vector.extract %411[0, 0, 0] : f32 from vector<1x1x1xf32>
    %413 = vector.broadcast %412 : f32 to vector<1x1xf32>
    %414 = vector.broadcast %413 : vector<1x1xf32> to vector<16x1xf32>
    %415 = arith.subf %408, %414 : vector<16x1xf32>
    %416 = math.exp %415 : vector<16x1xf32>
    %417 = vector.broadcast %416 : vector<16x1xf32> to vector<16x8xf32>
    %418 = arith.mulf %417, %294 : vector<16x8xf32>
    %419 = tpu.concatenate %418, %416 in 1 : vector<16x8xf32>, vector<16x1xf32> -> vector<16x9xf32>
    %420 = arith.truncf %419 : vector<16x9xf32> to vector<16x9xbf16>
    %cst_174 = arith.constant dense<0.000000e+00> : vector<3x9xf32>
    %421 = tpu.matmul %302, %420, %cst_174 {dimension_numbers = #tpu.dot_dimension_numbers<[1], [0], [0], [1], [0, 0, 1, 1], [], []>} : vector<3x16xbf16>, vector<16x9xbf16>, vector<3x9xf32> -> vector<3x9xf32>
    %422 = vector.extract_strided_slice %421 {offsets = [0, 0], sizes = [3, 8], strides = [1, 1]} : vector<3x9xf32> to vector<3x8xf32>
    %423 = vector.extract_strided_slice %421 {offsets = [0, 8], sizes = [3, 1], strides = [1, 1]} : vector<3x9xf32> to vector<3x1xf32>
    %cst_175 = arith.constant 9.99999968E-21 : f32
    %424 = vector.broadcast %cst_175 : f32 to vector<3x1xf32>
    %425 = arith.maximumf %423, %424 : vector<3x1xf32>
    %426 = vector.broadcast %425 : vector<3x1xf32> to vector<3x8xf32>
    %427 = arith.divf %422, %426 : vector<3x8xf32>
    %428 = tpu.concatenate %403, %427 in 1 : vector<3x8xf32>, vector<3x8xf32> -> vector<3x16xf32>
    %429 = tpu.concatenate %428, %403 in 1 : vector<3x16xf32>, vector<3x8xf32> -> vector<3x24xf32>
    %cst_176 = arith.constant dense<0.000000e+00> : vector<3x32xf32>
    %430 = tpu.matmul %429, %370, %cst_176 {dimension_numbers = #tpu.dot_dimension_numbers<[1], [0], [0], [1], [0, 0, 1, 1], [], []>} : vector<3x24xf32>, vector<24x32xf32>, vector<3x32xf32> -> vector<3x32xf32>
    %431 = vector.broadcast %371 : vector<1x32xf32> to vector<3x32xf32>
    %432 = arith.addf %430, %431 : vector<3x32xf32>
    %433 = vector.extract_strided_slice %432 {offsets = [0, 0], sizes = [3, 8], strides = [1, 1]} : vector<3x32xf32> to vector<3x8xf32>
    %434 = arith.negf %433 : vector<3x8xf32>
    %435 = math.exp %434 : vector<3x8xf32>
    %cst_177 = arith.constant 1.000000e+00 : f32
    %436 = vector.broadcast %cst_177 : f32 to vector<3x8xf32>
    %437 = arith.addf %436, %435 : vector<3x8xf32>
    %438 = arith.divf %436, %437 : vector<3x8xf32>
    %439 = vector.extract_strided_slice %432 {offsets = [0, 8], sizes = [3, 8], strides = [1, 1]} : vector<3x32xf32> to vector<3x8xf32>
    %440 = arith.negf %439 : vector<3x8xf32>
    %441 = math.exp %440 : vector<3x8xf32>
    %cst_178 = arith.constant 1.000000e+00 : f32
    %442 = vector.broadcast %cst_178 : f32 to vector<3x8xf32>
    %443 = arith.addf %442, %441 : vector<3x8xf32>
    %444 = arith.divf %442, %443 : vector<3x8xf32>
    %445 = vector.extract_strided_slice %432 {offsets = [0, 16], sizes = [3, 8], strides = [1, 1]} : vector<3x32xf32> to vector<3x8xf32>
    %446 = math.tanh %445 : vector<3x8xf32>
    %447 = vector.extract_strided_slice %432 {offsets = [0, 24], sizes = [3, 8], strides = [1, 1]} : vector<3x32xf32> to vector<3x8xf32>
    %448 = arith.negf %447 : vector<3x8xf32>
    %449 = math.exp %448 : vector<3x8xf32>
    %cst_179 = arith.constant 1.000000e+00 : f32
    %450 = vector.broadcast %cst_179 : f32 to vector<3x8xf32>
    %451 = arith.addf %450, %449 : vector<3x8xf32>
    %452 = arith.divf %450, %451 : vector<3x8xf32>
    %453 = arith.mulf %444, %401 : vector<3x8xf32>
    %454 = arith.mulf %438, %446 : vector<3x8xf32>
    %455 = arith.addf %453, %454 : vector<3x8xf32>
    %456 = math.tanh %455 : vector<3x8xf32>
    %457 = arith.mulf %452, %456 : vector<3x8xf32>
    %458 = arith.truncf %457 : vector<3x8xf32> to vector<3x8xbf16>
    %cst_180 = arith.constant dense<0.000000e+00> : vector<16x8xf32>
    %459 = tpu.matmul %309, %458, %cst_180 {dimension_numbers = #tpu.dot_dimension_numbers<[1], [0], [0], [1], [0, 0, 1, 1], [], []>} : vector<16x3xbf16>, vector<3x8xbf16>, vector<16x8xf32> -> vector<16x8xf32>
    %460 = arith.mulf %294, %459 : vector<16x8xf32>
    %cst_181 = arith.constant dense<0.000000e+00> : vector<16xf32>
    %461 = vector.multi_reduction <add>, %460, %cst_181 [1] : vector<16x8xf32> to vector<16xf32>
    %462 = vector.shape_cast %461 : vector<16xf32> to vector<16x1xf32>
    %463 = vector.shape_cast %462 : vector<16x1xf32> to vector<1x16x1xf32>
    %cst_182 = arith.constant dense<0xFF800000> : vector<1xf32>
    %464 = vector.multi_reduction <maximumf>, %463, %cst_182 [1, 2] : vector<1x16x1xf32> to vector<1xf32>
    %465 = vector.shape_cast %464 : vector<1xf32> to vector<1x1x1xf32>
    %466 = vector.extract %465[0, 0, 0] : f32 from vector<1x1x1xf32>
    %467 = vector.broadcast %466 : f32 to vector<1x1xf32>
    %468 = vector.broadcast %467 : vector<1x1xf32> to vector<16x1xf32>
    %469 = arith.subf %462, %468 : vector<16x1xf32>
    %470 = math.exp %469 : vector<16x1xf32>
    %471 = vector.broadcast %470 : vector<16x1xf32> to vector<16x8xf32>
    %472 = arith.mulf %471, %294 : vector<16x8xf32>
    %473 = tpu.concatenate %472, %470 in 1 : vector<16x8xf32>, vector<16x1xf32> -> vector<16x9xf32>
    %474 = arith.truncf %473 : vector<16x9xf32> to vector<16x9xbf16>
    %cst_183 = arith.constant dense<0.000000e+00> : vector<3x9xf32>
    %475 = tpu.matmul %302, %474, %cst_183 {dimension_numbers = #tpu.dot_dimension_numbers<[1], [0], [0], [1], [0, 0, 1, 1], [], []>} : vector<3x16xbf16>, vector<16x9xbf16>, vector<3x9xf32> -> vector<3x9xf32>
    %476 = vector.extract_strided_slice %475 {offsets = [0, 0], sizes = [3, 8], strides = [1, 1]} : vector<3x9xf32> to vector<3x8xf32>
    %477 = vector.extract_strided_slice %475 {offsets = [0, 8], sizes = [3, 1], strides = [1, 1]} : vector<3x9xf32> to vector<3x1xf32>
    %cst_184 = arith.constant 9.99999968E-21 : f32
    %478 = vector.broadcast %cst_184 : f32 to vector<3x1xf32>
    %479 = arith.maximumf %477, %478 : vector<3x1xf32>
    %480 = vector.broadcast %479 : vector<3x1xf32> to vector<3x8xf32>
    %481 = arith.divf %476, %480 : vector<3x8xf32>
    %482 = tpu.concatenate %457, %481 in 1 : vector<3x8xf32>, vector<3x8xf32> -> vector<3x16xf32>
    %483 = tpu.concatenate %482, %457 in 1 : vector<3x16xf32>, vector<3x8xf32> -> vector<3x24xf32>
    %cst_185 = arith.constant dense<0.000000e+00> : vector<3x32xf32>
    %484 = tpu.matmul %483, %370, %cst_185 {dimension_numbers = #tpu.dot_dimension_numbers<[1], [0], [0], [1], [0, 0, 1, 1], [], []>} : vector<3x24xf32>, vector<24x32xf32>, vector<3x32xf32> -> vector<3x32xf32>
    %485 = vector.broadcast %371 : vector<1x32xf32> to vector<3x32xf32>
    %486 = arith.addf %484, %485 : vector<3x32xf32>
    %487 = vector.extract_strided_slice %486 {offsets = [0, 0], sizes = [3, 8], strides = [1, 1]} : vector<3x32xf32> to vector<3x8xf32>
    %488 = arith.negf %487 : vector<3x8xf32>
    %489 = math.exp %488 : vector<3x8xf32>
    %cst_186 = arith.constant 1.000000e+00 : f32
    %490 = vector.broadcast %cst_186 : f32 to vector<3x8xf32>
    %491 = arith.addf %490, %489 : vector<3x8xf32>
    %492 = arith.divf %490, %491 : vector<3x8xf32>
    %493 = vector.extract_strided_slice %486 {offsets = [0, 8], sizes = [3, 8], strides = [1, 1]} : vector<3x32xf32> to vector<3x8xf32>
    %494 = arith.negf %493 : vector<3x8xf32>
    %495 = math.exp %494 : vector<3x8xf32>
    %cst_187 = arith.constant 1.000000e+00 : f32
    %496 = vector.broadcast %cst_187 : f32 to vector<3x8xf32>
    %497 = arith.addf %496, %495 : vector<3x8xf32>
    %498 = arith.divf %496, %497 : vector<3x8xf32>
    %499 = vector.extract_strided_slice %486 {offsets = [0, 16], sizes = [3, 8], strides = [1, 1]} : vector<3x32xf32> to vector<3x8xf32>
    %500 = math.tanh %499 : vector<3x8xf32>
    %501 = vector.extract_strided_slice %486 {offsets = [0, 24], sizes = [3, 8], strides = [1, 1]} : vector<3x32xf32> to vector<3x8xf32>
    %502 = arith.negf %501 : vector<3x8xf32>
    %503 = math.exp %502 : vector<3x8xf32>
    %cst_188 = arith.constant 1.000000e+00 : f32
    %504 = vector.broadcast %cst_188 : f32 to vector<3x8xf32>
    %505 = arith.addf %504, %503 : vector<3x8xf32>
    %506 = arith.divf %504, %505 : vector<3x8xf32>
    %507 = arith.mulf %498, %455 : vector<3x8xf32>
    %508 = arith.mulf %492, %500 : vector<3x8xf32>
    %509 = arith.addf %507, %508 : vector<3x8xf32>
    %510 = math.tanh %509 : vector<3x8xf32>
    %511 = arith.mulf %506, %510 : vector<3x8xf32>
    %512 = arith.truncf %511 : vector<3x8xf32> to vector<3x8xbf16>
    %cst_189 = arith.constant dense<0.000000e+00> : vector<16x8xf32>
    %513 = tpu.matmul %309, %512, %cst_189 {dimension_numbers = #tpu.dot_dimension_numbers<[1], [0], [0], [1], [0, 0, 1, 1], [], []>} : vector<16x3xbf16>, vector<3x8xbf16>, vector<16x8xf32> -> vector<16x8xf32>
    %514 = arith.mulf %294, %513 : vector<16x8xf32>
    %cst_190 = arith.constant dense<0.000000e+00> : vector<16xf32>
    %515 = vector.multi_reduction <add>, %514, %cst_190 [1] : vector<16x8xf32> to vector<16xf32>
    %516 = vector.shape_cast %515 : vector<16xf32> to vector<16x1xf32>
    %517 = vector.shape_cast %516 : vector<16x1xf32> to vector<1x16x1xf32>
    %cst_191 = arith.constant dense<0xFF800000> : vector<1xf32>
    %518 = vector.multi_reduction <maximumf>, %517, %cst_191 [1, 2] : vector<1x16x1xf32> to vector<1xf32>
    %519 = vector.shape_cast %518 : vector<1xf32> to vector<1x1x1xf32>
    %520 = vector.extract %519[0, 0, 0] : f32 from vector<1x1x1xf32>
    %521 = vector.broadcast %520 : f32 to vector<1x1xf32>
    %522 = vector.broadcast %521 : vector<1x1xf32> to vector<16x1xf32>
    %523 = arith.subf %516, %522 : vector<16x1xf32>
    %524 = math.exp %523 : vector<16x1xf32>
    %525 = vector.broadcast %524 : vector<16x1xf32> to vector<16x8xf32>
    %526 = arith.mulf %525, %294 : vector<16x8xf32>
    %527 = tpu.concatenate %526, %524 in 1 : vector<16x8xf32>, vector<16x1xf32> -> vector<16x9xf32>
    %528 = arith.truncf %527 : vector<16x9xf32> to vector<16x9xbf16>
    %cst_192 = arith.constant dense<0.000000e+00> : vector<3x9xf32>
    %529 = tpu.matmul %302, %528, %cst_192 {dimension_numbers = #tpu.dot_dimension_numbers<[1], [0], [0], [1], [0, 0, 1, 1], [], []>} : vector<3x16xbf16>, vector<16x9xbf16>, vector<3x9xf32> -> vector<3x9xf32>
    %530 = vector.extract_strided_slice %529 {offsets = [0, 0], sizes = [3, 8], strides = [1, 1]} : vector<3x9xf32> to vector<3x8xf32>
    %531 = vector.extract_strided_slice %529 {offsets = [0, 8], sizes = [3, 1], strides = [1, 1]} : vector<3x9xf32> to vector<3x1xf32>
    %cst_193 = arith.constant 9.99999968E-21 : f32
    %532 = vector.broadcast %cst_193 : f32 to vector<3x1xf32>
    %533 = arith.maximumf %531, %532 : vector<3x1xf32>
    %534 = vector.broadcast %533 : vector<3x1xf32> to vector<3x8xf32>
    %535 = arith.divf %530, %534 : vector<3x8xf32>
    %536 = tpu.concatenate %511, %535 in 1 : vector<3x8xf32>, vector<3x8xf32> -> vector<3x16xf32>
    %537 = tpu.concatenate %336, %369, %344, %342, %536 in 1 : vector<3x8xf32>, vector<3x8xf32>, vector<3x8xf32>, vector<3x8xf32>, vector<3x16xf32> -> vector<3x48xf32>
    %c0_194 = arith.constant 0 : index
    %c0_195 = arith.constant 0 : index
    %538 = vector.load %arg38[%c0_194, %c0_195] : memref<48x128xf32, #tpu.memory_space<vmem>>, vector<48x128xf32>
    %cst_196 = arith.constant dense<0.000000e+00> : vector<3x128xf32>
    %539 = tpu.matmul %537, %538, %cst_196 {dimension_numbers = #tpu.dot_dimension_numbers<[1], [0], [0], [1], [0, 0, 1, 1], [], []>} : vector<3x48xf32>, vector<48x128xf32>, vector<3x128xf32> -> vector<3x128xf32>
    %c0_197 = arith.constant 0 : index
    %c0_198 = arith.constant 0 : index
    %540 = vector.load %arg39[%c0_197, %c0_198] : memref<1x128xf32, #tpu.memory_space<vmem>>, vector<1x128xf32>
    %541 = vector.broadcast %540 : vector<1x128xf32> to vector<3x128xf32>
    %542 = arith.addf %539, %541 : vector<3x128xf32>
    %cst_199 = arith.constant 0.000000e+00 : f32
    %543 = vector.broadcast %cst_199 : f32 to vector<3x128xf32>
    %544 = arith.maximumf %542, %543 : vector<3x128xf32>
    %c0_200 = arith.constant 0 : index
    %c0_201 = arith.constant 0 : index
    %545 = vector.load %arg40[%c0_200, %c0_201] : memref<128x64xf32, #tpu.memory_space<vmem>>, vector<128x64xf32>
    %cst_202 = arith.constant dense<0.000000e+00> : vector<3x64xf32>
    %546 = tpu.matmul %544, %545, %cst_202 {dimension_numbers = #tpu.dot_dimension_numbers<[1], [0], [0], [1], [0, 0, 1, 1], [], []>} : vector<3x128xf32>, vector<128x64xf32>, vector<3x64xf32> -> vector<3x64xf32>
    %c0_203 = arith.constant 0 : index
    %c0_204 = arith.constant 0 : index
    %547 = vector.load %arg41[%c0_203, %c0_204] : memref<1x64xf32, #tpu.memory_space<vmem>>, vector<1x64xf32>
    %548 = vector.broadcast %547 : vector<1x64xf32> to vector<3x64xf32>
    %549 = arith.addf %546, %548 : vector<3x64xf32>
    %cst_205 = arith.constant 0.000000e+00 : f32
    %550 = vector.broadcast %cst_205 : f32 to vector<3x64xf32>
    %551 = arith.maximumf %549, %550 : vector<3x64xf32>
    %c0_206 = arith.constant 0 : index
    %c0_207 = arith.constant 0 : index
    %552 = vector.load %arg42[%c0_206, %c0_207] : memref<64x32xf32, #tpu.memory_space<vmem>>, vector<64x32xf32>
    %cst_208 = arith.constant dense<0.000000e+00> : vector<3x32xf32>
    %553 = tpu.matmul %551, %552, %cst_208 {dimension_numbers = #tpu.dot_dimension_numbers<[1], [0], [0], [1], [0, 0, 1, 1], [], []>} : vector<3x64xf32>, vector<64x32xf32>, vector<3x32xf32> -> vector<3x32xf32>
    %c0_209 = arith.constant 0 : index
    %c0_210 = arith.constant 0 : index
    %554 = vector.load %arg43[%c0_209, %c0_210] : memref<1x32xf32, #tpu.memory_space<vmem>>, vector<1x32xf32>
    %555 = vector.broadcast %554 : vector<1x32xf32> to vector<3x32xf32>
    %556 = arith.addf %553, %555 : vector<3x32xf32>
    %cst_211 = arith.constant 0.000000e+00 : f32
    %557 = vector.broadcast %cst_211 : f32 to vector<3x32xf32>
    %558 = arith.maximumf %556, %557 : vector<3x32xf32>
    %c0_212 = arith.constant 0 : index
    %c0_213 = arith.constant 0 : index
    %559 = vector.load %arg44[%c0_212, %c0_213] : memref<32x1xf32, #tpu.memory_space<vmem>>, vector<32x1xf32>
    %cst_214 = arith.constant dense<0.000000e+00> : vector<3x1xf32>
    %560 = tpu.matmul %558, %559, %cst_214 {dimension_numbers = #tpu.dot_dimension_numbers<[1], [0], [0], [1], [0, 0, 1, 1], [], []>} : vector<3x32xf32>, vector<32x1xf32>, vector<3x1xf32> -> vector<3x1xf32>
    %c0_215 = arith.constant 0 : index
    %c0_216 = arith.constant 0 : index
    %561 = vector.load %arg45[%c0_215, %c0_216] : memref<1x1xf32, #tpu.memory_space<vmem>>, vector<1x1xf32>
    %562 = vector.broadcast %561 : vector<1x1xf32> to vector<3x1xf32>
    %563 = arith.addf %560, %562 : vector<3x1xf32>
    %c0_217 = arith.constant 0 : index
    %c0_218 = arith.constant 0 : index
    %564 = vector.load %arg46[%c0_217, %c0_218] : memref<3x1xf32, #tpu.memory_space<vmem>>, vector<3x1xf32>
    tpu.vector_store %arg46[%c0_217, %c0_218], %563 {strides = array<i32>} : memref<3x1xf32, #tpu.memory_space<vmem>>, vector<3x1xf32>,
    return
  }
}

</mosaic_0001>

<bundles_post_ra>
// kernel: gatnet_forward.1
= control target key start
LH: loop header
LB: loop body
LE: loop exit
PB: predicated region body
PF: predicated region fallthrough
CT: control target
= control target key end

     0   :  { %s5084_s3 = smov 7   ;;  %v5085_v0 = vmov 0   ;;  %s5086_s10 = smov 2   ;;  %vm297_vm0 = vcmask 64512   ;;  %v5088_v13 = vmov 0.0   ;;  %vm5089_vm1 = vmmov 0   ;;  %s6058_s0 = inlined_call_operand.smem [shape: u32[47], index: -1, kind: input, shape index: {}] }
   0x1   :  { %s4000_s6 = sld [smem:[%s6058_s0 + %s5084_s3]]   ;;  %4916 = vset.pattern.permute.xlu0 %v5085_v0  ;;  %4917 = vset.pattern.permute.xlu1 %v5085_v0  ;;  %s5087_s14 = smov 3   ;;  %vm396_vm2 = vcmask 1043456   ;;  %vm380_vm3 = vcmask 31744   ;;  %v202_v20 = vlaneseq  ;;  %vm491_vm8 = vcmask 130048  }
   0x2   :  { %s1_s9 = sld [smem:[%s6058_s0]]   ;;  %4339 = vmatprep.subr.mxu1 %v5088_v13  ;;  %s5090_s18 = smov 9   ;;  %4341 = vmatprep.mubr.msk.f32.mxu1 %vm5089_vm1, %v5088_v13 }
   0x3   :  { %s3995_s13 = sld [smem:[%s6058_s0 + %s5086_s10]]   ;;  %s5091_s22 = smov 1   ;;  %v5219_v21 = vand.u32 127, %v202_v20 }
   0x4   :  { %s5159_s17 = sld [smem:[%s6058_s0 + %s5087_s14]]   ;;  %s5092_s26 = smov 8  }
   0x5   :  { %s4002_s21 = sld [smem:[%s6058_s0 + %s5090_s18]]   ;;  %s5093_s30 = smov 112  }
   0x6   :  { %s5179_s25 = sld [smem:[%s6058_s0 + %s5091_s22]]   ;;  %s5094_s1 = smov 11  }
   0x7   :  { %v289_v1 = vld [vmem:[%s4000_s6] sm:$0xff]  ;;  %s4001_s29 = sld [smem:[%s6058_s0 + %s5092_s26]]   ;;  %s5096_s5 = smov 10  }
   0x8   :  { %v195_v2 = vld [vmem:[%s1_s9] sm:$0xff]  ;;  %v196_v3 = vld [vmem:[%s1_s9 + $0x8] sm:$0xff]  ;;  %4334 = vmatprep.subr.mxu0 %v289_v1  ;;  %s4004_s4 = sld [smem:[%s6058_s0 + %s5094_s1]]   ;;  %s5097_s9 = smov 12  }
   0x9   :  { %4336 = vmatprep.mubr.msk.f32.mxu0 %vm297_vm0, %v195_v2  ;;  %v204_v4 = vld [vmem:[%s3995_s13] sm:$0xff]  ;;  %4335 = vmatpush3.msra.mxu0 %v289_v1  ;;  %v205_v6 = vld [vmem:[%s3995_s13 + $0x8] sm:$0xff]  ;;  %v206_v8 = vld [vmem:[%s3995_s13 + $0x10] sm:$0xff]  ;;  %s4003_s8 = sld [smem:[%s6058_s0 + %s5096_s5]]   ;;  %s5099_s14 = smov 4  }
   0xa   :  { %210 = vperm.xlu0 %4916, %v204_v4   ;;  %v237_v5 = vld [vmem:[%s5159_s17] sm:$0xff]  ;;  %4337 = vmatmul.mubr.msk.f32.vlgmr.msra.gmra.mrb[0].mxu0 %vm297_vm0, %v196_v3  ;;  %v238_v7 = vld [vmem:[%s5159_s17 + $0x8] sm:$0xff]  ;;  %v207_v9 = vld [vmem:[%s3995_s13 + $0x18] sm:$0xff]  ;;  %s4005_s12 = sld [smem:[%s6058_s0 + %s5097_s9]]   ;;  %s5100_s18 = smov 5  }
   0xb   :  { %243 = vperm.xlu1 %4917, %v237_v5   ;;  %v239_v10 = vld [vmem:[%s5159_s17 + $0x10] sm:$0xff]  ;;  %v240_v11 = vld [vmem:[%s5159_s17 + $0x18] sm:$0xff]  ;;  %v208_v12 = vld [vmem:[%s3995_s13 + $0x20] sm:$0xff]  ;;  %4356 = vmatprep.subr.bf16.mxu0 %v5088_v13  ;;  %s5098_s13 = smov 16   ;;  %s5101_s27 = smov 13  }
   0xc   :  { %4358 = vmatprep.mubr.msk.bf16.mxu0 %vm5089_vm1, %v5088_v13  ;;  %v379_v14 = vld [vmem:[%s4002_s21] sm:$0xf]  ;;  %v5191_v16 = vld [vmem:[%s5179_s25 + $0x8] sm:$0xff]  ;;  %v5198_v17 = vld [vmem:[%s5179_s25 + $0x10] sm:$0xff]  ;;  %s5389_s21 = sld [smem:[%s6058_s0 + %s5100_s18]]   ;;  %s5102_s2 = smov 14  }
   0xd   :  { %v5182_v15 = vld [vmem:[%s5179_s25] sm:$0xff]  ;;  %4340 = vmatpush3.msk.msra.mxu1 %vm396_vm2, %v379_v14  ;;  %v5205_v18 = vld [vmem:[%s5179_s25 + $0x18] sm:$0xff]  ;;  %s4009_s24 = sld [smem:[%s6058_s0 + %s5098_s13]]   ;;  %s5103_s6 = smov 15  }
   0xe   :  { %213 = vperm.xlu0 %4916, %v205_v6   ;;  %4342 = vmatmul.mubr.msk.f32.vlgmr.msra.gmra.mrb[0].mxu1 %vm380_vm3, %v5182_v15  ;;  %v5212_v19 = vld [vmem:[%s5179_s25 + $0x20] sm:$0xff]  ;;  %v664_v4 = vld [vmem:[%s4004_s4 + $0x8] sm:$0xff]  ;;  %v5095_v6 = vmov 0.0|0.0   ;;  %s4006_s1 = sld [smem:[%s6058_s0 + %s5101_s27]]   ;;  %s5104_s10 = smov 18  }
   0xf   :  { %246 = vperm.xlu1 %4917, %v238_v7   ;;  %4370 = vmatprep.subr.bf16.mxu1 %v5088_v13  ;;  %v4041_v29 = vld [vmem:[%s4001_s29] ss:$0 sm:$0xff]  ;;  %s4007_s5 = sld [smem:[%s6058_s0 + %s5102_s2]]   ;;  %s5105_s15 = smov 17  }
  0x10   :  { %4344 = vmatprep.mubr.msk.f32.mxu1 %vm5089_vm1, %v5088_v13  ;;  %v241_v40 = vld [vmem:[%s5159_s17 + $0x20] sm:$0xff]  ;;  %s3997_s17 = sld [smem:[%s6058_s0 + %s5099_s14]]   ;;  %s5106_s19 = smov 20  }
  0x11   :  { %v663_v3 = vld [vmem:[%s4004_s4] sm:$0xff]  ;;  %s4008_s9 = sld [smem:[%s6058_s0 + %s5103_s6]]  }
  0x12   :  { %216 = vperm.xlu0 %4916, %v206_v8   ;;  %4345 = vmatmul.mubr.msk.f32.gmra.mrb[2].mxu1 %vm380_vm3, %v5191_v16  ;;  %v4779_v5 = vpack.c.bf16 %v664_v4, %v663_v3  ;;  %s4011_s14 = sld [smem:[%s6058_s0 + %s5104_s10]]  }
  0x13   :  { %219 = vperm.xlu1 %4917, %v207_v9   ;;  %4347 = vmatprep.mubr.msk.f32.mxu1 %vm5089_vm1, %v5088_v13  ;;  %s4010_s18 = sld [smem:[%s6058_s0 + %s5105_s15]]  }
  0x14   :  { %s4013_s23 = sld [smem:[%s6058_s0 + %s5106_s19]]  }
  0x16   :  { %249 = vperm.xlu0 %4916, %v239_v10   ;;  %4348 = vmatmul.mubr.msk.f32.gmra.mrb[4].mxu1 %vm380_vm3, %v5198_v17 }
  0x17   :  { %252 = vperm.xlu1 %4917, %v240_v11   ;;  %4350 = vmatprep.mubr.msk.f32.mxu1 %vm5089_vm1, %v5088_v13 }
  0x1a   :  { %4351 = vmatmul.mubr.msk.f32.gmra.mrb[6].mxu1 %vm380_vm3, %v5205_v18 }
  0x1b   :  { %222 = vperm.xlu1 %4917, %v208_v12   ;;  %4353 = vmatprep.mubr.msk.f32.mxu1 %vm5089_vm1, %v5088_v13 }
  0x1e   :  { %4354 = vmatmul.mubr.msk.f32.gmra.mrb[8].mxu1 %vm380_vm3, %v5212_v19 }
  0x1f   :  { %4372 = vmatprep.mubr.msk.bf16.mxu1 %vm5089_vm1, %v5088_v13 }
  0x89   :  { %v211_v27 = vpop.permute.xlu0 %210 }
  0x8a   :  { %v244_v22 = vpop.permute.xlu1 %243  ;;  %vm224_vm6 = vcmp.eq.s32.totalorder %v211_v27, %v5219_v21 }
  0x8b   :  { %vm257_vm4 = vcmp.eq.s32.totalorder %v244_v22, %v5219_v21  ;;  %v229_v34 = vsel %vm224_vm6, 1.0, %v5088_v13 }
  0x8c   :  { %v262_v23 = vsel %vm257_vm4, 1.0, %v5088_v13 }
  0x8d   :  { %v214_v28 = vpop.permute.xlu0 %213 }
  0x8e   :  { %v247_v24 = vpop.permute.xlu1 %246  ;;  %vm225_vm7 = vcmp.eq.s32.totalorder %v214_v28, %v5219_v21 }
  0x8f   :  { %vm258_vm5 = vcmp.eq.s32.totalorder %v247_v24, %v5219_v21  ;;  %v230_v35 = vsel %vm225_vm7, 1.0, %v5088_v13 }
  0x90   :  { %v263_v25 = vsel %vm258_vm5, 1.0, %v5088_v13  ;;  %v5235_v39 = vpack.c.bf16 %v230_v35, %v229_v34 }
  0x91   :  { %v5225_v26 = vpack.c.bf16 %v263_v25, %v262_v23  ;;  %v217_v38 = vpop.permute.xlu0 %216 }
  0x92   :  { %v220_v36 = vpop.permute.xlu1 %219  ;;  %vm226_vm10 = vcmp.eq.s32.totalorder %v217_v38, %v5219_v21 }
  0x93   :  { %vm227_vm9 = vcmp.eq.s32.totalorder %v220_v36, %v5219_v21  ;;  %v231_v43 = vsel %vm226_vm10, 1.0, %v5088_v13  ;;  %v4056_v36 = vld [vmem:[%s4003_s8] ss:$0 sm:$0xff]  ;;  %vm770_vm10 = vcmask 15360  }
  0x94   :  { %v232_v42 = vsel %vm227_vm9, 1.0, %v5088_v13  ;;  %vm817_vm9 = vcmask 1041408  }
  0x95   :  { %v5247_v45 = vpack.c.bf16 %v232_v42, %v231_v43  ;;  %v250_v56 = vpop.permute.xlu0 %249 }
  0x96   :  { %v253_v41 = vpop.permute.xlu1 %252  ;;  %vm259_vm13 = vcmp.eq.s32.totalorder %v250_v56, %v5219_v21 }
  0x97   :  { %vm260_vm12 = vcmp.eq.s32.totalorder %v253_v41, %v5219_v21  ;;  %v264_v61 = vsel %vm259_vm13, 1.0, %v5088_v13  ;;  %vm944_vm13 = vcmask 326656  }
  0x98   :  { %v265_v60 = vsel %vm260_vm12, 1.0, %v5088_v13 }
  0x99   :  { %v5276_v62 = vpack.c.bf16 %v265_v60, %v264_v61 }
  0x9a   :  { %v223_v44 = vpop.permute.xlu1 %222 }
  0x9b   :  { %vm228_vm11 = vcmp.eq.s32.totalorder %v223_v44, %v5219_v21 }
  0x9c   :  { %v233_v46 = vsel %vm228_vm11, 1.0, %v5088_v13 }
  0x9d   :  { %v5255_v47 = vpack.c.bf16 %v233_v46, %v233_v46 }
  0xdd   :  { %v4338_v30 = vpop.f32.mrb[0].mxu0 }
  0xde   :  { %v376_v31 = vadd.f32 %v4338_v30, %v4041_v29  ;;  %v370_v32 = vpop.f32.mrb[1].mxu0 }
  0xdf   :  { %v371_v33 = vadd.f32 %v4041_v29, %v370_v32 }
  0xe1   :  { %v490_v37 = vpack.c.bf16 %v376_v31, %v371_v33  ;;  %v466_v48 = vpop.f32.mrb[0].mxu1 }
  0xe2   :  { %v4343_v49 = vpop.f32.mrb[1].mxu1 }
  0xe3   :  { %558 = vrot.lane.b32.xlu0 %v490_v37, %s5093_s30  ;;  %4357 = vmatpush3.bf16.msra.mxu0 %v490_v37 }
  0xe4   :  { %4778 = vmatprep.subr.bf16.mxu0 %v5095_v6 }
  0xe5   :  { %v471_v50 = vpop.f32.mrb[2].mxu1 }
  0xe6   :  { %4359 = vmatmul.mubr.msk.bf16.vlgmr.msra.gmra.mrb[4].mxu0 %vm491_vm8, %v5235_v39  ;;  %v4346_v51 = vpop.f32.mrb[3].mxu1 }
  0xe7   :  { %255 = vperm.xlu0 %4916, %v241_v40   ;;  %4362 = vmatprep.mubr.msk.bf16.mxu0 %vm5089_vm1, %v5088_v13 }
  0xe8   :  { %4780 = vmatpush3.bf16.msra.mxu0 %v4779_v5 }
  0xe9   :  { %v5261_v52 = vpop.f32.mrb[4].mxu1  ;;  %4420 = vmatprep.subr.bf16.mxu0 %v5088_v13 }
  0xea   :  { %v4349_v53 = vpop.f32.mrb[5].mxu1 }
  0xed   :  { %v5263_v54 = vpop.f32.mrb[6].mxu1 }
  0xee   :  { %4363 = vmatmul.mubr.msk.bf16.gmra.mrb[8].mxu0 %vm491_vm8, %v5247_v45  ;;  %v4352_v55 = vpop.f32.mrb[7].mxu1 }
  0xef   :  { %4366 = vmatprep.mubr.msk.bf16.mxu0 %vm5089_vm1, %v5088_v13 }
  0xf1   :  { %v5265_v57 = vpop.f32.mrb[8].mxu1 }
  0xf2   :  { %v4355_v58 = vpop.f32.mrb[9].mxu1 }
  0xf6   :  { %4367 = vmatmul.mubr.msk.bf16.gmra.mrb[12].mxu0 %vm491_vm8, %v5255_v47 }
  0xf7   :  { %4388 = vmatprep.mubr.msk.f32.mxu0 %vm5089_vm1, %v5088_v13 }
 0x155   :  { %v559_v59 = vpop.permute.xlu0 %558 }
 0x156   :  { %4371 = vmatpush3.bf16.msra.mxu1 %v559_v59 }
 0x157   :  { %4403 = vmatprep.subr.mxu1 %v5088_v13 }
 0x159   :  { %4373 = vmatmul.mubr.msk.bf16.vlgmr.msra.gmra.mrb[12].mxu1 %vm491_vm8, %v5225_v26 }
 0x15a   :  { %4376 = vmatprep.mubr.msk.bf16.mxu1 %vm5089_vm1, %v5088_v13 }
 0x161   :  { %4377 = vmatmul.mubr.msk.bf16.gmra.mrb[16].mxu1 %vm491_vm8, %v5276_v62 }
 0x162   :  { %4380 = vmatprep.mubr.msk.bf16.mxu1 %vm5089_vm1, %v5088_v13 }
 0x166   :  { %v256_v63 = vpop.permute.xlu0 %255 }
 0x167   :  { %vm261_vm14 = vcmp.eq.s32.totalorder %v256_v63, %v5219_v21 }
 0x168   :  { %v266_v1 = vsel %vm261_vm14, 1.0, %v5088_v13 }
 0x169   :  { %v5284_v2 = vpack.c.bf16 %v266_v1, %v266_v1 }
 0x16b   :  { %4381 = vmatmul.mubr.msk.bf16.gmra.mrb[20].mxu1 %vm491_vm8, %v5284_v2 }
 0x16c   :  { %4405 = vmatprep.mubr.msk.f32.mxu1 %vm5089_vm1, %v5088_v13 }
 0x1b9   :  { %v5295_v7 = vpop.f32.mrb[4].mxu0 }
 0x1ba   :  { %v4360_v8 = vpop.f32.mrb[5].mxu0 }
 0x1bb   :  { %v5297_v9 = vpop.f32.mrb[6].mxu0 }
 0x1bc   :  { %v4361_v10 = vpop.f32.mrb[7].mxu0 }
 0x1c1   :  { %v5299_v11 = vpop.f32.mrb[8].mxu0 }
 0x1c2   :  { %v4364_v12 = vpop.f32.mrb[9].mxu0 }
 0x1c3   :  { %v5301_v14 = vpop.f32.mrb[10].mxu0 }
 0x1c4   :  { %v4365_v22 = vpop.f32.mrb[11].mxu0 }
 0x1c9   :  { %v5303_v23 = vpop.f32.mrb[12].mxu0 }
 0x1ca   :  { %v4368_v24 = vpop.f32.mrb[13].mxu0 }
 0x1cb   :  { %v554_v25 = vpop.f32.mrb[14].mxu0 }
 0x1cc   :  { %v4369_v27 = vpop.f32.mrb[15].mxu0 }
 0x22c   :  { %v604_v28 = vpop.f32.mrb[12].mxu1 }
 0x22d   :  { %v626_v29 = vadd.f32 %v604_v28, %v5295_v7  ;;  %v4374_v30 = vpop.f32.mrb[13].mxu1 }
 0x22e   :  { %v607_v31 = vpop.f32.mrb[14].mxu1 }
 0x22f   :  { %v631_v32 = vadd.f32 %v626_v29, %v466_v48  ;;  %v627_v33 = vadd.f32 %v607_v31, %v5297_v9  ;;  %v4375_v34 = vpop.f32.mrb[15].mxu1 }
 0x231   :  { %vm636_vm15 = vcmp.gt.f32.partialorder %v631_v32, 0.0  ;;  %v641_v35 = vmul.f32 0.2, %v631_v32  ;;  %v632_v37 = vadd.f32 %v627_v33, %v471_v50 }
 0x233   :  { %v646_v38 = vsel %vm636_vm15, %v631_v32, %v641_v35  ;;  %vm637_vm4 = vcmp.gt.f32.partialorder %v632_v37, 0.0  ;;  %v642_v40 = vmul.f32 0.2, %v632_v37 }
 0x234   :  { %v658_v41 = vmul.f32 %v4056_v36, %v646_v38  ;;  %v612_v42 = vpop.f32.mrb[16].mxu1 }
 0x235   :  { %v647_v43 = vsel %vm637_vm4, %v632_v37, %v642_v40  ;;  %v628_v44 = vadd.f32 %v612_v42, %v5299_v11  ;;  %v4378_v46 = vpop.f32.mrb[17].mxu1 }
 0x236   :  { %v615_v49 = vpop.f32.mrb[18].mxu1  ;;  %4389 = vmatmul.mubr.msk.f32.vlgmr.msra.gmra.mrb[2].mxu0 %vm491_vm8, %v658_v41  ;;  %v659_v50 = vmul.f32 %v4056_v36, %v647_v43 }
 0x237   :  { %v633_v48 = vadd.f32 %v628_v44, %v5261_v52  ;;  %v629_v51 = vadd.f32 %v615_v49, %v5301_v14  ;;  %v4379_v53 = vpop.f32.mrb[19].mxu1  ;;  %4391 = vmatprep.mubr.msk.f32.mxu0 %vm5089_vm1, %v5088_v13 }
 0x239   :  { %vm638_vm5 = vcmp.gt.f32.partialorder %v633_v48, 0.0  ;;  %v643_v55 = vmul.f32 0.2, %v633_v48  ;;  %v634_v56 = vadd.f32 %v629_v51, %v5263_v54 }
 0x23a   :  { %4392 = vmatmul.mubr.msk.f32.gmra.mrb[16].mxu0 %vm491_vm8, %v659_v50 }
 0x23b   :  { %v648_v58 = vsel %vm638_vm5, %v633_v48, %v643_v55  ;;  %vm639_vm6 = vcmp.gt.f32.partialorder %v634_v56, 0.0  ;;  %v644_v59 = vmul.f32 0.2, %v634_v56  ;;  %4394 = vmatprep.mubr.msk.f32.mxu0 %vm5089_vm1, %v5088_v13 }
 0x23c   :  { %v660_v52 = vmul.f32 %v4056_v36, %v648_v58 }
 0x23d   :  { %v649_v60 = vsel %vm639_vm6, %v634_v56, %v644_v59 }
 0x23e   :  { %v620_v61 = vpop.f32.mrb[20].mxu1  ;;  %4395 = vmatmul.mubr.msk.f32.gmra.mrb[18].mxu0 %vm491_vm8, %v660_v52  ;;  %v661_v3 = vmul.f32 %v4056_v36, %v649_v60 }
 0x23f   :  { %v630_v63 = vadd.f32 %v620_v61, %v5303_v23  ;;  %v4382_v1 = vpop.f32.mrb[21].mxu1  ;;  %4397 = vmatprep.mubr.msk.f32.mxu0 %vm5089_vm1, %v5088_v13 }
 0x240   :  { %v623_v54 = vpop.f32.mrb[22].mxu1 }
 0x241   :  { %v635_v4 = vadd.f32 %v630_v63, %v5265_v57  ;;  %v4383_v5 = vpop.f32.mrb[23].mxu1  ;;  %v801_v57 = vld [vmem:[%s4005_s12] sm:$0x3] }
 0x242   :  { %4398 = vmatmul.mubr.msk.f32.gmra.mrb[20].mxu0 %vm491_vm8, %v661_v3  ;;  %4404 = vmatpush3.msk.msra.mxu1 %vm817_vm9, %v801_v57 }
 0x243   :  { %vm640_vm7 = vcmp.gt.f32.partialorder %v635_v4, 0.0  ;;  %v645_v8 = vmul.f32 0.2, %v635_v4  ;;  %4400 = vmatprep.mubr.msk.f32.mxu0 %vm5089_vm1, %v5088_v13  ;;  %4454 = vmatprep.subr.bf16.mxu1 %v5088_v13 }
 0x245   :  { %v650_v10 = vsel %vm640_vm7, %v635_v4, %v645_v8 }
 0x246   :  { %v662_v12 = vmul.f32 %v4056_v36, %v650_v10 }
 0x248   :  { %4401 = vmatmul.mubr.msk.f32.gmra.mrb[22].mxu0 %vm491_vm8, %v662_v12 }
 0x249   :  { %4426 = vmatprep.mubr.msk.bf16.mxu0 %vm5089_vm1, %v5088_v13 }
 0x309   :  { %v746_v22 = vpop.f32.mrb[2].mxu0 }
 0x30a   :  { %v4390_v24 = vpop.f32.mrb[3].mxu0  ;;  %v771_v36 = vsel %vm770_vm10, %v746_v22, -inf }
 0x30d   :  { %v751_v25 = vpop.f32.mrb[16].mxu0 }
 0x30e   :  { %v4393_v27 = vpop.f32.mrb[17].mxu0  ;;  %v772_v41 = vsel %vm770_vm10, %v751_v25, -inf }
 0x311   :  { %v756_v28 = vpop.f32.mrb[18].mxu0 }
 0x312   :  { %v4396_v29 = vpop.f32.mrb[19].mxu0  ;;  %v773_v31 = vsel %vm770_vm10, %v756_v28, -inf }
 0x315   :  { %v761_v30 = vpop.f32.mrb[20].mxu0 }
 0x316   :  { %v774_v32 = vsel %vm770_vm10, %v761_v30, -inf  ;;  %v4399_v33 = vpop.f32.mrb[21].mxu0 }
 0x317   :  { %v778_v34 = vmax.f32 %v773_v31, %v774_v32 }
 0x31b   :  { %v766_v35 = vpop.f32.mrb[22].mxu0 }
 0x31c   :  { %v775_v37 = vsel %vm770_vm10, %v766_v35, -inf  ;;  %v4402_v38 = vpop.f32.mrb[23].mxu0 }
 0x31d   :  { %v776_v40 = vmax.f32 %v771_v36, %v775_v37 }
 0x31f   :  { %v777_v42 = vmax.f32 %v776_v40, %v772_v41  ;;  %v5370_v40 = vshrl.u32 %v202_v20, 7 }
 0x321   :  { %v779_v43 = vmax.f32 %v777_v42, %v778_v34  ;;  %v4040_v42 = vld [vmem:[%s3997_s17] ss:$0 sm:$0xff] }
 0x322   :  { %vm278_vm11 = vcmp.eq.s32.totalorder %v4040_v42, %v5370_v40 }
 0x323   :  { %v780_v44 = vrot.slane %v779_v43, 4 }
 0x325   :  { %v781_v46 = vmax.f32 %v779_v43, %v780_v44 }
 0x327   :  { %v782_v49 = vrot.slane %v781_v46, 2 }
 0x329   :  { %v783_v48 = vmax.f32 %v781_v46, %v782_v49 }
 0x32b   :  { %v784_v51 = vrot.slane %v783_v48, 1 }
 0x32d   :  { %v785_v53 = vmax.f32 %v783_v48, %v784_v51 }
 0x32f   :  { %v786_v50 = vsub.f32 %v746_v22, %v785_v53  ;;  %v787_v55 = vsub.f32 %v751_v25, %v785_v53  ;;  %v788_v56 = vsub.f32 %v756_v28, %v785_v53  ;;  %v789_v58 = vsub.f32 %v761_v30, %v785_v53 }
 0x330   :  { %v790_v59 = vsub.f32 %v766_v35, %v785_v53 }
 0x331   :  { %v791_v52 = vmul.f32 1.442695, %v786_v50  ;;  %v793_v60 = vmul.f32 1.442695, %v787_v55  ;;  %v795_v61 = vmul.f32 1.442695, %v788_v56 }
 0x332   :  { %v797_v63 = vmul.f32 1.442695, %v789_v58  ;;  %v799_v54 = vmul.f32 1.442695, %v790_v59  ;;  %v280_v55 = vsel %vm278_vm11, 1.0, %v5088_v13 }
 0x333   :  { %4967 = vpow2.f32 %v791_v52 }
 0x334   :  { %4969 = vpow2.f32 %v793_v60 }
 0x335   :  { %4971 = vpow2.f32 %v795_v61 }
 0x336   :  { %4973 = vpow2.f32 %v797_v63 }
 0x337   :  { %4975 = vpow2.f32 %v799_v54 }
 0x33d   :  { %v4968_v1 = vpop.eup %4967 }
 0x33e   :  { %4406 = vmatmul.mubr.msk.f32.vlgmr.msra.gmra.mrb[10].mxu1 %vm770_vm10, %v4968_v1  ;;  %v4970_v3 = vpop.eup %4969 }
 0x33f   :  { %4408 = vmatprep.mubr.msk.f32.mxu1 %vm5089_vm1, %v5088_v13  ;;  %v4972_v4 = vpop.eup %4971 }
 0x340   :  { %v4974_v5 = vpop.eup %4973 }
 0x341   :  { %v4976_v8 = vpop.eup %4975 }
 0x342   :  { %4409 = vmatmul.mubr.msk.f32.gmra.mrb[24].mxu1 %vm770_vm10, %v4970_v3  ;;  %v283_v3 = vld [vmem:[%s5389_s21] sm:$0xff] }
 0x343   :  { %4411 = vmatprep.mubr.msk.f32.mxu1 %vm5089_vm1, %v5088_v13  ;;  %vm285_vm14 = vcmp.lt.s32.totalorder %v283_v3, 3 }
 0x346   :  { %4412 = vmatmul.mubr.msk.f32.gmra.mrb[26].mxu1 %vm770_vm10, %v4972_v4  ;;  %v284_v4 = vld [vmem:[%s5389_s21 + $0x8] sm:$0xff] }
 0x347   :  { %4414 = vmatprep.mubr.msk.f32.mxu1 %vm5089_vm1, %v5088_v13  ;;  %vm286_vm15 = vcmp.lt.s32.totalorder %v284_v4, 3 }
 0x34a   :  { %4415 = vmatmul.mubr.msk.f32.gmra.mrb[28].mxu1 %vm770_vm10, %v4974_v5  ;;  %v287_v5 = vsel %vm285_vm14, 1.0, %v5088_v13 }
 0x34b   :  { %4417 = vmatprep.mubr.msk.f32.mxu1 %vm5089_vm1, %v5088_v13 }
 0x34e   :  { %4418 = vmatmul.mubr.msk.f32.gmra.mrb[30].mxu1 %vm770_vm10, %v4976_v8  ;;  %v288_v8 = vsel %vm286_vm15, 1.0, %v5088_v13 }
 0x34f   :  { %4456 = vmatprep.mubr.msk.bf16.mxu1 %vm5089_vm1, %v5088_v13 }
 0x411   :  { %v887_v10 = vpop.f32.mrb[10].mxu1 }
 0x412   :  { %v911_v12 = vmul.f32 %v887_v10, %v5295_v7  ;;  %v4407_v57 = vpop.f32.mrb[11].mxu1 }
 0x415   :  { %v892_v22 = vpop.f32.mrb[24].mxu1 }
 0x416   :  { %v4918_v24 = vpack.i.bf16 %v892_v22, %v887_v10  ;;  %v912_v25 = vmul.f32 %v892_v22, %v5297_v9  ;;  %v4410_v27 = vpop.f32.mrb[25].mxu1  ;;  %v1097_v22 = vld [vmem:[%s4009_s24] sm:$0xff] }
 0x417   :  { %v4069_v27 = vld [vmem:[%s4006_s1] ss:$0 sm:$0xff]  ;;  %s5108_s1 = smov 21  }
 0x418   :  { %4919 = vrot.lane.b32.xlu1 %v4918_v24, %s5098_s13  ;;  %v1098_v24 = vld [vmem:[%s4009_s24 + $0x8] sm:$0xff]  ;;  %s5107_s24 = smov 19   ;;  %s4014_s4 = sld [smem:[%s6058_s0 + %s5108_s1]]  }
 0x419   :  { %v897_v28 = vpop.f32.mrb[26].mxu1  ;;  %s4012_s29 = sld [smem:[%s6058_s0 + %s5107_s24]]   ;;  %s5137_s24 = smov 45  }
 0x41a   :  { %v913_v29 = vmul.f32 %v897_v28, %v5299_v11  ;;  %v4413_v30 = vpop.f32.mrb[27].mxu1 }
 0x41d   :  { %v902_v31 = vpop.f32.mrb[28].mxu1 }
 0x41e   :  { %v4923_v32 = vpack.i.bf16 %v902_v31, %v897_v28  ;;  %v914_v33 = vmul.f32 %v902_v31, %v5301_v14  ;;  %v4416_v34 = vpop.f32.mrb[29].mxu1 }
 0x420   :  { %4924 = vrot.lane.b32.xlu0 %v4923_v32, %s5098_s13 }
 0x421   :  { %v907_v7 = vpop.f32.mrb[30].mxu1 }
 0x422   :  { %v915_v35 = vmul.f32 %v907_v7, %v5303_v23  ;;  %929 = vrot.lane.b32.xlu1 %v907_v7, %s5098_s13  ;;  %v4419_v9 = vpop.f32.mrb[31].mxu1  ;;  %v272_v23 = vadd.s32 8, %v5370_v40 }
 0x424   :  { %vm279_vm12 = vcmp.eq.s32.totalorder %v4040_v42, %v272_v23 }
 0x425   :  { %v281_v56 = vsel %vm279_vm12, 1.0, %v5088_v13 }
 0x426   :  { %v5382_v59 = vpack.c.bf16 %v281_v56, %v280_v55 }
 0x48a   :  { %v4920_v11 = vpop.permute.xlu1 %4919 }
 0x48b   :  { %v4922_v36 = vunpack.i.h.bf16 %v4920_v11  ;;  %v4921_v37 = vunpack.i.l.bf16 %v4920_v11 }
 0x48d   :  { %v936_v38 = vsel %vm491_vm8, %v911_v12, %v4921_v37  ;;  %v937_v14 = vsel %vm491_vm8, %v912_v25, %v4922_v36  ;;  %v4928_v12 = vpack.i.bf16 %v288_v8, %v287_v5  ;;  %v4781_v25 = vpack.c.bf16 %v1098_v24, %v1097_v22 }
 0x48e   :  { %v941_v41 = vpack.c.bf16 %v937_v14, %v936_v38 }
 0x490   :  { %4421 = vmatpush3.bf16.msra.mxu0 %v941_v41 }
 0x491   :  { %4422 = vmatprep.subr.bf16.mxu0 %v5088_v13 }
 0x492   :  { %v4925_v43 = vpop.permute.xlu0 %4924 }
 0x493   :  { %v4927_v44 = vunpack.i.h.bf16 %v4925_v43  ;;  %v4926_v46 = vunpack.i.l.bf16 %v4925_v43 }
 0x494   :  { %v930_v49 = vpop.permute.xlu1 %929 }
 0x495   :  { %v938_v48 = vsel %vm491_vm8, %v913_v29, %v4926_v46  ;;  %v939_v51 = vsel %vm491_vm8, %v914_v33, %v4927_v44  ;;  %v940_v20 = vsel %vm491_vm8, %v915_v35, %v930_v49 }
 0x496   :  { %v942_v53 = vpack.c.bf16 %v939_v51, %v938_v48  ;;  %v943_v50 = vpack.c.bf16 %v940_v20, %v940_v20 }
 0x498   :  { %4423 = vmatpush3.bf16.msra.mxu0 %v942_v53  ;;  %v949_v58 = vsel %vm396_vm2, %v943_v50, 0 }
 0x499   :  { %4424 = vmatprep.subr.bf16.mxu0 %v5088_v13 }
 0x49c   :  { %4425 = vmatpush3.bf16.msra.mxu0 %v949_v58 }
 0x49d   :  { %4782 = vmatprep.subr.bf16.mxu0 %v4781_v25 }
 0x49f   :  { %4427 = vmatmul.mubr.msk.bf16.vlgmr.msra.gmra.mrb[24].mxu0 %vm944_vm13, %v5382_v59 }
 0x4a0   :  { %4784 = vmatpush3.bf16.msra.mxu0 %v4781_v25 }
 0x4a1   :  { %4437 = vmatprep.subr.mxu0 %v5088_v13 }
 0x572   :  { %v985_v52 = vpop.f32.mrb[24].mxu0 }
 0x573   :  { %v992_v60 = vmax.f32 %v985_v52, 1e-20  ;;  %v4428_v61 = vpop.f32.mrb[25].mxu0 }
 0x574   :  { %v988_v63 = vpop.f32.mrb[26].mxu0 }
 0x575   :  { %4977 = vrcp.f32 %v992_v60  ;;  %v993_v1 = vmax.f32 %v988_v63, 1e-20  ;;  %v4429_v54 = vpop.f32.mrb[27].mxu0 }
 0x577   :  { %4979 = vrcp.f32 %v993_v1 }
 0x57f   :  { %v4978_v10 = vpop.eup %4977 }
 0x580   :  { %998 = vrot.lane.b32.xlu0 %v4978_v10, %s5093_s30 }
 0x581   :  { %v4980_v57 = vpop.eup %4979 }
 0x582   :  { %1000 = vrot.lane.b32.xlu1 %v4980_v57, %s5093_s30 }
 0x584   :  { %4929 = vperm.xlu0 %4916, %v4928_v12  }
 0x5f2   :  { %v999_v28 = vpop.permute.xlu0 %998 }
 0x5f3   :  { %v1004_v29 = vmul.f32 %v999_v28, %v985_v52 }
 0x5f4   :  { %v1001_v30 = vpop.permute.xlu1 %1000 }
 0x5f5   :  { %v1013_v31 = vadd.f32 %v4069_v27, %v1004_v29  ;;  %v1005_v32 = vmul.f32 %v1001_v30, %v988_v63 }
 0x5f7   :  { %v1015_v33 = vmin.f32 %v1013_v31, 0.0  ;;  %v1014_v34 = vadd.f32 %v4069_v27, %v1005_v32  ;;  %vm1033_vm5 = vcmp.gt.f32.partialorder %v1013_v31, 0.0 }
 0x5f9   :  { %v1025_v7 = vmul.f32 1.442695, %v1015_v33  ;;  %v1016_v35 = vmin.f32 %v1014_v34, 0.0  ;;  %v1019_v11 = vmul.f32 0.5, %v1015_v33  ;;  %vm1017_vm4 = vcmp.gt.f32.partialorder %v1015_v33, -0.0001 }
 0x5fa   :  { %vm1034_vm7 = vcmp.gt.f32.partialorder %v1014_v34, 0.0 }
 0x5fb   :  { %4981 = vpow2.f32 %v1025_v7  ;;  %v1027_v9 = vmul.f32 1.442695, %v1016_v35  ;;  %v1020_v36 = vmul.f32 0.5, %v1016_v35  ;;  %v1021_v37 = vmul.f32 %v1019_v11, %v1015_v33  ;;  %v4072_v11 = vld [vmem:[%s4007_s5] ss:$0 sm:$0xff]  ;;  %s5109_s5 = smov 25  }
 0x5fc   :  { %vm1018_vm6 = vcmp.gt.f32.partialorder %v1016_v35, -0.0001  ;;  %s4018_s8 = sld [smem:[%s6058_s0 + %s5109_s5]]  }
 0x5fd   :  { %4983 = vpow2.f32 %v1027_v9  ;;  %v1022_v14 = vmul.f32 %v1020_v36, %v1016_v35  ;;  %v1023_v41 = vadd.f32 %v1021_v37, %v1015_v33 }
 0x5ff   :  { %v1024_v49 = vadd.f32 %v1022_v14, %v1016_v35 }
 0x603   :  { %v4930_v42 = vpop.permute.xlu0 %4929 }
 0x604   :  { %v5405_v51 = vunpack.i.l.bf16 %v4930_v42  ;;  %v5407_v53 = vunpack.i.h.bf16 %v4930_v42 }
 0x605   :  { %v4982_v38 = vpop.eup %4981 }
 0x606   :  { %v4070_v23 = vadd.f32 -1.0, %v4982_v38  ;;  %v4073_v38 = vld [vmem:[%s4008_s9] ss:$0 sm:$0xff]  ;;  %s5110_s9 = smov 22  }
 0x607   :  { %v4984_v43 = vpop.eup %4983  ;;  %s4015_s12 = sld [smem:[%s6058_s0 + %s5110_s9]]  }
 0x608   :  { %v1031_v44 = vsel %vm1017_vm4, %v1023_v41, %v4070_v23  ;;  %v4071_v48 = vadd.f32 -1.0, %v4984_v43  ;;  %v1187_v43 = vld [vmem:[%s4011_s14] sm:$0xf]  ;;  %s5111_s14 = smov 23  }
 0x609   :  { %v1035_v46 = vsel %vm1033_vm5, %v1013_v31, %v1031_v44  ;;  %s4016_s17 = sld [smem:[%s6058_s0 + %s5111_s14]]  }
 0x60a   :  { %v1032_v20 = vsel %vm1018_vm6, %v1024_v49, %v4071_v48  ;;  %v1047_v50 = vmul.f32 %v5405_v51, %v1035_v46 }
 0x60b   :  { %v1036_v55 = vsel %vm1034_vm7, %v1014_v34, %v1032_v20 }
 0x60c   :  { %v1048_v56 = vmul.f32 %v5407_v53, %v1036_v55  ;;  %v1049_v58 = vsel %vm491_vm8, %v1047_v50, 0.0 }
 0x60e   :  { %v1050_v52 = vsel %vm491_vm8, %v1048_v56, 0.0 }
 0x60f   :  { %v1051_v60 = vadd.f32 %v1050_v52, %v1049_v58 }
 0x611   :  { %v1052_v61 = vrot.slane %v1051_v60, 4 }
 0x613   :  { %v1053_v63 = vadd.f32 %v1052_v61, %v1051_v60 }
 0x615   :  { %v1054_v1 = vrot.slane %v1053_v63, 2 }
 0x617   :  { %v1055_v54 = vadd.f32 %v1054_v1, %v1053_v63  ;;  %v1435_v63 = vld [vmem:[%s4013_s23] sm:$0xff]  ;;  %v1436_v1 = vld [vmem:[%s4013_s23 + $0x8] sm:$0xff]  ;;  %s5113_s23 = smov 27  }
 0x618   :  { %s4020_s28 = sld [smem:[%s6058_s0 + %s5113_s23]]   ;;  %s5127_s23 = smov 6  }
 0x619   :  { %v1056_v3 = vrot.slane %v1055_v54, 1 }
 0x61b   :  { %v1057_v4 = vadd.f32 %v1056_v3, %v1055_v54  ;;  %v4786_v54 = vpack.c.bf16 %v1436_v1, %v1435_v63 }
 0x61d   :  { %v1058_v5 = vmul.f32 0.083333336, %v1057_v4 }
 0x61f   :  { %v1059_v8 = vsub.f32 %v1035_v46, %v1058_v5  ;;  %v1060_v10 = vsub.f32 %v1036_v55, %v1058_v5 }
 0x621   :  { %v1061_v12 = vmul.f32 %v5405_v51, %v1059_v8  ;;  %v1062_v57 = vmul.f32 %v5407_v53, %v1060_v10 }
 0x623   :  { %v1063_v22 = vmul.f32 %v1061_v12, %v1061_v12  ;;  %v1064_v24 = vmul.f32 %v1062_v57, %v1062_v57 }
 0x625   :  { %v1065_v25 = vsel %vm491_vm8, %v1063_v22, 0.0  ;;  %v1066_v27 = vsel %vm491_vm8, %v1064_v24, 0.0 }
 0x626   :  { %v1067_v28 = vadd.f32 %v1066_v27, %v1065_v25 }
 0x628   :  { %v1068_v29 = vrot.slane %v1067_v28, 4 }
 0x62a   :  { %v1069_v30 = vadd.f32 %v1068_v29, %v1067_v28 }
 0x62c   :  { %v1070_v31 = vrot.slane %v1069_v30, 2 }
 0x62e   :  { %v1071_v32 = vadd.f32 %v1070_v31, %v1069_v30 }
 0x630   :  { %v1072_v33 = vrot.slane %v1071_v32, 1 }
 0x632   :  { %v1073_v34 = vadd.f32 %v1072_v33, %v1071_v32 }
 0x634   :  { %v1074_v7 = vmul.f32 0.083333336, %v1073_v34 }
 0x636   :  { %v1075_v35 = vadd.f32 1e-05, %v1074_v7 }
 0x638   :  { %4985 = vrsqrt.f32 %v1075_v35 }
 0x642   :  { %v4986_v9 = vpop.eup %4985 }
 0x643   :  { %v1077_v36 = vmul.f32 %v4986_v9, %v1059_v8  ;;  %v1078_v37 = vmul.f32 %v4986_v9, %v1060_v10  ;;  %v4089_v9 = vld [vmem:[%s4012_s29] ss:$0 sm:$0xff]  ;;  %s5114_s29 = smov 26  }
 0x644   :  { %s4019_s3 = sld [smem:[%s6058_s0 + %s5114_s29]]  }
 0x645   :  { %v1086_v14 = vmul.f32 %v4072_v11, %v1077_v36  ;;  %v1087_v41 = vmul.f32 %v4072_v11, %v1078_v37 }
 0x647   :  { %v1095_v23 = vadd.f32 %v4073_v38, %v1086_v14  ;;  %v1096_v42 = vadd.f32 %v4073_v38, %v1087_v41 }
 0x649   :  { %4434 = vmatprep.mubr.msk.f32.mxu0 %vm491_vm8, %v1095_v23 }
 0x64a   :  { %4435 = vmatmul.mubr.msk.f32.vlgmr.msra.gmra.mrb[28].mxu0 %vm491_vm8, %v1096_v42 }
 0x64b   :  { %4439 = vmatprep.mubr.msk.f32.mxu0 %vm5089_vm1, %v5088_v13  ;;  %4438 = vmatpush3.msk.msra.mxu0 %vm396_vm2, %v1187_v43 }
 0x64c   :  { %4468 = vmatprep.subr.bf16.mxu0 %v5088_v13 }
 0x64e   :  { %4440 = vmatmul.mubr.msk.f32.vlgmr.msra.gmra.mrb[30].mxu0 %vm380_vm3, %v5182_v15  ;;  %v4074_v15 = vld [vmem:[%s4010_s18] ss:$0 sm:$0xff]  ;;  %s5112_s18 = smov 24  }
 0x64f   :  { %4442 = vmatprep.mubr.msk.f32.mxu0 %vm5089_vm1, %v5088_v13  ;;  %s4017_s22 = sld [smem:[%s6058_s0 + %s5112_s18]]  }
 0x652   :  { %4443 = vmatmul.mubr.msk.f32.gmra.mrb[32].mxu0 %vm380_vm3, %v5191_v16 }
 0x653   :  { %4445 = vmatprep.mubr.msk.f32.mxu0 %vm5089_vm1, %v5088_v13 }
 0x656   :  { %4446 = vmatmul.mubr.msk.f32.gmra.mrb[34].mxu0 %vm380_vm3, %v5198_v17 }
 0x657   :  { %4448 = vmatprep.mubr.msk.f32.mxu0 %vm5089_vm1, %v5088_v13 }
 0x65a   :  { %4449 = vmatmul.mubr.msk.f32.gmra.mrb[36].mxu0 %vm380_vm3, %v5205_v18 }
 0x65b   :  { %4451 = vmatprep.mubr.msk.f32.mxu0 %vm5089_vm1, %v5088_v13 }
 0x65e   :  { %4452 = vmatmul.mubr.msk.f32.gmra.mrb[38].mxu0 %vm380_vm3, %v5212_v19 }
 0x65f   :  { %4470 = vmatprep.mubr.msk.bf16.mxu0 %vm5089_vm1, %v5088_v13 }
 0x71d   :  { %v4436_v16 = vpop.f32.mrb[28].mxu0 }
 0x71e   :  { %v1184_v17 = vadd.f32 %v4436_v16, %v4074_v15  ;;  %v1178_v44 = vpop.f32.mrb[29].mxu0 }
 0x71f   :  { %v1179_v46 = vadd.f32 %v4074_v15, %v1178_v44 }
 0x721   :  { %v1281_v18 = vpack.c.bf16 %v1184_v17, %v1179_v46  ;;  %v1257_v19 = vpop.f32.mrb[30].mxu0 }
 0x722   :  { %v4441_v49 = vpop.f32.mrb[31].mxu0 }
 0x723   :  { %1339 = vrot.lane.b32.xlu1 %v1281_v18, %s5093_s30  ;;  %4455 = vmatpush3.bf16.msra.mxu1 %v1281_v18 }
 0x724   :  { %4785 = vmatprep.subr.bf16.mxu1 %v5095_v6 }
 0x725   :  { %v1262_v20 = vpop.f32.mrb[32].mxu0 }
 0x726   :  { %4457 = vmatmul.mubr.msk.bf16.vlgmr.msra.gmra.mrb[32].mxu1 %vm491_vm8, %v5235_v39  ;;  %v4444_v50 = vpop.f32.mrb[33].mxu0 }
 0x727   :  { %4460 = vmatprep.mubr.msk.bf16.mxu1 %vm5089_vm1, %v5088_v13  ;;  %4787 = vmatpush3.bf16.msra.mxu1 %v4786_v54 }
 0x728   :  { %4518 = vmatprep.subr.bf16.mxu1 %v5088_v13 }
 0x729   :  { %v1267_v55 = vpop.f32.mrb[34].mxu0 }
 0x72a   :  { %v4447_v56 = vpop.f32.mrb[35].mxu0 }
 0x72d   :  { %v1272_v58 = vpop.f32.mrb[36].mxu0 }
 0x72e   :  { %4461 = vmatmul.mubr.msk.bf16.gmra.mrb[36].mxu1 %vm491_vm8, %v5247_v45  ;;  %v4450_v52 = vpop.f32.mrb[37].mxu0 }
 0x72f   :  { %4464 = vmatprep.mubr.msk.bf16.mxu1 %vm5089_vm1, %v5088_v13 }
 0x731   :  { %v5478_v60 = vpop.f32.mrb[38].mxu0 }
 0x732   :  { %v4453_v61 = vpop.f32.mrb[39].mxu0 }
 0x736   :  { %4465 = vmatmul.mubr.msk.bf16.gmra.mrb[40].mxu1 %vm491_vm8, %v5255_v47 }
 0x737   :  { %4486 = vmatprep.mubr.msk.f32.mxu1 %vm5089_vm1, %v5088_v13 }
 0x795   :  { %v1340_v48 = vpop.permute.xlu1 %1339 }
 0x796   :  { %4469 = vmatpush3.bf16.msra.mxu0 %v1340_v48 }
 0x797   :  { %4501 = vmatprep.subr.mxu0 %v5088_v13 }
 0x799   :  { %4471 = vmatmul.mubr.msk.bf16.vlgmr.msra.gmra.mrb[40].mxu0 %vm491_vm8, %v5225_v26 }
 0x79a   :  { %4474 = vmatprep.mubr.msk.bf16.mxu0 %vm5089_vm1, %v5088_v13 }
 0x7a1   :  { %4475 = vmatmul.mubr.msk.bf16.gmra.mrb[44].mxu0 %vm491_vm8, %v5276_v62 }
 0x7a2   :  { %4478 = vmatprep.mubr.msk.bf16.mxu0 %vm5089_vm1, %v5088_v13 }
 0x7a9   :  { %4479 = vmatmul.mubr.msk.bf16.gmra.mrb[48].mxu0 %vm491_vm8, %v5284_v2 }
 0x7aa   :  { %4503 = vmatprep.mubr.msk.f32.mxu0 %vm5089_vm1, %v5088_v13 }
 0x7f9   :  { %v5488_v3 = vpop.f32.mrb[32].mxu1 }
 0x7fa   :  { %v4458_v4 = vpop.f32.mrb[33].mxu1 }
 0x7fb   :  { %v5490_v5 = vpop.f32.mrb[34].mxu1 }
 0x7fc   :  { %v4459_v8 = vpop.f32.mrb[35].mxu1 }
 0x801   :  { %v5492_v10 = vpop.f32.mrb[36].mxu1 }
 0x802   :  { %v4462_v12 = vpop.f32.mrb[37].mxu1 }
 0x803   :  { %v5494_v57 = vpop.f32.mrb[38].mxu1 }
 0x804   :  { %v4463_v22 = vpop.f32.mrb[39].mxu1 }
 0x809   :  { %v5496_v24 = vpop.f32.mrb[40].mxu1 }
 0x80a   :  { %v4466_v25 = vpop.f32.mrb[41].mxu1 }
 0x80b   :  { %v1335_v27 = vpop.f32.mrb[42].mxu1 }
 0x80c   :  { %v4467_v28 = vpop.f32.mrb[43].mxu1 }
 0x86c   :  { %v1376_v29 = vpop.f32.mrb[40].mxu0 }
 0x86d   :  { %v1398_v30 = vadd.f32 %v1376_v29, %v5488_v3  ;;  %v4472_v31 = vpop.f32.mrb[41].mxu0 }
 0x86e   :  { %v1379_v32 = vpop.f32.mrb[42].mxu0 }
 0x86f   :  { %v1403_v33 = vadd.f32 %v1398_v30, %v1257_v19  ;;  %v1399_v34 = vadd.f32 %v1379_v32, %v5490_v5  ;;  %v4473_v7 = vpop.f32.mrb[43].mxu0 }
 0x871   :  { %vm1408_vm11 = vcmp.gt.f32.partialorder %v1403_v33, 0.0  ;;  %v1413_v35 = vmul.f32 0.2, %v1403_v33  ;;  %v1404_v11 = vadd.f32 %v1399_v34, %v1262_v20 }
 0x873   :  { %v1418_v36 = vsel %vm1408_vm11, %v1403_v33, %v1413_v35  ;;  %vm1409_vm12 = vcmp.gt.f32.partialorder %v1404_v11, 0.0  ;;  %v1414_v37 = vmul.f32 0.2, %v1404_v11 }
 0x874   :  { %v1430_v38 = vmul.f32 %v4089_v9, %v1418_v36  ;;  %v1384_v14 = vpop.f32.mrb[44].mxu0 }
 0x875   :  { %v1419_v41 = vsel %vm1409_vm12, %v1404_v11, %v1414_v37  ;;  %v1400_v23 = vadd.f32 %v1384_v14, %v5492_v10  ;;  %v4476_v42 = vpop.f32.mrb[45].mxu0 }
 0x876   :  { %v1387_v43 = vpop.f32.mrb[46].mxu0  ;;  %4487 = vmatmul.mubr.msk.f32.vlgmr.msra.gmra.mrb[44].mxu1 %vm491_vm8, %v1430_v38  ;;  %v1431_v44 = vmul.f32 %v4089_v9, %v1419_v41 }
 0x877   :  { %v1405_v15 = vadd.f32 %v1400_v23, %v1267_v55  ;;  %v1401_v16 = vadd.f32 %v1387_v43, %v5494_v57  ;;  %v4477_v17 = vpop.f32.mrb[47].mxu0  ;;  %4489 = vmatprep.mubr.msk.f32.mxu1 %vm5089_vm1, %v5088_v13 }
 0x879   :  { %vm1410_vm14 = vcmp.gt.f32.partialorder %v1405_v15, 0.0  ;;  %v1415_v46 = vmul.f32 0.2, %v1405_v15  ;;  %v1406_v18 = vadd.f32 %v1401_v16, %v1272_v58 }
 0x87a   :  { %4490 = vmatmul.mubr.msk.f32.gmra.mrb[46].mxu1 %vm491_vm8, %v1431_v44 }
 0x87b   :  { %v1420_v19 = vsel %vm1410_vm14, %v1405_v15, %v1415_v46  ;;  %vm1411_vm15 = vcmp.gt.f32.partialorder %v1406_v18, 0.0  ;;  %v1416_v49 = vmul.f32 0.2, %v1406_v18  ;;  %4492 = vmatprep.mubr.msk.f32.mxu1 %vm5089_vm1, %v5088_v13 }
 0x87c   :  { %v1392_v48 = vpop.f32.mrb[48].mxu0  ;;  %v1432_v20 = vmul.f32 %v4089_v9, %v1420_v19 }
 0x87d   :  { %v1421_v50 = vsel %vm1411_vm15, %v1406_v18, %v1416_v49  ;;  %v1402_v55 = vadd.f32 %v1392_v48, %v5496_v24  ;;  %v4480_v56 = vpop.f32.mrb[49].mxu0 }
 0x87e   :  { %v1395_v52 = vpop.f32.mrb[50].mxu0  ;;  %4493 = vmatmul.mubr.msk.f32.gmra.mrb[48].mxu1 %vm491_vm8, %v1432_v20  ;;  %v1433_v63 = vmul.f32 %v4089_v9, %v1421_v50 }
 0x87f   :  { %v1407_v61 = vadd.f32 %v1402_v55, %v5478_v60  ;;  %v4481_v58 = vpop.f32.mrb[51].mxu0  ;;  %4495 = vmatprep.mubr.msk.f32.mxu1 %vm5089_vm1, %v5088_v13  ;;  %v1572_v60 = vld [vmem:[%s4014_s4] sm:$0x3]  ;;  %s5115_s4 = smov 120  }
 0x880   :  { %4502 = vmatpush3.msk.msra.mxu0 %vm817_vm9, %v1572_v60 }
 0x881   :  { %vm1412_vm4 = vcmp.gt.f32.partialorder %v1407_v61, 0.0  ;;  %v1417_v1 = vmul.f32 0.2, %v1407_v61  ;;  %4552 = vmatprep.subr.bf16.mxu0 %v5088_v13 }
 0x882   :  { %4496 = vmatmul.mubr.msk.f32.gmra.mrb[50].mxu1 %vm491_vm8, %v1433_v63 }
 0x883   :  { %v1422_v54 = vsel %vm1412_vm4, %v1407_v61, %v1417_v1  ;;  %4498 = vmatprep.mubr.msk.f32.mxu1 %vm5089_vm1, %v5088_v13  ;;  %vm2344_vm4 = vcmask 1040384  }
 0x884   :  { %v1434_v4 = vmul.f32 %v4089_v9, %v1422_v54 }
 0x886   :  { %4499 = vmatmul.mubr.msk.f32.gmra.mrb[52].mxu1 %vm491_vm8, %v1434_v4 }
 0x887   :  { %4524 = vmatprep.mubr.msk.bf16.mxu1 %vm5089_vm1, %v5088_v13 }
 0x949   :  { %v1518_v8 = vpop.f32.mrb[44].mxu1 }
 0x94a   :  { %v4488_v12 = vpop.f32.mrb[45].mxu1  ;;  %v1542_v7 = vsel %vm770_vm10, %v1518_v8, -inf }
 0x94d   :  { %v1523_v22 = vpop.f32.mrb[46].mxu1 }
 0x94e   :  { %v4491_v25 = vpop.f32.mrb[47].mxu1  ;;  %v1543_v36 = vsel %vm770_vm10, %v1523_v22, -inf }
 0x951   :  { %v1528_v27 = vpop.f32.mrb[48].mxu1 }
 0x952   :  { %v4494_v28 = vpop.f32.mrb[49].mxu1  ;;  %v1544_v30 = vsel %vm770_vm10, %v1528_v27, -inf }
 0x955   :  { %v1533_v29 = vpop.f32.mrb[50].mxu1 }
 0x956   :  { %v1545_v31 = vsel %vm770_vm10, %v1533_v29, -inf  ;;  %v4497_v32 = vpop.f32.mrb[51].mxu1 }
 0x957   :  { %v1549_v33 = vmax.f32 %v1544_v30, %v1545_v31 }
 0x959   :  { %v1538_v34 = vpop.f32.mrb[52].mxu1 }
 0x95a   :  { %v1546_v35 = vsel %vm770_vm10, %v1538_v34, -inf  ;;  %v4500_v9 = vpop.f32.mrb[53].mxu1 }
 0x95b   :  { %v1547_v11 = vmax.f32 %v1542_v7, %v1546_v35 }
 0x95d   :  { %v1548_v37 = vmax.f32 %v1547_v11, %v1543_v36 }
 0x95f   :  { %v1550_v38 = vmax.f32 %v1548_v37, %v1549_v33 }
 0x961   :  { %v1551_v14 = vrot.slane %v1550_v38, 4 }
 0x963   :  { %v1552_v41 = vmax.f32 %v1550_v38, %v1551_v14 }
 0x965   :  { %v1553_v23 = vrot.slane %v1552_v41, 2 }
 0x967   :  { %v1554_v42 = vmax.f32 %v1552_v41, %v1553_v23 }
 0x969   :  { %v1555_v43 = vrot.slane %v1554_v42, 1 }
 0x96b   :  { %v1556_v15 = vmax.f32 %v1554_v42, %v1555_v43 }
 0x96d   :  { %v1557_v16 = vsub.f32 %v1518_v8, %v1556_v15  ;;  %v1558_v17 = vsub.f32 %v1523_v22, %v1556_v15  ;;  %v1559_v44 = vsub.f32 %v1528_v27, %v1556_v15  ;;  %v1560_v46 = vsub.f32 %v1533_v29, %v1556_v15 }
 0x96e   :  { %v1561_v18 = vsub.f32 %v1538_v34, %v1556_v15 }
 0x96f   :  { %v1562_v19 = vmul.f32 1.442695, %v1557_v16  ;;  %v1564_v49 = vmul.f32 1.442695, %v1558_v17  ;;  %v1566_v48 = vmul.f32 1.442695, %v1559_v44 }
 0x970   :  { %v1568_v20 = vmul.f32 1.442695, %v1560_v46  ;;  %v1570_v55 = vmul.f32 1.442695, %v1561_v18 }
 0x971   :  { %4987 = vpow2.f32 %v1562_v19 }
 0x972   :  { %4989 = vpow2.f32 %v1564_v49  ;;  %v1853_v49 = vld [vmem:[%s4018_s8] sm:$0xff] }
 0x973   :  { %4991 = vpow2.f32 %v1566_v48  ;;  %v1854_v48 = vld [vmem:[%s4018_s8 + $0x8] sm:$0xff]  ;;  %s5117_s8 = smov 28  }
 0x974   :  { %4993 = vpow2.f32 %v1568_v20  ;;  %v4788_v20 = vpack.c.bf16 %v1854_v48, %v1853_v49  ;;  %s4021_s11 = sld [smem:[%s6058_s0 + %s5117_s8]]  }
 0x975   :  { %4995 = vpow2.f32 %v1570_v55 }
 0x97b   :  { %v4988_v50 = vpop.eup %4987 }
 0x97c   :  { %4504 = vmatmul.mubr.msk.f32.vlgmr.msra.gmra.mrb[52].mxu0 %vm770_vm10, %v4988_v50  ;;  %v4990_v56 = vpop.eup %4989  ;;  %v4102_v50 = vld [vmem:[%s4015_s12] ss:$0 sm:$0xff]  ;;  %s5118_s12 = smov 30  }
 0x97d   :  { %4506 = vmatprep.mubr.msk.f32.mxu0 %vm5089_vm1, %v5088_v13  ;;  %v4992_v52 = vpop.eup %4991  ;;  %s4023_s16 = sld [smem:[%s6058_s0 + %s5118_s12]]  }
 0x97e   :  { %v4994_v61 = vpop.eup %4993 }
 0x97f   :  { %v4996_v58 = vpop.eup %4995 }
 0x980   :  { %4507 = vmatmul.mubr.msk.f32.gmra.mrb[54].mxu0 %vm770_vm10, %v4990_v56 }
 0x981   :  { %4509 = vmatprep.mubr.msk.f32.mxu0 %vm5089_vm1, %v5088_v13 }
 0x984   :  { %4510 = vmatmul.mubr.msk.f32.gmra.mrb[56].mxu0 %vm770_vm10, %v4992_v52 }
 0x985   :  { %4512 = vmatprep.mubr.msk.f32.mxu0 %vm5089_vm1, %v5088_v13 }
 0x988   :  { %4513 = vmatmul.mubr.msk.f32.gmra.mrb[58].mxu0 %vm770_vm10, %v4994_v61 }
 0x989   :  { %4515 = vmatprep.mubr.msk.f32.mxu0 %vm5089_vm1, %v5088_v13 }
 0x98c   :  { %4516 = vmatmul.mubr.msk.f32.gmra.mrb[60].mxu0 %vm770_vm10, %v4996_v58 }
 0x98d   :  { %4554 = vmatprep.mubr.msk.bf16.mxu0 %vm5089_vm1, %v5088_v13 }
 0xa4f   :  { %v1657_v63 = vpop.f32.mrb[52].mxu0 }
 0xa50   :  { %v1681_v1 = vmul.f32 %v1657_v63, %v5488_v3  ;;  %v4505_v54 = vpop.f32.mrb[53].mxu0 }
 0xa53   :  { %v1662_v4 = vpop.f32.mrb[54].mxu0 }
 0xa54   :  { %v4933_v60 = vpack.i.bf16 %v1662_v4, %v1657_v63  ;;  %v1682_v8 = vmul.f32 %v1662_v4, %v5490_v5  ;;  %v4508_v12 = vpop.f32.mrb[55].mxu0 }
 0xa56   :  { %4934 = vrot.lane.b32.xlu0 %v4933_v60, %s5098_s13 }
 0xa57   :  { %v1667_v22 = vpop.f32.mrb[56].mxu0 }
 0xa58   :  { %v1683_v25 = vmul.f32 %v1667_v22, %v5492_v10  ;;  %v4511_v27 = vpop.f32.mrb[57].mxu0 }
 0xa5b   :  { %v1672_v28 = vpop.f32.mrb[58].mxu0 }
 0xa5c   :  { %v4938_v29 = vpack.i.bf16 %v1672_v28, %v1667_v22  ;;  %v1684_v30 = vmul.f32 %v1672_v28, %v5494_v57  ;;  %v4514_v31 = vpop.f32.mrb[59].mxu0 }
 0xa5e   :  { %4939 = vrot.lane.b32.xlu1 %v4938_v29, %s5098_s13 }
 0xa5f   :  { %v1677_v3 = vpop.f32.mrb[60].mxu0 }
 0xa60   :  { %v1685_v32 = vmul.f32 %v1677_v3, %v5496_v24  ;;  %1699 = vrot.lane.b32.xlu0 %v1677_v3, %s5098_s13  ;;  %v4517_v5 = vpop.f32.mrb[61].mxu0 }
 0xac8   :  { %v4935_v33 = vpop.permute.xlu0 %4934 }
 0xac9   :  { %v4937_v34 = vunpack.i.h.bf16 %v4935_v33  ;;  %v4936_v7 = vunpack.i.l.bf16 %v4935_v33 }
 0xacb   :  { %v1706_v35 = vsel %vm491_vm8, %v1681_v1, %v4936_v7  ;;  %v1707_v10 = vsel %vm491_vm8, %v1682_v8, %v4937_v34 }
 0xacc   :  { %v1711_v9 = vpack.c.bf16 %v1707_v10, %v1706_v35 }
 0xace   :  { %4519 = vmatpush3.bf16.msra.mxu1 %v1711_v9 }
 0xacf   :  { %4520 = vmatprep.subr.bf16.mxu1 %v5088_v13 }
 0xad0   :  { %v4940_v57 = vpop.permute.xlu1 %4939 }
 0xad1   :  { %v4942_v11 = vunpack.i.h.bf16 %v4940_v57  ;;  %v4941_v36 = vunpack.i.l.bf16 %v4940_v57 }
 0xad2   :  { %v1700_v37 = vpop.permute.xlu0 %1699 }
 0xad3   :  { %v1708_v24 = vsel %vm491_vm8, %v1683_v25, %v4941_v36  ;;  %v1709_v38 = vsel %vm491_vm8, %v1684_v30, %v4942_v11  ;;  %v1710_v14 = vsel %vm491_vm8, %v1685_v32, %v1700_v37 }
 0xad4   :  { %v1712_v41 = vpack.c.bf16 %v1709_v38, %v1708_v24  ;;  %v1713_v23 = vpack.c.bf16 %v1710_v14, %v1710_v14 }
 0xad6   :  { %4521 = vmatpush3.bf16.msra.mxu1 %v1712_v41  ;;  %v1715_v42 = vsel %vm396_vm2, %v1713_v23, 0 }
 0xad7   :  { %4522 = vmatprep.subr.bf16.mxu1 %v5088_v13 }
 0xada   :  { %4523 = vmatpush3.bf16.msra.mxu1 %v1715_v42 }
 0xadb   :  { %4789 = vmatprep.subr.bf16.mxu1 %v4788_v20 }
 0xadd   :  { %4525 = vmatmul.mubr.msk.bf16.vlgmr.msra.gmra.mrb[56].mxu1 %vm944_vm13, %v5382_v59 }
 0xade   :  { %4791 = vmatpush3.bf16.msra.mxu1 %v4788_v20 }
 0xadf   :  { %4535 = vmatprep.subr.mxu1 %v5088_v13 }
 0xbb0   :  { %v1751_v43 = vpop.f32.mrb[56].mxu1 }
 0xbb1   :  { %v1758_v15 = vmax.f32 %v1751_v43, 1e-20  ;;  %v4526_v16 = vpop.f32.mrb[57].mxu1 }
 0xbb2   :  { %v1754_v17 = vpop.f32.mrb[58].mxu1 }
 0xbb3   :  { %4997 = vrcp.f32 %v1758_v15  ;;  %v1759_v44 = vmax.f32 %v1754_v17, 1e-20  ;;  %v4527_v46 = vpop.f32.mrb[59].mxu1 }
 0xbb5   :  { %4999 = vrcp.f32 %v1759_v44 }
 0xbbd   :  { %v4998_v18 = vpop.eup %4997 }
 0xbbe   :  { %1764 = vrot.lane.b32.xlu1 %v4998_v18, %s5093_s30 }
 0xbbf   :  { %v5000_v19 = vpop.eup %4999 }
 0xbc0   :  { %1766 = vrot.lane.b32.xlu0 %v5000_v19, %s5093_s30 }
 0xc30   :  { %v1765_v55 = vpop.permute.xlu1 %1764 }
 0xc31   :  { %v1770_v56 = vmul.f32 %v1765_v55, %v1751_v43 }
 0xc32   :  { %v1767_v52 = vpop.permute.xlu0 %1766 }
 0xc33   :  { %v1779_v61 = vadd.f32 %v4102_v50, %v1770_v56  ;;  %v1771_v58 = vmul.f32 %v1767_v52, %v1754_v17 }
 0xc35   :  { %v1781_v63 = vmin.f32 %v1779_v61, 0.0  ;;  %v1780_v1 = vadd.f32 %v4102_v50, %v1771_v58  ;;  %vm1799_vm5 = vcmp.gt.f32.partialorder %v1779_v61, 0.0  ;;  %v4105_v58 = vld [vmem:[%s4016_s17] ss:$0 sm:$0xff]  ;;  %s5119_s17 = smov 36  }
 0xc36   :  { %s4029_s20 = sld [smem:[%s6058_s0 + %s5119_s17]]  }
 0xc37   :  { %v1791_v54 = vmul.f32 1.442695, %v1781_v63  ;;  %v1782_v4 = vmin.f32 %v1780_v1, 0.0  ;;  %v1785_v8 = vmul.f32 0.5, %v1781_v63  ;;  %vm1783_vm10 = vcmp.gt.f32.partialorder %v1781_v63, -0.0001 }
 0xc38   :  { %vm1800_vm7 = vcmp.gt.f32.partialorder %v1780_v1, 0.0 }
 0xc39   :  { %5001 = vpow2.f32 %v1791_v54  ;;  %v1793_v60 = vmul.f32 1.442695, %v1782_v4  ;;  %v1786_v12 = vmul.f32 0.5, %v1782_v4  ;;  %v1787_v22 = vmul.f32 %v1785_v8, %v1781_v63  ;;  %v4106_v54 = vld [vmem:[%s4017_s22] ss:$0 sm:$0xff]  ;;  %s5120_s22 = smov 34  }
 0xc3a   :  { %vm1784_vm6 = vcmp.gt.f32.partialorder %v1782_v4, -0.0001  ;;  %s4027_s27 = sld [smem:[%s6058_s0 + %s5120_s22]]   ;;  %s5126_s22 = smov 104  }
 0xc3b   :  { %5003 = vpow2.f32 %v1793_v60  ;;  %v1788_v27 = vmul.f32 %v1786_v12, %v1782_v4  ;;  %v1789_v28 = vadd.f32 %v1787_v22, %v1781_v63  ;;  %v1943_v22 = vld [vmem:[%s4020_s28] sm:$0xf]  ;;  %s5121_s28 = smov 37  }
 0xc3c   :  { %s4030_s2 = sld [smem:[%s6058_s0 + %s5121_s28]]  }
 0xc3d   :  { %v1790_v32 = vadd.f32 %v1788_v27, %v1782_v4  ;;  %v5078_v27 = vld [vmem:[%s5179_s25 + $0x8] sm:$0xff]  ;;  %s3999_s28 = sld [smem:[%s6058_s0 + %s5127_s23]]  }
 0xc43   :  { %v5002_v25 = vpop.eup %5001 }
 0xc44   :  { %v4103_v29 = vadd.f32 -1.0, %v5002_v25  ;;  %v5077_v25 = vld [vmem:[%s5179_s25] sm:$0xff] }
 0xc45   :  { %v5004_v30 = vpop.eup %5003 }
 0xc46   :  { %v1797_v31 = vsel %vm1783_vm10, %v1789_v28, %v4103_v29  ;;  %v4104_v5 = vadd.f32 -1.0, %v5004_v30  ;;  %v5079_v28 = vld [vmem:[%s5179_s25 + $0x10] sm:$0xff]  ;;  %v5080_v29 = vld [vmem:[%s5179_s25 + $0x18] sm:$0xff]  ;;  %v5081_v30 = vld [vmem:[%s5179_s25 + $0x20] sm:$0xff]  ;;  %s5116_s25 = smov 29   ;;  %vm2297_vm10 = vcmask 7168  }
 0xc47   :  { %v1801_v3 = vsel %vm1799_vm5, %v1779_v61, %v1797_v31  ;;  %v4107_v31 = vld [vmem:[%s4019_s3] ss:$0 sm:$0xff]  ;;  %s4022_s7 = sld [smem:[%s6058_s0 + %s5116_s25]]   ;;  %s5122_s3 = smov 35  }
 0xc48   :  { %v1803_v33 = vmul.f32 %v5405_v51, %v1801_v3  ;;  %v1798_v34 = vsel %vm1784_vm6, %v1790_v32, %v4104_v5  ;;  %s4028_s6 = sld [smem:[%s6058_s0 + %s5122_s3]]   ;;  %s5132_s25 = smov 40  }
 0xc49   :  { %v1802_v7 = vsel %vm1800_vm7, %v1780_v1, %v1798_v34 }
 0xc4a   :  { %v1804_v35 = vmul.f32 %v5407_v53, %v1802_v7  ;;  %v1805_v10 = vsel %vm491_vm8, %v1803_v33, 0.0 }
 0xc4c   :  { %v1806_v9 = vsel %vm491_vm8, %v1804_v35, 0.0 }
 0xc4d   :  { %v1807_v57 = vadd.f32 %v1806_v9, %v1805_v10 }
 0xc4f   :  { %v1808_v11 = vrot.slane %v1807_v57, 4 }
 0xc51   :  { %v1809_v36 = vadd.f32 %v1808_v11, %v1807_v57 }
 0xc53   :  { %v1810_v37 = vrot.slane %v1809_v36, 2 }
 0xc55   :  { %v1811_v24 = vadd.f32 %v1810_v37, %v1809_v36 }
 0xc57   :  { %v1812_v38 = vrot.slane %v1811_v24, 1 }
 0xc59   :  { %v1813_v14 = vadd.f32 %v1812_v38, %v1811_v24 }
 0xc5b   :  { %v1814_v41 = vmul.f32 0.083333336, %v1813_v14 }
 0xc5d   :  { %v1815_v23 = vsub.f32 %v1801_v3, %v1814_v41  ;;  %v1816_v42 = vsub.f32 %v1802_v7, %v1814_v41 }
 0xc5f   :  { %v1817_v43 = vmul.f32 %v5405_v51, %v1815_v23  ;;  %v1818_v15 = vmul.f32 %v5407_v53, %v1816_v42 }
 0xc61   :  { %v1819_v16 = vmul.f32 %v1817_v43, %v1817_v43  ;;  %v1820_v17 = vmul.f32 %v1818_v15, %v1818_v15 }
 0xc63   :  { %v1821_v44 = vsel %vm491_vm8, %v1819_v16, 0.0  ;;  %v1822_v46 = vsel %vm491_vm8, %v1820_v17, 0.0 }
 0xc64   :  { %v1823_v18 = vadd.f32 %v1822_v46, %v1821_v44 }
 0xc66   :  { %v1824_v19 = vrot.slane %v1823_v18, 4 }
 0xc68   :  { %v1825_v49 = vadd.f32 %v1824_v19, %v1823_v18 }
 0xc6a   :  { %v1826_v48 = vrot.slane %v1825_v49, 2 }
 0xc6c   :  { %v1827_v20 = vadd.f32 %v1826_v48, %v1825_v49 }
 0xc6e   :  { %v1828_v50 = vrot.slane %v1827_v20, 1 }
 0xc70   :  { %v1829_v55 = vadd.f32 %v1828_v50, %v1827_v20 }
 0xc72   :  { %v1830_v56 = vmul.f32 0.083333336, %v1829_v55  ;;  %v4122_v55 = vld [vmem:[%s4021_s11] ss:$0 sm:$0xff]  ;;  %s5124_s11 = smov 32  }
 0xc73   :  { %s4025_s15 = sld [smem:[%s6058_s0 + %s5124_s11]]  }
 0xc74   :  { %v1831_v52 = vadd.f32 1e-05, %v1830_v56 }
 0xc76   :  { %5005 = vrsqrt.f32 %v1831_v52 }
 0xc80   :  { %v5006_v61 = vpop.eup %5005 }
 0xc81   :  { %v1834_v63 = vmul.f32 %v5006_v61, %v1816_v42  ;;  %v1833_v1 = vmul.f32 %v5006_v61, %v1815_v23 }
 0xc83   :  { %v1842_v4 = vmul.f32 %v4105_v58, %v1833_v1  ;;  %v1843_v60 = vmul.f32 %v4105_v58, %v1834_v63 }
 0xc85   :  { %v1851_v8 = vadd.f32 %v4106_v54, %v1842_v4  ;;  %v1852_v12 = vadd.f32 %v4106_v54, %v1843_v60 }
 0xc87   :  { %4532 = vmatprep.mubr.msk.f32.mxu1 %vm491_vm8, %v1851_v8 }
 0xc88   :  { %4533 = vmatmul.mubr.msk.f32.vlgmr.msra.gmra.mrb[54].mxu1 %vm491_vm8, %v1852_v12 }
 0xc89   :  { %4537 = vmatprep.mubr.msk.f32.mxu1 %vm5089_vm1, %v5088_v13  ;;  %4536 = vmatpush3.msk.msra.mxu1 %vm396_vm2, %v1943_v22 }
 0xc8a   :  { %4566 = vmatprep.subr.bf16.mxu1 %v5088_v13 }
 0xc8c   :  { %4538 = vmatmul.mubr.msk.f32.vlgmr.msra.gmra.mrb[60].mxu1 %vm380_vm3, %v5077_v25 }
 0xc8d   :  { %4540 = vmatprep.mubr.msk.f32.mxu1 %vm5089_vm1, %v5088_v13 }
 0xc90   :  { %4541 = vmatmul.mubr.msk.f32.gmra.mrb[62].mxu1 %vm380_vm3, %v5078_v27 }
 0xc91   :  { %4543 = vmatprep.mubr.msk.f32.mxu1 %vm5089_vm1, %v5088_v13 }
 0xc94   :  { %4544 = vmatmul.mubr.msk.f32.gmra.mrb[64].mxu1 %vm380_vm3, %v5079_v28 }
 0xc95   :  { %4546 = vmatprep.mubr.msk.f32.mxu1 %vm5089_vm1, %v5088_v13 }
 0xc98   :  { %4547 = vmatmul.mubr.msk.f32.gmra.mrb[66].mxu1 %vm380_vm3, %v5080_v29 }
 0xc99   :  { %4549 = vmatprep.mubr.msk.f32.mxu1 %vm5089_vm1, %v5088_v13 }
 0xc9c   :  { %4550 = vmatmul.mubr.msk.f32.gmra.mrb[68].mxu1 %vm380_vm3, %v5081_v30 }
 0xc9d   :  { %4568 = vmatprep.mubr.msk.bf16.mxu1 %vm5089_vm1, %v5088_v13 }
 0xd5b   :  { %v4534_v3 = vpop.f32.mrb[54].mxu1 }
 0xd5c   :  { %v1940_v32 = vadd.f32 %v4534_v3, %v4107_v31  ;;  %v1934_v5 = vpop.f32.mrb[55].mxu1 }
 0xd5d   :  { %v1935_v33 = vadd.f32 %v4107_v31, %v1934_v5 }
 0xd5f   :  { %v2037_v34 = vpack.c.bf16 %v1940_v32, %v1935_v33  ;;  %v2013_v7 = vpop.f32.mrb[60].mxu1 }
 0xd60   :  { %v4539_v35 = vpop.f32.mrb[61].mxu1 }
 0xd61   :  { %2095 = vrot.lane.b32.xlu1 %v2037_v34, %s5115_s4  ;;  %4553 = vmatpush3.bf16.msra.mxu0 %v2037_v34 }
 0xd62   :  { %4580 = vmatprep.subr.mxu0 %v5088_v13 }
 0xd64   :  { %4555 = vmatmul.mubr.msk.bf16.vlgmr.msra.gmra.mrb[64].mxu0 %vm491_vm8, %v5235_v39  ;;  %v2018_v39 = vpop.f32.mrb[62].mxu1 }
 0xd65   :  { %4558 = vmatprep.mubr.msk.bf16.mxu0 %vm5089_vm1, %v5088_v13  ;;  %v4542_v9 = vpop.f32.mrb[63].mxu1 }
 0xd6c   :  { %4559 = vmatmul.mubr.msk.bf16.gmra.mrb[68].mxu0 %vm491_vm8, %v5247_v45  ;;  %v2023_v45 = vpop.f32.mrb[64].mxu1 }
 0xd6d   :  { %4562 = vmatprep.mubr.msk.bf16.mxu0 %vm5089_vm1, %v5088_v13  ;;  %v4545_v57 = vpop.f32.mrb[65].mxu1 }
 0xd6e   :  { %v2328_v57 = vld [vmem:[%s4023_s16] sm:$0x1]  ;;  %s5125_s16 = smov 33  }
 0xd6f   :  { %s4026_s19 = sld [smem:[%s6058_s0 + %s5125_s16]]  }
 0xd74   :  { %4563 = vmatmul.mubr.msk.bf16.gmra.mrb[72].mxu0 %vm491_vm8, %v5255_v47  ;;  %v2028_v47 = vpop.f32.mrb[66].mxu1 }
 0xd75   :  { %4582 = vmatprep.mubr.msk.f32.mxu0 %vm5089_vm1, %v5088_v13  ;;  %v4548_v11 = vpop.f32.mrb[67].mxu1 }
 0xd76   :  { %v5643_v36 = vpop.f32.mrb[68].mxu1 }
 0xd77   :  { %v4551_v37 = vpop.f32.mrb[69].mxu1 }
 0xdd3   :  { %v2096_v10 = vpop.permute.xlu1 %2095 }
 0xdd4   :  { %4567 = vmatpush3.bf16.msra.mxu1 %v2096_v10 }
 0xdd5   :  { %4597 = vmatprep.subr.mxu1 %v5088_v13 }
 0xdd7   :  { %4569 = vmatmul.mubr.msk.bf16.vlgmr.msra.gmra.mrb[72].mxu1 %vm491_vm8, %v5225_v26  ;;  %v2191_v26 = vld [vmem:[%s4022_s7] sm:$0xff]  ;;  %s5123_s7 = smov 31  }
 0xdd8   :  { %4572 = vmatprep.mubr.msk.bf16.mxu1 %vm5089_vm1, %v5088_v13  ;;  %4581 = vmatpush3.msra.mxu0 %v2191_v26  ;;  %s4024_s10 = sld [smem:[%s6058_s0 + %s5123_s7]]  }
 0xdd9   :  { %4614 = vmatprep.subr.bf16.mxu0 %v5088_v13  ;;  %4598 = vmatpush3.msk.msra.mxu1 %vm2344_vm4, %v2328_v57 }
 0xdda   :  { %4792 = vmatprep.subr.bf16.mxu1 %v5095_v6 }
 0xddf   :  { %4573 = vmatmul.mubr.msk.bf16.gmra.mrb[76].mxu1 %vm491_vm8, %v5276_v62 }
 0xde0   :  { %4576 = vmatprep.mubr.msk.bf16.mxu1 %vm5089_vm1, %v5088_v13 }
 0xde7   :  { %4577 = vmatmul.mubr.msk.bf16.gmra.mrb[80].mxu1 %vm491_vm8, %v5284_v2 }
 0xde8   :  { %4599 = vmatprep.mubr.msk.f32.mxu1 %vm5089_vm1, %v5088_v13 }
 0xe37   :  { %v5652_v62 = vpop.f32.mrb[64].mxu0 }
 0xe38   :  { %v4556_v24 = vpop.f32.mrb[65].mxu0 }
 0xe39   :  { %v5655_v38 = vpop.f32.mrb[66].mxu0 }
 0xe3a   :  { %v4557_v14 = vpop.f32.mrb[67].mxu0 }
 0xe3f   :  { %v5657_v41 = vpop.f32.mrb[68].mxu0 }
 0xe40   :  { %v4560_v2 = vpop.f32.mrb[69].mxu0 }
 0xe41   :  { %v5659_v23 = vpop.f32.mrb[70].mxu0 }
 0xe42   :  { %v4561_v42 = vpop.f32.mrb[71].mxu0 }
 0xe47   :  { %v5661_v43 = vpop.f32.mrb[72].mxu0 }
 0xe48   :  { %v4564_v15 = vpop.f32.mrb[73].mxu0 }
 0xe49   :  { %v2091_v16 = vpop.f32.mrb[74].mxu0 }
 0xe4a   :  { %v4565_v17 = vpop.f32.mrb[75].mxu0 }
 0xeaa   :  { %v2132_v44 = vpop.f32.mrb[72].mxu1 }
 0xeab   :  { %v2154_v46 = vadd.f32 %v2132_v44, %v5652_v62  ;;  %v4570_v18 = vpop.f32.mrb[73].mxu1 }
 0xeac   :  { %v2135_v19 = vpop.f32.mrb[74].mxu1 }
 0xead   :  { %v2159_v49 = vadd.f32 %v2154_v46, %v2013_v7  ;;  %v2155_v48 = vadd.f32 %v2135_v19, %v5655_v38  ;;  %v4571_v20 = vpop.f32.mrb[75].mxu1 }
 0xeaf   :  { %vm2164_vm3 = vcmp.gt.f32.partialorder %v2159_v49, 0.0  ;;  %v2169_v50 = vmul.f32 0.2, %v2159_v49  ;;  %v2160_v56 = vadd.f32 %v2155_v48, %v2018_v39 }
 0xeb1   :  { %v2174_v52 = vsel %vm2164_vm3, %v2159_v49, %v2169_v50  ;;  %vm2165_vm11 = vcmp.gt.f32.partialorder %v2160_v56, 0.0  ;;  %v2170_v61 = vmul.f32 0.2, %v2160_v56 }
 0xeb2   :  { %v2186_v58 = vmul.f32 %v4122_v55, %v2174_v52  ;;  %v2140_v63 = vpop.f32.mrb[76].mxu1 }
 0xeb3   :  { %v2175_v1 = vsel %vm2165_vm11, %v2160_v56, %v2170_v61  ;;  %v2156_v54 = vadd.f32 %v2140_v63, %v5657_v41  ;;  %v4574_v4 = vpop.f32.mrb[77].mxu1 }
 0xeb4   :  { %v2143_v60 = vpop.f32.mrb[78].mxu1  ;;  %4583 = vmatmul.mubr.msk.f32.vlgmr.msra.gmra.mrb[62].mxu0 %vm297_vm0, %v2186_v58  ;;  %v2187_v25 = vmul.f32 %v4122_v55, %v2175_v1 }
 0xeb5   :  { %v2161_v8 = vadd.f32 %v2156_v54, %v2023_v45  ;;  %v2157_v12 = vadd.f32 %v2143_v60, %v5659_v23  ;;  %v4575_v22 = vpop.f32.mrb[79].mxu1  ;;  %4585 = vmatprep.mubr.msk.f32.mxu0 %vm5089_vm1, %v5088_v13 }
 0xeb7   :  { %vm2166_vm12 = vcmp.gt.f32.partialorder %v2161_v8, 0.0  ;;  %v2171_v27 = vmul.f32 0.2, %v2161_v8  ;;  %v2162_v28 = vadd.f32 %v2157_v12, %v2028_v47 }
 0xeb8   :  { %4586 = vmatmul.mubr.msk.f32.gmra.mrb[76].mxu0 %vm297_vm0, %v2187_v25 }
 0xeb9   :  { %v2176_v29 = vsel %vm2166_vm12, %v2161_v8, %v2171_v27  ;;  %vm2167_vm14 = vcmp.gt.f32.partialorder %v2162_v28, 0.0  ;;  %v2172_v30 = vmul.f32 0.2, %v2162_v28  ;;  %4588 = vmatprep.mubr.msk.f32.mxu0 %vm5089_vm1, %v5088_v13  ;;  %vm3008_vm12 = vcmask 23552  }
 0xeba   :  { %v2148_v31 = vpop.f32.mrb[80].mxu1  ;;  %v2188_v3 = vmul.f32 %v4122_v55, %v2176_v29 }
 0xebb   :  { %v2177_v32 = vsel %vm2167_vm14, %v2162_v28, %v2172_v30  ;;  %v2158_v5 = vadd.f32 %v2148_v31, %v5661_v43  ;;  %v4578_v33 = vpop.f32.mrb[81].mxu1  ;;  %vm2906_vm14 = vcmask 195584  }
 0xebc   :  { %v2151_v34 = vpop.f32.mrb[82].mxu1  ;;  %4589 = vmatmul.mubr.msk.f32.gmra.mrb[78].mxu0 %vm297_vm0, %v2188_v3  ;;  %v2189_v10 = vmul.f32 %v4122_v55, %v2177_v32 }
 0xebd   :  { %v2163_v7 = vadd.f32 %v2158_v5, %v5643_v36  ;;  %v4579_v35 = vpop.f32.mrb[83].mxu1  ;;  %4591 = vmatprep.mubr.msk.f32.mxu0 %vm5089_vm1, %v5088_v13 }
 0xebf   :  { %vm2168_vm15 = vcmp.gt.f32.partialorder %v2163_v7, 0.0  ;;  %v2173_v39 = vmul.f32 0.2, %v2163_v7 }
 0xec0   :  { %4592 = vmatmul.mubr.msk.f32.gmra.mrb[80].mxu0 %vm297_vm0, %v2189_v10 }
 0xec1   :  { %v2178_v9 = vsel %vm2168_vm15, %v2163_v7, %v2173_v39  ;;  %4594 = vmatprep.mubr.msk.f32.mxu0 %vm5089_vm1, %v5088_v13  ;;  %vm2629_vm15 = vcmask 124928  }
 0xec2   :  { %v2190_v45 = vmul.f32 %v4122_v55, %v2178_v9 }
 0xec4   :  { %4595 = vmatmul.mubr.msk.f32.gmra.mrb[82].mxu0 %vm297_vm0, %v2190_v45 }
 0xec5   :  { %4620 = vmatprep.mubr.msk.bf16.mxu0 %vm5089_vm1, %v5088_v13 }
 0xf87   :  { %v2273_v47 = vpop.f32.mrb[62].mxu0 }
 0xf88   :  { %v4584_v11 = vpop.f32.mrb[63].mxu0  ;;  %v2298_v44 = vsel %vm2297_vm10, %v2273_v47, -inf }
 0xf8b   :  { %v2278_v36 = vpop.f32.mrb[76].mxu0 }
 0xf8c   :  { %v4587_v37 = vpop.f32.mrb[77].mxu0  ;;  %v2299_v49 = vsel %vm2297_vm10, %v2278_v36, -inf }
 0xf8f   :  { %v2283_v26 = vpop.f32.mrb[78].mxu0 }
 0xf90   :  { %v4590_v24 = vpop.f32.mrb[79].mxu0  ;;  %v2300_v2 = vsel %vm2297_vm10, %v2283_v26, -inf }
 0xf93   :  { %v2288_v14 = vpop.f32.mrb[80].mxu0 }
 0xf94   :  { %v2301_v42 = vsel %vm2297_vm10, %v2288_v14, -inf  ;;  %v4593_v15 = vpop.f32.mrb[81].mxu0 }
 0xf95   :  { %v2305_v16 = vmax.f32 %v2300_v2, %v2301_v42 }
 0xf97   :  { %v2293_v17 = vpop.f32.mrb[82].mxu0 }
 0xf98   :  { %v2302_v46 = vsel %vm2297_vm10, %v2293_v17, -inf  ;;  %v4596_v18 = vpop.f32.mrb[83].mxu0 }
 0xf99   :  { %v2303_v19 = vmax.f32 %v2298_v44, %v2302_v46 }
 0xf9b   :  { %v2304_v48 = vmax.f32 %v2303_v19, %v2299_v49 }
 0xf9d   :  { %v2306_v20 = vmax.f32 %v2304_v48, %v2305_v16  ;;  %v2896_v48 = vld [vmem:[%s4029_s20] sm:$0xff] }
 0xf9f   :  { %v2307_v50 = vrot.slane %v2306_v20, 4 }
 0xfa1   :  { %v2308_v55 = vmax.f32 %v2306_v20, %v2307_v50  ;;  %v2897_v20 = vld [vmem:[%s4029_s20 + $0x8] sm:$0xff] }
 0xfa2   :  { %v5733_v50 = vpack.c.bf16 %v2897_v20, %v2896_v48 }
 0xfa3   :  { %v2309_v56 = vrot.slane %v2308_v55, 2 }
 0xfa5   :  { %v2310_v52 = vmax.f32 %v2308_v55, %v2309_v56  ;;  %v5737_v55 = vld [vmem:[%s4029_s20 + $0x10] sm:$0xff] }
 0xfa7   :  { %v2311_v61 = vrot.slane %v2310_v52, 1 }
 0xfa9   :  { %v2312_v58 = vmax.f32 %v2310_v52, %v2311_v61 }
 0xfab   :  { %v2313_v63 = vsub.f32 %v2273_v47, %v2312_v58  ;;  %v2314_v1 = vsub.f32 %v2278_v36, %v2312_v58  ;;  %v2315_v54 = vsub.f32 %v2283_v26, %v2312_v58  ;;  %v2316_v4 = vsub.f32 %v2288_v14, %v2312_v58 }
 0xfac   :  { %v2317_v60 = vsub.f32 %v2293_v17, %v2312_v58 }
 0xfad   :  { %v2318_v8 = vmul.f32 1.442695, %v2313_v63  ;;  %v2320_v12 = vmul.f32 1.442695, %v2314_v1  ;;  %v2322_v22 = vmul.f32 1.442695, %v2315_v54 }
 0xfae   :  { %v2324_v25 = vmul.f32 1.442695, %v2316_v4  ;;  %v2326_v28 = vmul.f32 1.442695, %v2317_v60  ;;  %v2633_v4 = vld [vmem:[%s4027_s27] sm:$0xff] }
 0xfaf   :  { %5007 = vpow2.f32 %v2318_v8  ;;  %v5752_v60 = vld [vmem:[%s4030_s2] ss:$0 sm:$0xff]  ;;  %s5139_s2 = smov 46  }
 0xfb0   :  { %5009 = vpow2.f32 %v2320_v12  ;;  %s4039_s5 = sld [smem:[%s6058_s0 + %s5139_s2]]  }
 0xfb1   :  { %5011 = vpow2.f32 %v2322_v22 }
 0xfb2   :  { %5013 = vpow2.f32 %v2324_v25  ;;  %v98_v25 = vstv %s4028_s6  ;;  %s5995_s6 = sld [smem:[%s6058_s0 + %s5132_s25]]  }
 0xfb3   :  { %5015 = vpow2.f32 %v2326_v28  ;;  %99 = vst [vmem:[#allocation2] sm:$0x1] %v98_v25  ;;  %v4135_v28 = vld [vmem:[%s4024_s10] ss:$0 sm:$0xff]  ;;  %s5134_s10 = smov 39  }
 0xfb4   :  { %s4032_s14 = sld [smem:[%s6058_s0 + %s5134_s10]]  }
 0xfb9   :  { %v5008_v27 = vpop.eup %5007 }
 0xfba   :  { %4600 = vmatmul.mubr.msk.f32.vlgmr.msra.gmra.mrb[70].mxu1 %vm2297_vm10, %v5008_v27  ;;  %v5010_v29 = vpop.eup %5009 }
 0xfbb   :  { %4602 = vmatprep.mubr.msk.f32.mxu1 %vm5089_vm1, %v5088_v13  ;;  %v5012_v30 = vpop.eup %5011  ;;  %4794 = vmatpush3.bf16.msra.mxu1 %v5733_v50 }
 0xfbc   :  { %v5014_v31 = vpop.eup %5013  ;;  %4639 = vmatprep.subr.mxu1 %v5088_v13 }
 0xfbd   :  { %v5016_v3 = vpop.eup %5015 }
 0xfbe   :  { %4603 = vmatmul.mubr.msk.f32.gmra.mrb[84].mxu1 %vm2297_vm10, %v5010_v29 }
 0xfbf   :  { %4605 = vmatprep.mubr.msk.f32.mxu1 %vm5089_vm1, %v5088_v13  ;;  %4640 = vmatpush3.msra.mxu1 %v5737_v55 }
 0xfc0   :  { %4650 = vmatprep.subr.bf16.mxu1 %v5088_v13 }
 0xfc2   :  { %4606 = vmatmul.mubr.msk.f32.gmra.mrb[86].mxu1 %vm2297_vm10, %v5012_v30 }
 0xfc3   :  { %4608 = vmatprep.mubr.msk.f32.mxu1 %vm5089_vm1, %v5088_v13 }
 0xfc6   :  { %4609 = vmatmul.mubr.msk.f32.gmra.mrb[88].mxu1 %vm2297_vm10, %v5014_v31 }
 0xfc7   :  { %4611 = vmatprep.mubr.msk.f32.mxu1 %vm5089_vm1, %v5088_v13 }
 0xfca   :  { %4612 = vmatmul.mubr.msk.f32.gmra.mrb[90].mxu1 %vm2297_vm10, %v5016_v3 }
 0xfcb   :  { %4641 = vmatprep.mubr.msk.f32.mxu1 %vm5089_vm1, %v5088_v13 }
 0xfce   :  { %4642 = vmatmul.mubr.f32.vlgmr.msra.gmra.mrb[92].mxu1 %v5088_v13 }
 0xfcf   :  { %4652 = vmatprep.mubr.msk.bf16.mxu1 %vm5089_vm1, %v5088_v13 }
0x108d   :  { %v2414_v32 = vpop.f32.mrb[70].mxu1 }
0x108e   :  { %v2438_v5 = vmul.f32 %v2414_v32, %v5652_v62  ;;  %v4601_v33 = vpop.f32.mrb[71].mxu1 }
0x1091   :  { %v2419_v34 = vpop.f32.mrb[84].mxu1 }
0x1092   :  { %v4943_v7 = vpack.i.bf16 %v2419_v34, %v2414_v32  ;;  %v2439_v35 = vmul.f32 %v2419_v34, %v5655_v38  ;;  %v4604_v10 = vpop.f32.mrb[85].mxu1 }
0x1094   :  { %4944 = vrot.lane.b32.xlu0 %v4943_v7, %s5092_s26 }
0x1095   :  { %v2424_v39 = vpop.f32.mrb[86].mxu1 }
0x1096   :  { %v2440_v9 = vmul.f32 %v2424_v39, %v5657_v41  ;;  %v4607_v45 = vpop.f32.mrb[87].mxu1 }
0x1099   :  { %v2429_v57 = vpop.f32.mrb[88].mxu1 }
0x109a   :  { %v4948_v47 = vpack.i.bf16 %v2429_v57, %v2424_v39  ;;  %v2441_v11 = vmul.f32 %v2429_v57, %v5659_v23  ;;  %v4610_v36 = vpop.f32.mrb[89].mxu1 }
0x109c   :  { %4949 = vrot.lane.b32.xlu1 %v4948_v47, %s5092_s26 }
0x109d   :  { %v2434_v62 = vpop.f32.mrb[90].mxu1 }
0x109e   :  { %v2442_v37 = vmul.f32 %v2434_v62, %v5661_v43  ;;  %2456 = vrot.lane.b32.xlu0 %v2434_v62, %s5092_s26  ;;  %v4613_v38 = vpop.f32.mrb[91].mxu1 }
0x10a1   :  { %v2976_v8 = vpop.f32.mrb[92].mxu1 }
0x10a2   :  { %v5755_v12 = vadd.f32 %v5752_v60, %v2976_v8  ;;  %v4643_v22 = vpop.f32.mrb[93].mxu1 }
0x1106   :  { %v4945_v26 = vpop.permute.xlu0 %4944 }
0x1107   :  { %v4947_v24 = vunpack.i.h.bf16 %v4945_v26  ;;  %v4946_v14 = vunpack.i.l.bf16 %v4945_v26 }
0x1109   :  { %v2463_v2 = vsel %vm297_vm0, %v2438_v5, %v4946_v14  ;;  %v2464_v41 = vsel %vm297_vm0, %v2439_v35, %v4947_v24 }
0x110a   :  { %v2468_v42 = vpack.c.bf16 %v2464_v41, %v2463_v2 }
0x110c   :  { %4615 = vmatpush3.bf16.msra.mxu0 %v2468_v42 }
0x110d   :  { %4616 = vmatprep.subr.bf16.mxu0 %v5088_v13 }
0x110e   :  { %v4950_v23 = vpop.permute.xlu1 %4949 }
0x110f   :  { %v4952_v15 = vunpack.i.h.bf16 %v4950_v23  ;;  %v4951_v16 = vunpack.i.l.bf16 %v4950_v23 }
0x1110   :  { %v2457_v17 = vpop.permute.xlu0 %2456 }
0x1111   :  { %v2465_v43 = vsel %vm297_vm0, %v2440_v9, %v4951_v16  ;;  %v2466_v44 = vsel %vm297_vm0, %v2441_v11, %v4952_v15  ;;  %v2467_v46 = vsel %vm297_vm0, %v2442_v37, %v2457_v17 }
0x1112   :  { %v2469_v18 = vpack.c.bf16 %v2466_v44, %v2465_v43  ;;  %v2470_v19 = vpack.c.bf16 %v2467_v46, %v2467_v46 }
0x1114   :  { %4617 = vmatpush3.bf16.msra.mxu0 %v2469_v18  ;;  %v2472_v49 = vsel %vm396_vm2, %v2470_v19, 0 }
0x1115   :  { %4618 = vmatprep.subr.bf16.mxu0 %v5088_v13 }
0x1118   :  { %4619 = vmatpush3.bf16.msra.mxu0 %v2472_v49 }
0x1119   :  { %4624 = vmatprep.subr.mxu0 %v2633_v4 }
0x111b   :  { %4621 = vmatmul.mubr.msk.bf16.vlgmr.msra.gmra.mrb[84].mxu0 %vm944_vm13, %v5382_v59 }
0x111c   :  { %4625 = vmatpush3.msra.mxu0 %v2633_v4 }
0x111d   :  { %4629 = vmatprep.subr.bf16.mxu0 %v5088_v13 }
0x11ee   :  { %v2508_v59 = vpop.f32.mrb[84].mxu0 }
0x11ef   :  { %v2515_v56 = vmax.f32 %v2508_v59, 1e-20  ;;  %v4622_v52 = vpop.f32.mrb[85].mxu0 }
0x11f0   :  { %v2511_v61 = vpop.f32.mrb[86].mxu0 }
0x11f1   :  { %5017 = vrcp.f32 %v2515_v56  ;;  %v2516_v58 = vmax.f32 %v2511_v61, 1e-20  ;;  %v4623_v63 = vpop.f32.mrb[87].mxu0 }
0x11f3   :  { %5019 = vrcp.f32 %v2516_v58 }
0x11f4   :  { %5021 = vtanh.f32 %v5755_v12 }
0x11fb   :  { %v5018_v1 = vpop.eup %5017 }
0x11fc   :  { %2521 = vrot.lane.b32.xlu1 %v5018_v1, %s5115_s4 }
0x11fd   :  { %v5020_v54 = vpop.eup %5019 }
0x11fe   :  { %2523 = vrot.lane.b32.xlu0 %v5020_v54, %s5115_s4  ;;  %v5022_v27 = vpop.eup %5021  ;;  %v4146_v54 = vmul.f32 -1.442695, %v5755_v12 }
0x1202   :  { %2989 = vrot.lane.b32.xlu0 %v5022_v27, %s5093_s30 }
0x126e   :  { %v2522_v29 = vpop.permute.xlu1 %2521 }
0x126f   :  { %v2527_v30 = vmul.f32 %v2522_v29, %v2508_v59 }
0x1270   :  { %v2524_v31 = vpop.permute.xlu0 %2523 }
0x1271   :  { %v2536_v3 = vadd.f32 %v4135_v28, %v2527_v30  ;;  %v2528_v32 = vmul.f32 %v2524_v31, %v2511_v61  ;;  %v4138_v30 = vld [vmem:[%s4025_s15] ss:$0 sm:$0xff]  ;;  %s5135_s15 = smov 41  }
0x1272   :  { %s4034_s18 = sld [smem:[%s6058_s0 + %s5135_s15]]  }
0x1273   :  { %v2538_v5 = vmin.f32 %v2536_v3, 0.0  ;;  %v2537_v33 = vadd.f32 %v4135_v28, %v2528_v32  ;;  %vm2556_vm13 = vcmp.gt.f32.partialorder %v2536_v3, 0.0  ;;  %v4139_v32 = vld [vmem:[%s4026_s19] ss:$0 sm:$0xff]  ;;  %s5136_s19 = smov 44  }
0x1274   :  { %s4037_s23 = sld [smem:[%s6058_s0 + %s5136_s19]]  }
0x1275   :  { %v2548_v34 = vmul.f32 1.442695, %v2538_v5  ;;  %v2539_v7 = vmin.f32 %v2537_v33, 0.0  ;;  %v2542_v10 = vmul.f32 0.5, %v2538_v5  ;;  %vm2540_vm2 = vcmp.gt.f32.partialorder %v2538_v5, -0.0001 }
0x1276   :  { %vm2557_vm6 = vcmp.gt.f32.partialorder %v2537_v33, 0.0 }
0x1277   :  { %5023 = vpow2.f32 %v2548_v34  ;;  %v2550_v35 = vmul.f32 1.442695, %v2539_v7  ;;  %v2543_v39 = vmul.f32 0.5, %v2539_v7  ;;  %v2544_v9 = vmul.f32 %v2542_v10, %v2538_v5  ;;  %v2990_v10 = vpop.permute.xlu0 %2989 }
0x1278   :  { %vm2541_vm5 = vcmp.gt.f32.partialorder %v2539_v7, -0.0001 }
0x1279   :  { %5025 = vpow2.f32 %v2550_v35  ;;  %v2545_v57 = vmul.f32 %v2543_v39, %v2539_v7  ;;  %v2546_v47 = vadd.f32 %v2544_v9, %v2538_v5  ;;  %v4141_v9 = vld [vmem:[#allocation2] ss:$0 sm:$0xff] }
0x127a   :  { %5027 = vpow2.f32 %v4146_v54 }
0x127b   :  { %v2547_v38 = vadd.f32 %v2545_v57, %v2539_v7 }
0x1281   :  { %v5024_v45 = vpop.eup %5023 }
0x1282   :  { %v4136_v11 = vadd.f32 -1.0, %v5024_v45 }
0x1283   :  { %v5026_v36 = vpop.eup %5025 }
0x1284   :  { %v2554_v62 = vsel %vm2540_vm2, %v2546_v47, %v4136_v11  ;;  %v4137_v26 = vadd.f32 -1.0, %v5026_v36  ;;  %v5028_v29 = vpop.eup %5027 }
0x1285   :  { %v2558_v37 = vsel %vm2556_vm13, %v2536_v3, %v2554_v62 }
0x1286   :  { %v2560_v24 = vmul.f32 %v5405_v51, %v2558_v37  ;;  %v2555_v14 = vsel %vm2541_vm5, %v2547_v38, %v4137_v26 }
0x1287   :  { %v2559_v2 = vsel %vm2557_vm6, %v2537_v33, %v2555_v14 }
0x1288   :  { %v2561_v41 = vmul.f32 %v5407_v53, %v2559_v2  ;;  %v2562_v42 = vsel %vm297_vm0, %v2560_v24, 0.0 }
0x128a   :  { %v2563_v23 = vsel %vm297_vm0, %v2561_v41, 0.0 }
0x128b   :  { %v2564_v15 = vadd.f32 %v2563_v23, %v2562_v42 }
0x128d   :  { %v2565_v16 = vrot.slane %v2564_v15, 4 }
0x128f   :  { %v2566_v17 = vadd.f32 %v2565_v16, %v2564_v15 }
0x1291   :  { %v2567_v43 = vrot.slane %v2566_v17, 2 }
0x1293   :  { %v2568_v44 = vadd.f32 %v2567_v43, %v2566_v17 }
0x1295   :  { %v2569_v46 = vrot.slane %v2568_v44, 1 }
0x1297   :  { %v2570_v18 = vadd.f32 %v2569_v46, %v2568_v44 }
0x1299   :  { %v2571_v19 = vmul.f32 0.083333336, %v2570_v18 }
0x129b   :  { %v2572_v49 = vsub.f32 %v2558_v37, %v2571_v19  ;;  %v2573_v48 = vsub.f32 %v2559_v2, %v2571_v19 }
0x129d   :  { %v2574_v20 = vmul.f32 %v5405_v51, %v2572_v49  ;;  %v2575_v59 = vmul.f32 %v5407_v53, %v2573_v48  ;;  %v2983_v53 = vadd.f32 1.0, %v5028_v29 }
0x129f   :  { %v2576_v56 = vmul.f32 %v2574_v20, %v2574_v20  ;;  %v2577_v52 = vmul.f32 %v2575_v59, %v2575_v59  ;;  %v5800_v20 = vld [vmem:[%s5389_s21] sm:$0xff] }
0x12a0   :  { %vm2848_vm2 = vcmp.eq.s32.totalorder %v5800_v20, 1 }
0x12a1   :  { %v2578_v61 = vsel %vm297_vm0, %v2576_v56, 0.0  ;;  %v2579_v58 = vsel %vm297_vm0, %v2577_v52, 0.0 }
0x12a2   :  { %v2580_v63 = vadd.f32 %v2579_v58, %v2578_v61 }
0x12a4   :  { %v2581_v1 = vrot.slane %v2580_v63, 4 }
0x12a6   :  { %v2582_v4 = vadd.f32 %v2581_v1, %v2580_v63 }
0x12a8   :  { %v2583_v8 = vrot.slane %v2582_v4, 2 }
0x12aa   :  { %v2584_v22 = vadd.f32 %v2583_v8, %v2582_v4  ;;  %v5812_v8 = vld [vmem:[%s5389_s21 + $0x8] sm:$0xff] }
0x12ab   :  { %vm2849_vm13 = vcmp.eq.s32.totalorder %v5812_v8, 1  ;;  %vm2872_vm5 = vcmp.eq.s32.totalorder %v5812_v8, 2  ;;  %vm2826_vm6 = vcmp.eq.s32.totalorder %v5812_v8, 0 }
0x12ac   :  { %v2585_v25 = vrot.slane %v2584_v22, 1 }
0x12ae   :  { %v2586_v27 = vadd.f32 %v2585_v25, %v2584_v22 }
0x12b0   :  { %v2587_v28 = vmul.f32 0.083333336, %v2586_v27  ;;  %v4140_v27 = vld [vmem:[%s3999_s28] ss:$0 sm:$0xff] }
0x12b1   :  { %vm2615_vm7 = vcmp.eq.s32.totalorder %v4140_v27, %v5370_v40 }
0x12b2   :  { %v2588_v51 = vadd.f32 1e-05, %v2587_v28 }
0x12b4   :  { %5029 = vrsqrt.f32 %v2588_v51 }
0x12b5   :  { %5031 = vrcp.f32 %v2983_v53 }
0x12be   :  { %v5030_v12 = vpop.eup %5029 }
0x12bf   :  { %v2590_v31 = vmul.f32 %v5030_v12, %v2572_v49  ;;  %v2591_v3 = vmul.f32 %v5030_v12, %v2573_v48  ;;  %v5032_v35 = vpop.eup %5031 }
0x12c0   :  { %v2992_v39 = vmul.f32 %v5032_v35, %v2990_v10  ;;  %v2987_v43 = vmul.f32 0.0, %v5032_v35 }
0x12c1   :  { %v2599_v5 = vmul.f32 %v4138_v30, %v2590_v31  ;;  %v2600_v33 = vmul.f32 %v4138_v30, %v2591_v3  ;;  %v5128_v3 = vmov 65535  }
0x12c2   :  { %2994 = vrot.lane.b32.xlu0 %v2992_v39, %s5092_s26 }
0x12c3   :  { %v5782_v34 = vadd.f32 %v4139_v32, %v2599_v5  ;;  %v5784_v7 = vadd.f32 %v4139_v32, %v2600_v33  ;;  %v3012_v32 = vsel %vm2344_vm4, 4294967295, %v5128_v3  ;;  %v5826_v5 = vsel %vm2615_vm7, 1.0, %v5088_v13 }
0x12c4   :  { %v5831_v10 = vsel %vm817_vm9, %v3012_v32, 0  ;;  %vm2871_vm7 = vcmp.eq.s32.totalorder %v5800_v20, 2 }
0x12c5   :  { %4626 = vmatprep.mubr.msk.f32.mxu0 %vm297_vm0, %v5782_v34 }
0x12c6   :  { %4627 = vmatmul.mubr.msk.f32.vlgmr.msra.gmra.mrb[88].mxu0 %vm297_vm0, %v5784_v7 }
0x12c7   :  { %4631 = vmatprep.mubr.msk.bf16.mxu0 %vm5089_vm1, %v5088_v13 }
0x1334   :  { %v2995_v46 = vpop.permute.xlu0 %2994 }
0x1335   :  { %v5795_v18 = vadd.f32 %v2995_v46, %v2987_v43 }
0x1399   :  { %v4628_v45 = vpop.f32.mrb[88].mxu0 }
0x139a   :  { %v2719_v57 = vadd.f32 %v4628_v45, %v4141_v9  ;;  %v2713_v47 = vpop.f32.mrb[89].mxu0 }
0x139b   :  { %v2714_v11 = vadd.f32 %v4141_v9, %v2713_v47  ;;  %v5835_v9 = vpack.c.bf16 %v5826_v5, %v5826_v5 }
0x139c   :  { %v2723_v36 = vsel %vm2297_vm10, %v2719_v57, -inf }
0x139d   :  { %v2722_v62 = vsel %vm2297_vm10, %v2714_v11, -inf  ;;  %vm2825_vm10 = vcmp.eq.s32.totalorder %v5800_v20, 0 }
0x139e   :  { %v2724_v37 = vmax.f32 %v2722_v62, %v2723_v36 }
0x13a0   :  { %2725 = vmax.xlane.f32.xlu1 %v2724_v37 }
0x142d   :  { %v2726_v38 = vpop.xlane.xlu1 %2725 }
0x142e   :  { %v2727_v26 = vrot.slane %v2726_v38, 4 }
0x1430   :  { %v2728_v24 = vmax.f32 %v2726_v38, %v2727_v26 }
0x1432   :  { %v2729_v14 = vrot.slane %v2728_v24, 2 }
0x1434   :  { %v2730_v2 = vmax.f32 %v2728_v24, %v2729_v14 }
0x1436   :  { %v2731_v41 = vrot.slane %v2730_v2, 1 }
0x1438   :  { %v2732_v42 = vmax.f32 %v2730_v2, %v2731_v41 }
0x143a   :  { %4852 = vpush %v2732_v42 }
0x146b   :  { %s4853_s20 = spop %4852 }
0x146c   :  { %v2734_v23 = vstv %s4853_s20 }
0x146d   :  { %v2735_v15 = vsub.f32 %v2714_v11, %v2734_v23  ;;  %v2736_v16 = vsub.f32 %v2719_v57, %v2734_v23 }
0x146f   :  { %v2737_v17 = vmul.f32 1.442695, %v2735_v15  ;;  %v2739_v44 = vmul.f32 1.442695, %v2736_v16 }
0x1471   :  { %5033 = vpow2.f32 %v2737_v17 }
0x1472   :  { %5035 = vpow2.f32 %v2739_v44 }
0x1473   :  { %5037 = vtanh.f32 %v5795_v18 }
0x147b   :  { %v5034_v19 = vpop.eup %5033 }
0x147c   :  { %2743 = vperm.xlu0 %4916, %v5034_v19   ;;  %v5036_v49 = vpop.eup %5035 }
0x147d   :  { %v5038_v48 = vpop.eup %5037  ;;  %v4953_v59 = vpack.i.bf16 %v5036_v49, %v5034_v19 }
0x1480   :  { %2748 = vperm.xlu0 %4916, %v5036_v49  }
0x1484   :  { %3000 = vrot.lane.b32.xlu0 %v5038_v48, %s5098_s13 }
0x1488   :  { %2619 = vperm.xlu0 %4916, %v5800_v20  }
0x148c   :  { %4954 = vrot.lane.b32.xlu0 %v4953_v59, %s5098_s13 }
0x14fb   :  { %v2744_v56 = vpop.permute.xlu0 %2743 }
0x14fc   :  { %v2751_v61 = vmul.f32 %v2744_v56, %v5782_v34 }
0x14ff   :  { %v2749_v52 = vpop.permute.xlu0 %2748 }
0x1500   :  { %v2752_v58 = vmul.f32 %v2749_v52, %v5784_v7 }
0x1502   :  { %v4958_v63 = vpack.i.bf16 %v2752_v58, %v2751_v61 }
0x1503   :  { %v3001_v1 = vpop.permute.xlu0 %3000 }
0x1504   :  { %v5806_v54 = vmul.f32 %v5032_v35, %v3001_v1  ;;  %4959 = vrot.lane.b32.xlu0 %v4958_v63, %s5092_s26 }
0x1506   :  { %v3004_v4 = vpack.c.bf16 %v5806_v54, %v5806_v54 }
0x1507   :  { %v2620_v22 = vpop.permute.xlu0 %2619 }
0x1508   :  { %2622 = vperm.xlu0 %4916, %v5812_v8   ;;  %3006 = vrot.lane.b32.xlu1 %v3004_v4, %s5126_s22  ;;  %vm2624_vm3 = vcmp.eq.s32.totalorder %v2620_v22, %v5219_v21 }
0x1509   :  { %v2626_v47 = vsel %vm2624_vm3, 1.0, %v5088_v13 }
0x150b   :  { %v4955_v25 = vpop.permute.xlu0 %4954 }
0x150c   :  { %v4957_v53 = vunpack.i.h.bf16 %v4955_v25  ;;  %v4956_v12 = vunpack.i.l.bf16 %v4955_v25 }
0x1576   :  { %v4960_v28 = vpop.permute.xlu0 %4959 }
0x1577   :  { %v4962_v51 = vunpack.i.h.bf16 %v4960_v28  ;;  %v4961_v29 = vunpack.i.l.bf16 %v4960_v28 }
0x1579   :  { %v2768_v30 = vsel %vm297_vm0, %v5784_v7, %v4962_v51  ;;  %v2767_v31 = vsel %vm297_vm0, %v5782_v34, %v4961_v29  ;;  %v5129_v29 = vmov 8  }
0x157a   :  { %v2769_v33 = vsel %vm491_vm8, %v2767_v31, %v4956_v12  ;;  %v2770_v40 = vsel %vm491_vm8, %v2768_v30, %v4957_v53  ;;  %v3007_v39 = vpop.permute.xlu1 %3006  ;;  %4963 = vset.pattern.permute.xlu0 %v5129_v29 }
0x157b   :  { %v2771_v35 = vpack.c.bf16 %v2770_v40, %v2769_v33  ;;  %v3015_v45 = vand.u32 %v5831_v10, %v3007_v39 }
0x157d   :  { %4630 = vmatpush3.bf16.msra.mxu0 %v2771_v35 }
0x157e   :  { %4644 = vmatprep.subr.bf16.mxu0 %v5088_v13 }
0x1580   :  { %4632 = vmatmul.mubr.msk.bf16.vlgmr.msra.gmra.mrb[92].mxu0 %vm491_vm8, %v5835_v9 }
0x1581   :  { %4645 = vmatpush3.bf16.msra.mxu0 %v3015_v45  ;;  %4646 = vmatprep.mubr.msk.bf16.mxu0 %vm5089_vm1, %v5088_v13 }
0x1582   :  { %4795 = vmatprep.subr.bf16.mxu0 %v5095_v6 }
0x1587   :  { %v2623_v57 = vpop.permute.xlu0 %2622 }
0x1588   :  { %vm2625_vm11 = vcmp.eq.s32.totalorder %v2623_v57, %v5219_v21 }
0x1589   :  { %v2627_v11 = vsel %vm2625_vm11, 1.0, %v5088_v13 }
0x158a   :  { %v5848_v36 = vpack.c.bf16 %v2627_v11, %v2626_v47 }
0x158c   :  { %4647 = vmatmul.mubr.msk.bf16.vlgmr.msra.gmra.mrb[96].mxu0 %vm3008_vm12, %v5848_v36 }
0x158d   :  { %4797 = vmatpush3.bf16.msra.mxu0 %v5733_v50  ;;  %4662 = vmatprep.mubr.msk.f32.mxu0 %vm5089_vm1, %v5088_v13 }
0x158e   :  { %4660 = vmatprep.subr.mxu0 %v5088_v13 }
0x1591   :  { %4661 = vmatpush3.msra.mxu0 %v5737_v55 }
0x1592   :  { %4671 = vmatprep.subr.bf16.mxu0 %v5088_v13 }
0x1653   :  { %v5858_v21 = vpop.f32.mrb[92].mxu0 }
0x1654   :  { %v4633_v62 = vpop.f32.mrb[93].mxu0 }
0x1655   :  { %v2812_v37 = vpop.f32.mrb[94].mxu0 }
0x1656   :  { %v4634_v38 = vpop.f32.mrb[95].mxu0 }
0x165f   :  { %v3051_v26 = vpop.f32.mrb[96].mxu0 }
0x1660   :  { %v3058_v24 = vmul.f32 %v3051_v26, %v5782_v34  ;;  %v4648_v14 = vpop.f32.mrb[97].mxu0 }
0x1661   :  { %v3054_v2 = vpop.f32.mrb[98].mxu0 }
0x1662   :  { %v3059_v41 = vmul.f32 %v3054_v2, %v5784_v7  ;;  %v4649_v42 = vpop.f32.mrb[99].mxu0  ;;  %v3060_v23 = vsel %vm297_vm0, %v3058_v24, 0.0 }
0x1663   :  { %3061 = vadd.xlane.f32.xlu0 %v3060_v23 }
0x1664   :  { %v3063_v15 = vsel %vm297_vm0, %v3059_v41, 0.0 }
0x1665   :  { %3064 = vadd.xlane.f32.xlu1 %v3063_v15 }
0x1676   :  { %3135 = vrot.lane.b32.xlu1 %v5806_v54, %s5126_s22 }
0x16f0   :  { %v3062_v16 = vpop.xlane.xlu0 %3061 }
0x16f2   :  { %v3065_v17 = vpop.xlane.xlu1 %3064 }
0x16f3   :  { %v3066_v43 = vmax.f32 %v3062_v16, %v3065_v17 }
0x16f5   :  { %v3067_v44 = vrot.slane %v3066_v43, 4 }
0x16f6   :  { %v3136_v35 = vpop.permute.xlu1 %3135 }
0x16f7   :  { %v3068_v46 = vmax.f32 %v3066_v43, %v3067_v44 }
0x16f9   :  { %v3069_v19 = vrot.slane %v3068_v46, 2 }
0x16fb   :  { %v3070_v49 = vmax.f32 %v3068_v46, %v3069_v19 }
0x16fd   :  { %v3071_v48 = vrot.slane %v3070_v49, 1 }
0x16ff   :  { %v3072_v59 = vmax.f32 %v3070_v49, %v3071_v48 }
0x1701   :  { %4854 = vpush %v3072_v59 }
0x1732   :  { %s4855_s21 = spop %4854 }
0x1733   :  { %v3074_v56 = vstv %s4855_s21  ;;  %s4038_s21 = sld [smem:[%s6058_s0 + %s5137_s24]]  }
0x1734   :  { %v3075_v52 = vsub.f32 %v3062_v16, %v3074_v56  ;;  %v3076_v61 = vsub.f32 %v3065_v17, %v3074_v56 }
0x1736   :  { %v3077_v58 = vmul.f32 1.442695, %v3075_v52  ;;  %v3079_v63 = vmul.f32 1.442695, %v3076_v61 }
0x1738   :  { %5039 = vpow2.f32 %v3077_v58 }
0x1739   :  { %5041 = vpow2.f32 %v3079_v63 }
0x1742   :  { %v5040_v1 = vpop.eup %5039 }
0x1743   :  { %v5042_v4 = vpop.eup %5041  ;;  %v3081_v22 = vmul.f32 %v5040_v1, %v5782_v34 }
0x1744   :  { %v3082_v25 = vmul.f32 %v5042_v4, %v5784_v7 }
0x1745   :  { %v3083_v27 = vsel %vm297_vm0, %v3081_v22, %v5040_v1 }
0x1746   :  { %v3084_v28 = vsel %vm297_vm0, %v3082_v25, %v5042_v4 }
0x1747   :  { %v3085_v51 = vpack.c.bf16 %v3084_v28, %v3083_v27 }
0x1749   :  { %4651 = vmatpush3.bf16.msra.mxu1 %v3085_v51 }
0x174a   :  { %4665 = vmatprep.subr.bf16.mxu1 %v5088_v13 }
0x174c   :  { %4653 = vmatmul.mubr.msk.bf16.vlgmr.msra.gmra.mrb[96].mxu1 %vm491_vm8, %v5835_v9 }
0x174d   :  { %4667 = vmatprep.mubr.msk.bf16.mxu1 %vm5089_vm1, %v5088_v13 }
0x181f   :  { %v3120_v53 = vpop.f32.mrb[96].mxu1 }
0x1820   :  { %v3126_v12 = vmax.f32 %v3120_v53, 1e-20  ;;  %v4654_v30 = vpop.f32.mrb[97].mxu1 }
0x1821   :  { %v3123_v31 = vpop.f32.mrb[98].mxu1 }
0x1822   :  { %3129 = vperm.xlu0 %4963, %v3126_v12   ;;  %v4655_v3 = vpop.f32.mrb[99].mxu1 }
0x18a1   :  { %v3130_v32 = vpop.permute.xlu0 %3129 }
0x18a2   :  { %5043 = vrcp.f32 %v3130_v32 }
0x18ac   :  { %v5044_v33 = vpop.eup %5043 }
0x18ad   :  { %v3133_v40 = vmul.f32 %v5044_v33, %v3120_v53 }
0x18af   :  { %3139 = vrot.lane.b32.xlu1 %v3133_v40, %s5092_s26 }
0x18b3   :  { %3143 = vrot.lane.b32.xlu1 %v5806_v54, %s5115_s4 }
0x1921   :  { %v3140_v39 = vpop.permute.xlu1 %3139 }
0x1922   :  { %v3142_v45 = vsel %vm297_vm0, %v3136_v35, %v3140_v39 }
0x1925   :  { %v3144_v57 = vpop.permute.xlu1 %3143 }
0x1926   :  { %v3146_v47 = vsel %vm491_vm8, %v3142_v45, %v3144_v57 }
0x1927   :  { %4663 = vmatmul.mubr.msk.f32.vlgmr.msra.gmra.mrb[90].mxu0 %vm2906_vm14, %v3146_v47 }
0x1928   :  { %4673 = vmatprep.mubr.msk.bf16.mxu0 %vm5089_vm1, %v5088_v13 }
0x19fa   :  { %v3216_v11 = vpop.f32.mrb[90].mxu0 }
0x19fb   :  { %v3217_v62 = vadd.f32 %v5752_v60, %v3216_v11  ;;  %v4664_v37 = vpop.f32.mrb[91].mxu0 }
0x19fd   :  { %5045 = vtanh.f32 %v3217_v62  ;;  %v4150_v54 = vmul.f32 -1.442695, %v3217_v62 }
0x19ff   :  { %5047 = vpow2.f32 %v4150_v54 }
0x1a07   :  { %v5046_v38 = vpop.eup %5045 }
0x1a08   :  { %3229 = vrot.lane.b32.xlu1 %v5046_v38, %s5093_s30 }
0x1a09   :  { %v5048_v26 = vpop.eup %5047 }
0x1a0a   :  { %v3223_v24 = vadd.f32 1.0, %v5048_v26 }
0x1a0c   :  { %5049 = vrcp.f32 %v3223_v24 }
0x1a16   :  { %v5050_v14 = vpop.eup %5049 }
0x1a17   :  { %v3227_v42 = vmul.f32 %v5050_v14, %v5795_v18 }
0x1a7a   :  { %v3230_v2 = vpop.permute.xlu1 %3229 }
0x1a7b   :  { %v3232_v41 = vmul.f32 %v5050_v14, %v3230_v2 }
0x1a7d   :  { %3234 = vrot.lane.b32.xlu0 %v3232_v41, %s5092_s26 }
0x1aef   :  { %v3235_v23 = vpop.permute.xlu0 %3234 }
0x1af0   :  { %v5888_v15 = vadd.f32 %v3235_v23, %v3227_v42 }
0x1af2   :  { %5051 = vtanh.f32 %v5888_v15 }
0x1afc   :  { %v5052_v16 = vpop.eup %5051 }
0x1afd   :  { %3240 = vrot.lane.b32.xlu1 %v5052_v16, %s5098_s13 }
0x1b6f   :  { %v3241_v17 = vpop.permute.xlu1 %3240 }
0x1b70   :  { %v3243_v43 = vmul.f32 %v5050_v14, %v3241_v17 }
0x1b72   :  { %v3244_v44 = vpack.c.bf16 %v3243_v43, %v3243_v43 }
0x1b74   :  { %3246 = vrot.lane.b32.xlu0 %v3244_v44, %s5126_s22 }
0x1be6   :  { %v3247_v46 = vpop.permute.xlu0 %3246 }
0x1be7   :  { %v3249_v19 = vand.u32 %v3247_v46, %v5831_v10 }
0x1be9   :  { %4666 = vmatpush3.bf16.msra.mxu1 %v3249_v19 }
0x1bea   :  { %4798 = vmatprep.subr.bf16.mxu1 %v5095_v6 }
0x1bec   :  { %4668 = vmatmul.mubr.msk.bf16.vlgmr.msra.gmra.mrb[100].mxu1 %vm3008_vm12, %v5848_v36 }
0x1bed   :  { %4800 = vmatpush3.bf16.msra.mxu1 %v5733_v50  ;;  %4683 = vmatprep.mubr.msk.f32.mxu1 %vm5089_vm1, %v5088_v13 }
0x1bee   :  { %4681 = vmatprep.subr.mxu1 %v5088_v13 }
0x1bf1   :  { %4682 = vmatpush3.msra.mxu1 %v5737_v55 }
0x1bf2   :  { %4692 = vmatprep.subr.bf16.mxu1 %v5088_v13 }
0x1cbf   :  { %v3285_v18 = vpop.f32.mrb[100].mxu1 }
0x1cc0   :  { %v3292_v49 = vmul.f32 %v3285_v18, %v5782_v34  ;;  %v4669_v48 = vpop.f32.mrb[101].mxu1 }
0x1cc1   :  { %v3288_v59 = vpop.f32.mrb[102].mxu1 }
0x1cc2   :  { %v3293_v56 = vmul.f32 %v3288_v59, %v5784_v7  ;;  %v4670_v52 = vpop.f32.mrb[103].mxu1  ;;  %v3294_v61 = vsel %vm297_vm0, %v3292_v49, 0.0 }
0x1cc3   :  { %3295 = vadd.xlane.f32.xlu1 %v3294_v61 }
0x1cc4   :  { %v3297_v50 = vsel %vm297_vm0, %v3293_v56, 0.0 }
0x1cc5   :  { %3298 = vadd.xlane.f32.xlu0 %v3297_v50 }
0x1cd4   :  { %3369 = vrot.lane.b32.xlu1 %v3243_v43, %s5126_s22 }
0x1d50   :  { %v3296_v58 = vpop.xlane.xlu1 %3295 }
0x1d52   :  { %v3299_v55 = vpop.xlane.xlu0 %3298 }
0x1d53   :  { %v3300_v63 = vmax.f32 %v3296_v58, %v3299_v55 }
0x1d54   :  { %v3370_v24 = vpop.permute.xlu1 %3369 }
0x1d55   :  { %v3301_v1 = vrot.slane %v3300_v63, 4 }
0x1d57   :  { %v3302_v4 = vmax.f32 %v3300_v63, %v3301_v1 }
0x1d59   :  { %v3303_v22 = vrot.slane %v3302_v4, 2 }
0x1d5b   :  { %v3304_v25 = vmax.f32 %v3302_v4, %v3303_v22 }
0x1d5d   :  { %v3305_v27 = vrot.slane %v3304_v25, 1 }
0x1d5f   :  { %v3306_v28 = vmax.f32 %v3304_v25, %v3305_v27 }
0x1d61   :  { %4856 = vpush %v3306_v28 }
0x1d92   :  { %s4857_s29 = spop %4856 }
0x1d93   :  { %v3308_v51 = vstv %s4857_s29  ;;  %s5138_s29 = smov 43  }
0x1d94   :  { %v3309_v53 = vsub.f32 %v3296_v58, %v3308_v51  ;;  %v3310_v12 = vsub.f32 %v3299_v55, %v3308_v51  ;;  %v2630_v51 = vsel %vm2629_vm15, %v5826_v5, 0.0  ;;  %v2874_v5 = vsel %vm2872_vm5, 1, %v5085_v0  ;;  %s4036_s1 = sld [smem:[%s6058_s0 + %s5138_s29]]  }
0x1d96   :  { %v3311_v30 = vmul.f32 1.442695, %v3309_v53  ;;  %v3313_v31 = vmul.f32 1.442695, %v3310_v12  ;;  %v2850_v53 = vsel %vm2848_vm2, 1, %v5085_v0  ;;  %v2851_v12 = vsel %vm2849_vm13, 1, %v5085_v0 }
0x1d98   :  { %5053 = vpow2.f32 %v3311_v30 }
0x1d99   :  { %5055 = vpow2.f32 %v3313_v31 }
0x1da2   :  { %v5054_v3 = vpop.eup %5053 }
0x1da3   :  { %v5056_v32 = vpop.eup %5055  ;;  %v3315_v33 = vmul.f32 %v5054_v3, %v5782_v34 }
0x1da4   :  { %v3316_v40 = vmul.f32 %v5056_v32, %v5784_v7 }
0x1da5   :  { %v3317_v35 = vsel %vm297_vm0, %v3315_v33, %v5054_v3 }
0x1da6   :  { %v3318_v39 = vsel %vm297_vm0, %v3316_v40, %v5056_v32 }
0x1da7   :  { %v3319_v45 = vpack.c.bf16 %v3318_v39, %v3317_v35 }
0x1da9   :  { %4672 = vmatpush3.bf16.msra.mxu0 %v3319_v45 }
0x1daa   :  { %4686 = vmatprep.subr.bf16.mxu0 %v5088_v13 }
0x1dac   :  { %4674 = vmatmul.mubr.msk.bf16.vlgmr.msra.gmra.mrb[100].mxu0 %vm491_vm8, %v5835_v9 }
0x1dad   :  { %4688 = vmatprep.mubr.msk.bf16.mxu0 %vm5089_vm1, %v5088_v13 }
0x1e7f   :  { %v3354_v57 = vpop.f32.mrb[100].mxu0 }
0x1e80   :  { %v3360_v47 = vmax.f32 %v3354_v57, 1e-20  ;;  %v4675_v11 = vpop.f32.mrb[101].mxu0 }
0x1e81   :  { %v3357_v62 = vpop.f32.mrb[102].mxu0 }
0x1e82   :  { %3363 = vperm.xlu0 %4963, %v3360_v47   ;;  %v4676_v37 = vpop.f32.mrb[103].mxu0 }
0x1e86   :  { %3377 = vrot.lane.b32.xlu0 %v3243_v43, %s5115_s4  ;;  %s5131_s4 = smov 38  }
0x1e87   :  { %s4031_s3 = sld [smem:[%s6058_s0 + %s5131_s4]]  }
0x1f01   :  { %v3364_v38 = vpop.permute.xlu0 %3363 }
0x1f02   :  { %5057 = vrcp.f32 %v3364_v38 }
0x1f05   :  { %v3378_v2 = vpop.permute.xlu0 %3377 }
0x1f0c   :  { %v5058_v54 = vpop.eup %5057 }
0x1f0d   :  { %v3367_v26 = vmul.f32 %v5058_v54, %v3354_v57 }
0x1f0f   :  { %3373 = vrot.lane.b32.xlu1 %v3367_v26, %s5092_s26 }
0x1f81   :  { %v3374_v14 = vpop.permute.xlu1 %3373 }
0x1f82   :  { %v3376_v41 = vsel %vm297_vm0, %v3370_v24, %v3374_v14 }
0x1f83   :  { %v3380_v42 = vsel %vm491_vm8, %v3376_v41, %v3378_v2 }
0x1f84   :  { %4684 = vmatmul.mubr.msk.f32.vlgmr.msra.gmra.mrb[94].mxu1 %vm2906_vm14, %v3380_v42 }
0x1f85   :  { %4694 = vmatprep.mubr.msk.bf16.mxu1 %vm5089_vm1, %v5088_v13 }
0x2057   :  { %v3450_v23 = vpop.f32.mrb[94].mxu1 }
0x2058   :  { %v3451_v16 = vadd.f32 %v5752_v60, %v3450_v23  ;;  %v4685_v17 = vpop.f32.mrb[95].mxu1 }
0x205a   :  { %5059 = vtanh.f32 %v3451_v16  ;;  %v4154_v44 = vmul.f32 -1.442695, %v3451_v16 }
0x205c   :  { %5061 = vpow2.f32 %v4154_v44  ;;  %v2828_v44 = vsel %vm2826_vm6, 1, %v5085_v0 }
0x2064   :  { %v5060_v43 = vpop.eup %5059 }
0x2065   :  { %3463 = vrot.lane.b32.xlu1 %v5060_v43, %s5093_s30 }
0x2066   :  { %v5062_v46 = vpop.eup %5061 }
0x2067   :  { %v3457_v19 = vadd.f32 1.0, %v5062_v46  ;;  %v2815_v46 = vmax.f32 %v5858_v21, 1e-20 }
0x2069   :  { %5063 = vrcp.f32 %v3457_v19  ;;  %v5130_v19 = vmov 16  }
0x2073   :  { %v5064_v18 = vpop.eup %5063 }
0x2074   :  { %v3461_v59 = vmul.f32 %v5064_v18, %v5888_v15 }
0x20d7   :  { %v3464_v49 = vpop.permute.xlu1 %3463 }
0x20d8   :  { %v3466_v48 = vmul.f32 %v5064_v18, %v3464_v49 }
0x20da   :  { %3468 = vrot.lane.b32.xlu0 %v3466_v48, %s5092_s26 }
0x214c   :  { %v3469_v56 = vpop.permute.xlu0 %3468 }
0x214d   :  { %v3471_v52 = vadd.f32 %v3469_v56, %v3461_v59 }
0x214f   :  { %5065 = vtanh.f32 %v3471_v52 }
0x2159   :  { %v5066_v60 = vpop.eup %5065 }
0x215a   :  { %3474 = vrot.lane.b32.xlu1 %v5066_v60, %s5098_s13 }
0x21cc   :  { %v3475_v61 = vpop.permute.xlu1 %3474 }
0x21cd   :  { %v3477_v50 = vmul.f32 %v5064_v18, %v3475_v61 }
0x21cf   :  { %v3478_v58 = vpack.c.bf16 %v3477_v50, %v3477_v50 }
0x21d1   :  { %3480 = vrot.lane.b32.xlu0 %v3478_v58, %s5126_s22 }
0x2243   :  { %v3481_v55 = vpop.permute.xlu0 %3480 }
0x2244   :  { %v3483_v63 = vand.u32 %v3481_v55, %v5831_v10 }
0x2246   :  { %4687 = vmatpush3.bf16.msra.mxu0 %v3483_v63 }
0x2247   :  { %4801 = vmatprep.subr.bf16.mxu0 %v5095_v6 }
0x2249   :  { %4689 = vmatmul.mubr.msk.bf16.vlgmr.msra.gmra.mrb[104].mxu0 %vm3008_vm12, %v5848_v36  ;;  %v2827_v36 = vsel %vm2825_vm10, 1, %v5085_v0 }
0x224a   :  { %4710 = vmatprep.mubr.msk.f32.mxu0 %vm5089_vm1, %v5088_v13 }
0x231c   :  { %v3519_v15 = vpop.f32.mrb[104].mxu0 }
0x231d   :  { %v3526_v1 = vmul.f32 %v3519_v15, %v5782_v34  ;;  %v4690_v4 = vpop.f32.mrb[105].mxu0 }
0x231e   :  { %v3522_v22 = vpop.f32.mrb[106].mxu0 }
0x231f   :  { %v3527_v25 = vmul.f32 %v3522_v22, %v5784_v7  ;;  %v4691_v27 = vpop.f32.mrb[107].mxu0  ;;  %v3528_v10 = vsel %vm297_vm0, %v3526_v1, 0.0 }
0x2320   :  { %3529 = vadd.xlane.f32.xlu1 %v3528_v10 }
0x2321   :  { %v3531_v28 = vsel %vm297_vm0, %v3527_v25, 0.0 }
0x2322   :  { %3532 = vadd.xlane.f32.xlu0 %v3531_v28 }
0x2324   :  { %2631 = vadd.xlane.f32.xlu1 %v2630_v51 }
0x2335   :  { %2830 = vperm.xlu1 %4917, %v2827_v36  }
0x2339   :  { %2853 = vperm.xlu1 %4917, %v2850_v53  }
0x233d   :  { %2856 = vperm.xlu1 %4917, %v2851_v12  }
0x2341   :  { %2879 = vperm.xlu1 %4917, %v2874_v5  }
0x2345   :  { %3603 = vrot.lane.b32.xlu1 %v3477_v50, %s5126_s22 }
0x23ad   :  { %v3530_v30 = vpop.xlane.xlu1 %3529 }
0x23af   :  { %v3533_v31 = vpop.xlane.xlu0 %3532 }
0x23b0   :  { %v3534_v3 = vmax.f32 %v3530_v30, %v3533_v31 }
0x23b1   :  { %v2632_v8 = vpop.xlane.xlu1 %2631 }
0x23b2   :  { %v3535_v32 = vrot.slane %v3534_v3, 4 }
0x23b4   :  { %v3536_v33 = vmax.f32 %v3534_v3, %v3535_v32 }
0x23b5   :  { %v2831_v18 = vpop.permute.xlu1 %2830 }
0x23b6   :  { %v3537_v40 = vrot.slane %v3536_v33, 2  ;;  %vm2835_vm12 = vcmp.eq.s32.totalorder %v2831_v18, 1  ;;  %v3722_v18 = vld [vmem:[%s5995_s6 + $0x10] sm:$0xff] }
0x23b7   :  { %v2837_v50 = vsel %vm2835_vm12, %v5782_v34, -3e+38 }
0x23b8   :  { %v3538_v35 = vmax.f32 %v3536_v33, %v3537_v40  ;;  %v2839_v63 = vsel %vm297_vm0, %v2837_v50, -inf }
0x23b9   :  { %v2854_v49 = vpop.permute.xlu1 %2853 }
0x23ba   :  { %v3539_v39 = vrot.slane %v3538_v35, 1  ;;  %vm2858_vm11 = vcmp.eq.s32.totalorder %v2854_v49, 1 }
0x23bb   :  { %v2860_v59 = vsel %vm2858_vm11, %v5782_v34, -3e+38 }
0x23bc   :  { %v3540_v45 = vmax.f32 %v3538_v35, %v3539_v39  ;;  %v2862_v56 = vsel %vm297_vm0, %v2860_v59, -inf }
0x23bd   :  { %v2857_v48 = vpop.permute.xlu1 %2856 }
0x23be   :  { %4858 = vpush %v3540_v45  ;;  %vm2859_vm3 = vcmp.eq.s32.totalorder %v2857_v48, 1  ;;  %v3723_v48 = vld [vmem:[%s5995_s6 + $0x18] sm:$0xff] }
0x23bf   :  { %v2861_v20 = vsel %vm2859_vm3, %v5784_v7, -3e+38  ;;  %v4814_v59 = vpack.c.bf16 %v3723_v48, %v3722_v18 }
0x23ef   :  { %s4859_s30 = spop %4858 }
0x23f0   :  { %v3542_v57 = vstv %s4859_s30 }
0x23f1   :  { %v3543_v47 = vsub.f32 %v3530_v30, %v3542_v57  ;;  %v3544_v11 = vsub.f32 %v3533_v31, %v3542_v57 }
0x23f3   :  { %v3545_v62 = vmul.f32 1.442695, %v3543_v47  ;;  %v3547_v37 = vmul.f32 1.442695, %v3544_v11 }
0x23f5   :  { %5067 = vpow2.f32 %v3545_v62 }
0x23f6   :  { %5069 = vpow2.f32 %v3547_v37 }
0x23ff   :  { %v5068_v38 = vpop.eup %5067 }
0x2400   :  { %v5070_v54 = vpop.eup %5069  ;;  %v3549_v26 = vmul.f32 %v5068_v38, %v5782_v34 }
0x2401   :  { %v3550_v24 = vmul.f32 %v5070_v54, %v5784_v7 }
0x2402   :  { %v3551_v14 = vsel %vm297_vm0, %v3549_v26, %v5068_v38  ;;  %v3632_v26 = vld [vmem:[%s4031_s3] sm:$0xff] }
0x2403   :  { %v3552_v2 = vsel %vm297_vm0, %v3550_v24, %v5070_v54  ;;  %v3633_v24 = vld [vmem:[%s4031_s3 + $0x8] sm:$0xff] }
0x2404   :  { %v3553_v41 = vpack.c.bf16 %v3552_v2, %v3551_v14  ;;  %v3634_v14 = vld [vmem:[%s4031_s3 + $0x10] sm:$0xff] }
0x2406   :  { %4693 = vmatpush3.bf16.msra.mxu1 %v3553_v41 }
0x2407   :  { %4810 = vmatprep.subr.bf16.mxu1 %v5095_v6 }
0x2409   :  { %4695 = vmatmul.mubr.msk.bf16.vlgmr.msra.gmra.mrb[104].mxu1 %vm491_vm8, %v5835_v9  ;;  %v2873_v9 = vsel %vm2871_vm7, 1, %v5085_v0 }
0x240a   :  { %4745 = vmatprep.mubr.msk.f32.mxu1 %vm5089_vm1, %v5088_v13 }
0x24dc   :  { %v3588_v42 = vpop.f32.mrb[104].mxu1 }
0x24dd   :  { %v3594_v23 = vmax.f32 %v3588_v42, 1e-20  ;;  %v4696_v16 = vpop.f32.mrb[105].mxu1 }
0x24de   :  { %v3591_v17 = vpop.f32.mrb[106].mxu1 }
0x24df   :  { %3597 = vperm.xlu0 %4963, %v3594_v23   ;;  %v4697_v43 = vpop.f32.mrb[107].mxu1  ;;  %v3635_v23 = vld [vmem:[%s4031_s3 + $0x18] sm:$0xff] }
0x24e0   :  { %v4805_v16 = vpack.c.bf16 %v3635_v23, %v3634_v14  ;;  %v3636_v43 = vld [vmem:[%s4031_s3 + $0x20] sm:$0xff] }
0x24e1   :  { %v4159_v14 = vld [vmem:[%s4034_s18] ss:$0 sm:$0xff] }
0x24e3   :  { %4964 = vset.pattern.permute.xlu0 %v5085_v0  ;;  %v2863_v0 = vsel %vm297_vm0, %v2861_v20, -inf }
0x24e4   :  { %2833 = vperm.xlu0 %4964, %v2828_v44   ;;  %v2864_v52 = vmax.f32 %v2862_v56, %v2863_v0  ;;  %v3637_v44 = vld [vmem:[%s4031_s3 + $0x28] sm:$0xff]  ;;  %v3724_v56 = vld [vmem:[%s5995_s6 + $0x20] sm:$0xff] }
0x24e6   :  { %v2865_v61 = vrot.slane %v2864_v52, 4 }
0x24e8   :  { %2876 = vperm.xlu0 %4964, %v2873_v9   ;;  %v2866_v15 = vmax.f32 %v2864_v52, %v2865_v61  ;;  %v4808_v9 = vpack.c.bf16 %v3637_v44, %v3636_v43  ;;  %v3725_v52 = vld [vmem:[%s5995_s6 + $0x28] sm:$0xff]  ;;  %v3727_v61 = vld [vmem:[%s5995_s6 + $0x38] sm:$0xff]  ;;  %v3906_v44 = vld [vmem:[%s4037_s23 + $0x10] sm:$0xff] }
0x24ea   :  { %v2867_v51 = vrot.slane %v2866_v15, 2 }
0x24ec   :  { %4965 = vset.pattern.permute.xlu0 %v5130_v19  ;;  %v2868_v33 = vmax.f32 %v2866_v15, %v2867_v51  ;;  %v3720_v19 = vld [vmem:[%s5995_s6] sm:$0xff]  ;;  %v3730_v15 = vld [vmem:[%s5995_s6 + $0x50] sm:$0xff] }
0x24ed   :  { %2818 = vperm.xlu0 %4965, %v2815_v46  }
0x24ee   :  { %v2869_v57 = vrot.slane %v2868_v33, 1 }
0x24f0   :  { %v2870_v37 = vmax.f32 %v2868_v33, %v2869_v57 }
0x24f1   :  { %4966 = vset.pattern.permute.xlu0 %v5129_v29  ;;  %v2880_v29 = vpop.permute.xlu1 %2879 }
0x24f2   :  { %vm2882_vm15 = vcmp.eq.s32.totalorder %v2880_v29, 1  ;;  %v3726_v29 = vld [vmem:[%s5995_s6 + $0x30] sm:$0xff] }
0x24f3   :  { %v2884_v4 = vsel %vm2882_vm15, %v5784_v7, -3e+38  ;;  %v4820_v50 = vpack.c.bf16 %v3727_v61, %v3726_v29 }
0x24f4   :  { %v2886_v36 = vsel %vm297_vm0, %v2884_v4, -inf }
0x24f5   :  { %v3604_v46 = vpop.permute.xlu1 %3603 }
0x255e   :  { %v3598_v60 = vpop.permute.xlu0 %3597 }
0x255f   :  { %5071 = vrcp.f32 %v3598_v60  ;;  %v4817_v60 = vpack.c.bf16 %v3725_v52, %v3724_v56 }
0x2560   :  { %5073 = vrcp.f32 %v2632_v8  ;;  %v3721_v8 = vld [vmem:[%s5995_s6 + $0x8] sm:$0xff] }
0x2561   :  { %v4811_v49 = vpack.c.bf16 %v3721_v8, %v3720_v19  ;;  %v100_v19 = vstv %s4038_s21  ;;  %v4160_v8 = vld [vmem:[%s4036_s1] ss:$0 sm:$0xff] }
0x2562   :  { %101 = vst [vmem:[#allocation3] sm:$0x1] %v100_v19 }
0x2563   :  { %v2834_v58 = vpop.permute.xlu0 %2833  ;;  %4812 = vmatpush3.bf16.msra.mxu1 %v4811_v49 }
0x2564   :  { %vm2836_vm10 = vcmp.eq.s32.totalorder %v2834_v58, 1  ;;  %4813 = vmatprep.subr.bf16.mxu1 %v5095_v6  ;;  %v3728_v58 = vld [vmem:[%s5995_s6 + $0x40] sm:$0xff] }
0x2565   :  { %v2838_v55 = vsel %vm2836_vm10, %v5784_v7, -3e+38 }
0x2566   :  { %v2840_v1 = vsel %vm297_vm0, %v2838_v55, -inf  ;;  %v3729_v55 = vld [vmem:[%s5995_s6 + $0x48] sm:$0xff] }
0x2567   :  { %v2841_v22 = vmax.f32 %v2839_v63, %v2840_v1  ;;  %v2877_v25 = vpop.permute.xlu0 %2876  ;;  %4815 = vmatpush3.bf16.msra.mxu1 %v4814_v59  ;;  %v4823_v63 = vpack.c.bf16 %v3729_v55, %v3728_v58  ;;  %v3731_v1 = vld [vmem:[%s5995_s6 + $0x58] sm:$0xff] }
0x2568   :  { %vm2881_vm2 = vcmp.eq.s32.totalorder %v2877_v25, 1  ;;  %4816 = vmatprep.subr.bf16.mxu1 %v5095_v6  ;;  %v4826_v4 = vpack.c.bf16 %v3731_v1, %v3730_v15  ;;  %v3733_v25 = vld [vmem:[%s5995_s6 + $0x68] sm:$0xff] }
0x2569   :  { %v5072_v27 = vpop.eup %5071  ;;  %v2842_v10 = vrot.slane %v2841_v22, 4  ;;  %v2883_v28 = vsel %vm2881_vm2, %v5782_v34, -3e+38  ;;  %v4162_v48 = vld [vmem:[#allocation3] ss:$0 sm:$0xff] }
0x256a   :  { %v2885_v53 = vsel %vm297_vm0, %v2883_v28, -inf  ;;  %v3601_v12 = vmul.f32 %v5072_v27, %v3588_v42  ;;  %v5074_v5 = vpop.eup %5073  ;;  %v4802_v42 = vpack.c.bf16 %v3633_v24, %v3632_v26 }
0x256b   :  { %v2843_v30 = vmax.f32 %v2841_v22, %v2842_v10  ;;  %v2887_v31 = vmax.f32 %v2885_v53, %v2886_v36  ;;  %v2824_v40 = vmul.f32 %v5074_v5, %v5858_v21  ;;  %4818 = vmatpush3.bf16.msra.mxu1 %v4817_v60  ;;  %v3732_v22 = vld [vmem:[%s5995_s6 + $0x60] sm:$0xff] }
0x256c   :  { %3607 = vrot.lane.b32.xlu1 %v3601_v12, %s5092_s26  ;;  %v2819_v3 = vpop.permute.xlu0 %2818  ;;  %4803 = vmatpush3.bf16.msra.mxu0 %v4802_v42  ;;  %v4829_v27 = vpack.c.bf16 %v3733_v25, %v3732_v22 }
0x256d   :  { %v2844_v7 = vrot.slane %v2843_v30, 2  ;;  %v2888_v32 = vrot.slane %v2887_v31, 4  ;;  %5075 = vrcp.f32 %v2819_v3  ;;  %4804 = vmatprep.subr.bf16.mxu0 %v5095_v6  ;;  %4819 = vmatprep.subr.bf16.mxu1 %v5095_v6  ;;  %v3735_v3 = vld [vmem:[%s5995_s6 + $0x78] sm:$0xff] }
0x256f   :  { %v2845_v35 = vmax.f32 %v2843_v30, %v2844_v7  ;;  %v2889_v39 = vmax.f32 %v2887_v31, %v2888_v32  ;;  %4821 = vmatpush3.bf16.msra.mxu1 %v4820_v50  ;;  %v3734_v31 = vld [vmem:[%s5995_s6 + $0x70] sm:$0xff] }
0x2570   :  { %3616 = vrot.lane.b32.xlu1 %v2824_v40, %s5098_s13  ;;  %4806 = vmatpush3.bf16.msra.mxu0 %v4805_v16  ;;  %v4832_v7 = vpack.c.bf16 %v3735_v3, %v3734_v31 }
0x2571   :  { %v2846_v34 = vrot.slane %v2845_v35, 1  ;;  %v2890_v45 = vrot.slane %v2889_v39, 2  ;;  %4807 = vmatprep.subr.bf16.mxu0 %v5095_v6  ;;  %4822 = vmatprep.subr.bf16.mxu1 %v5095_v6 }
0x2573   :  { %v2891_v47 = vmax.f32 %v2889_v39, %v2890_v45  ;;  %v2847_v11 = vmax.f32 %v2845_v35, %v2846_v34  ;;  %4824 = vmatpush3.bf16.msra.mxu1 %v4823_v63 }
0x2574   :  { %4809 = vmatpush3.bf16.msra.mxu0 %v4808_v9  ;;  %4825 = vmatprep.subr.bf16.mxu1 %v5095_v6  ;;  %v3907_v9 = vld [vmem:[%s4037_s23 + $0x18] sm:$0xff] }
0x2575   :  { %v2892_v62 = vrot.slane %v2891_v47, 1  ;;  %v2894_v54 = vsel %vm2344_vm4, %v2847_v11, %v2870_v37  ;;  %4834 = vmatprep.subr.bf16.mxu0 %v5095_v6  ;;  %vm3645_vm4 = vcmask 392192  }
0x2577   :  { %v2893_v38 = vmax.f32 %v2891_v47, %v2892_v62  ;;  %v5076_v2 = vpop.eup %5075  ;;  %4827 = vmatpush3.bf16.msra.mxu1 %v4826_v4  ;;  %v4157_v47 = vld [vmem:[%s4032_s14] ss:$0 sm:$0xff] }
0x2578   :  { %v2822_v17 = vmul.f32 %v5076_v2, %v5858_v21  ;;  %4828 = vmatprep.subr.bf16.mxu1 %v5095_v6  ;;  %v3904_v2 = vld [vmem:[%s4037_s23] sm:$0xff] }
0x2579   :  { %v2895_v41 = vsel %vm817_vm9, %v2894_v54, %v2893_v38  ;;  %vm3630_vm9 = vcmask 261120  }
0x257a   :  { %3612 = vrot.lane.b32.xlu0 %v2895_v41, %s5092_s26  ;;  %v3905_v41 = vld [vmem:[%s4037_s23 + $0x8] sm:$0xff] }
0x257b   :  { %4830 = vmatpush3.bf16.msra.mxu1 %v4829_v27 }
0x257c   :  { %4831 = vmatprep.subr.bf16.mxu1 %v5095_v6 }
0x257e   :  { %3620 = vrot.lane.b32.xlu0 %v2822_v17, %s5098_s13  ;;  %s5133_s13 = smov 42   ;;  %v4847_v17 = vpack.c.bf16 %v3905_v41, %v3904_v2 }
0x257f   :  { %4833 = vmatpush3.bf16.msra.mxu1 %v4832_v7  ;;  %s4035_s9 = sld [smem:[%s6058_s0 + %s5133_s13]]  }
0x2585   :  { %v3815_v32 = vld [vmem:[%s4035_s9 + $0x8] sm:$0xff]  ;;  %v3816_v33 = vld [vmem:[%s4035_s9 + $0x10] sm:$0xff]  ;;  %v3817_v35 = vld [vmem:[%s4035_s9 + $0x18] sm:$0xff] }
0x2586   :  { %v4838_v39 = vpack.c.bf16 %v3817_v35, %v3816_v33  ;;  %v3818_v34 = vld [vmem:[%s4035_s9 + $0x20] sm:$0xff]  ;;  %v3819_v45 = vld [vmem:[%s4035_s9 + $0x28] sm:$0xff]  ;;  %v3820_v54 = vld [vmem:[%s4035_s9 + $0x30] sm:$0xff] }
0x2587   :  { %v4841_v57 = vpack.c.bf16 %v3819_v45, %v3818_v34  ;;  %v3821_v26 = vld [vmem:[%s4035_s9 + $0x38] sm:$0xff] }
0x2588   :  { %v4844_v24 = vpack.c.bf16 %v3821_v26, %v3820_v54 }
0x25de   :  { %v3608_v20 = vpop.permute.xlu1 %3607 }
0x25df   :  { %v3610_v0 = vsel %vm297_vm0, %v3604_v46, %v3608_v20  ;;  %v4850_v46 = vpack.c.bf16 %v3907_v9, %v3906_v44 }
0x25e0   :  { %3624 = vrot.lane.b32.xlu1 %v3610_v0, %s5124_s11 }
0x25e2   :  { %v3617_v28 = vpop.permute.xlu1 %3616 }
0x25ec   :  { %v3613_v10 = vpop.permute.xlu0 %3612 }
0x25ed   :  { %v3627_v51 = vsel %vm297_vm0, %v5858_v21, %v3613_v10  ;;  %v3814_v21 = vld [vmem:[%s4035_s9] sm:$0xff]  ;;  %vm3829_vm0 = vcmask 523264  }
0x25ee   :  { %v3628_v53 = vsel %vm491_vm8, %v3627_v51, %v3617_v28  ;;  %v4835_v40 = vpack.c.bf16 %v3815_v32, %v3814_v21 }
0x25f0   :  { %v3621_v36 = vpop.permute.xlu0 %3620 }
0x25f1   :  { %v3629_v12 = vsel %vm2906_vm14, %v3628_v53, %v3621_v36 }
0x2652   :  { %v3625_v5 = vpop.permute.xlu1 %3624 }
0x2653   :  { %v3631_v30 = vsel %vm3630_vm9, %v3629_v12, %v3625_v5 }
0x2654   :  { %4711 = vmatmul.mubr.msk.f32.vlgmr.msra.gmra.mrb[108].mxu0 %vm3645_vm4, %v3631_v30 }
0x2655   :  { %4764 = vmatprep.mubr.msk.f32.mxu0 %vm5089_vm1, %v5088_v13  ;;  %4836 = vmatpush3.bf16.msra.mxu0 %v4835_v40 }
0x2656   :  { %4837 = vmatprep.subr.bf16.mxu0 %v5095_v6 }
0x2659   :  { %4839 = vmatpush3.bf16.msra.mxu0 %v4838_v39 }
0x265a   :  { %4840 = vmatprep.subr.bf16.mxu0 %v5095_v6 }
0x265d   :  { %4842 = vmatpush3.bf16.msra.mxu0 %v4841_v57 }
0x265e   :  { %4843 = vmatprep.subr.bf16.mxu0 %v5095_v6 }
0x2661   :  { %4845 = vmatpush3.bf16.msra.mxu0 %v4844_v24 }
0x2662   :  { %4846 = vmatprep.subr.bf16.mxu0 %v5095_v6 }
0x2727   :  { %v3715_v11 = vpop.f32.mrb[108].mxu0 }
0x2728   :  { %v3716_v62 = vadd.f32 %v4157_v47, %v3715_v11  ;;  %v4712_v37 = vpop.f32.mrb[109].mxu0 }
0x272a   :  { %v3719_v38 = vmax.f32 %v3716_v62, 0.0 }
0x272c   :  { %4746 = vmatmul.mubr.f32.vlgmr.msra.gmra.mrb[108].mxu1 %v3719_v38 }
0x27ff   :  { %v3809_v42 = vpop.f32.mrb[108].mxu1 }
0x2800   :  { %v3810_v23 = vadd.f32 %v4159_v14, %v3809_v42  ;;  %v4747_v16 = vpop.f32.mrb[109].mxu1 }
0x2802   :  { %v3813_v43 = vmax.f32 %v3810_v23, 0.0 }
0x2804   :  { %4765 = vmatmul.mubr.msk.f32.vlgmr.msra.gmra.mrb[110].mxu0 %vm3829_vm0, %v3813_v43 }
0x2805   :  { %4848 = vmatpush3.bf16.msra.mxu0 %v4847_v17  ;;  %4775 = vmatprep.mubr.msk.f32.mxu0 %vm5089_vm1, %v5088_v13  ;;  %vm3988_vm1 = vcmask 2048  }
0x2806   :  { %4849 = vmatprep.subr.bf16.mxu0 %v5095_v6 }
0x2809   :  { %4851 = vmatpush3.bf16.msra.mxu0 %v4850_v46 }
0x28d7   :  { %v3899_v13 = vpop.f32.mrb[110].mxu0 }
0x28d8   :  { %v3900_v18 = vadd.f32 %v4160_v8, %v3899_v13  ;;  %v4766_v6 = vpop.f32.mrb[111].mxu0 }
0x28da   :  { %v3903_v49 = vmax.f32 %v3900_v18, 0.0 }
0x28dc   :  { %4776 = vmatmul.mubr.msk.f32.vlgmr.msra.gmra.mrb[112].mxu0 %vm3630_vm9, %v3903_v49 }
0x29af   :  { %v3984_v20 = vpop.f32.mrb[112].mxu0 }
0x29b0   :  { %v3985_v59 = vadd.f32 %v4162_v48, %v3984_v20  ;;  %v4777_v0 = vpop.f32.mrb[113].mxu0 }
0x29b2   :  { %3989 = vst.msk [vmem:[%s4039_s5] sm:$0x7] %vm3988_vm1, %v3985_v59 }

</bundles_post_ra>
